<compile_context>
chip_gen: v7x
topology: tpu7x:2x2x1
jax: 0.10.0
libtpu: 0.0.40
codegen_flags: <defaults>
</compile_context>

<pallas_src>
import functools

import jax
import jax.numpy as jnp
from jax import lax
from jax.experimental import pallas as pl
from jax.experimental.pallas import tpu as pltpu


# ----------------------------- helpers ---------------------------------------
def _apply_act(y, act):
    if act == "relu":
        return jnp.maximum(y, 0.0)
    if act == "leakyrelu":
        return jnp.where(y >= 0.0, y, 0.2 * y)
    if act == "sigmoid":
        return 1.0 / (1.0 + jnp.exp(-y))
    if act == "tanh":
        return jnp.tanh(y)
    if act == "linear":
        return y
    raise ValueError(act)


def _pick_tile(total, candidates):
    for c in candidates:
        if total >= c and total % c == 0:
            return c
    return total


# 32 MiB scoped VMEM: above v5e's 16 MiB default, safely below v7x's 64 MiB
# physical; chosen tiles keep the per-step working set well under this.
_VMEM_LIMIT = 32 * 1024 * 1024


def _cparams(n_axes):
    return pltpu.CompilerParams(
        dimension_semantics=("parallel",) * n_axes,
        vmem_limit_bytes=_VMEM_LIMIT)


# ----------------------------- fc1 kernel ------------------------------------
def _fc_deconv_kernel(x_ref, w_ref, b_ref, o_ref, *, act):
    # fc1 (ConvTranspose2d K=8 on a 1x1 input) == matmul over channels.
    # x: (B, Cin); w: (Cin, TN); b: (1, TN); o: (B, TN)
    y = jnp.dot(x_ref[...], w_ref[...], preferred_element_type=jnp.float32)
    y = y + b_ref[...]
    o_ref[...] = _apply_act(y, act).astype(o_ref.dtype)


def fc_deconv(x2d, w, b, act, compute_dtype):
    """ConvTranspose2d(Cin, Cout, 8) on 1x1 spatial input. Returns (B, 8, 8, Cout)."""
    Cin, Cout, KH, KW = w.shape
    B = x2d.shape[0]
    N = KH * KW * Cout
    w_mat = jnp.transpose(w, (0, 2, 3, 1)).reshape(Cin, N).astype(compute_dtype)
    b_row = jnp.tile(b.astype(jnp.float32), KH * KW).reshape(1, N)
    tn = _pick_tile(N, (2048, 1024, 512, 256, 128))      # column-tile the big weight
    out = pl.pallas_call(
        functools.partial(_fc_deconv_kernel, act=act),
        grid=(N // tn,),
        in_specs=[
            pl.BlockSpec((B, Cin), lambda j: (0, 0)),
            pl.BlockSpec((Cin, tn), lambda j: (0, j)),
            pl.BlockSpec((1, tn), lambda j: (0, j)),
        ],
        out_specs=pl.BlockSpec((B, tn), lambda j: (0, j)),
        out_shape=jax.ShapeDtypeStruct((B, N), compute_dtype),
        compiler_params=_cparams(1),
    )(x2d.astype(compute_dtype), w_mat, b_row)
    return out.reshape(B, KH, KW, Cout)                   # NHWC


# --------------------- conv1 kernel: 3x3, stride 2, pad 1 ---------------------
def _tconv3x3_s2_kernel(xa_ref, xb_ref, w_ref, b_ref, o_ref, *, act):
    # Sub-pixel (output-parity) decomposition of ConvTranspose2d(3, s=2, p=1)
    # on an 8x8 input.  y[2a+rh, 2c+rw] is stored at parity p = 2*rh + rw:
    #   p=0 (ee): x[a,  c  ]@W11
    #   p=1 (eo): x[a,  c+1]@W10 + x[a,  c]@W12
    #   p=2 (oe): x[a+1,c  ]@W01 + x[a,  c]@W21
    #   p=3 (oo): x[a+1,c+1]@W00 + x[a+1,c]@W02 + x[a,c+1]@W20 + x[a,c]@W22
    # (W[kh,kw] is the *unflipped* ConvTranspose weight; out-of-range edge
    # entries read appended zeros and are cropped by the wrapper.)
    C1 = xa_ref.shape[-1]
    xa = xa_ref[0]                        # (9, 8, C1)  == x[i, j]   (+ zero row)
    xb = xb_ref[0]                        # (9, 8, C1)  == x[i, j+1] (+ zeros)
    A0 = xa[0:8].reshape(64, C1)          # x[i,   j]
    A1 = xa[1:9].reshape(64, C1)          # x[i+1, j]
    B0 = xb[0:8].reshape(64, C1)          # x[i,   j+1]
    B1 = xb[1:9].reshape(64, C1)          # x[i+1, j+1]
    bias = b_ref[...]                     # (1, TC2) f32

    def mm(v, kh, kw):
        return jnp.dot(v, w_ref[kh, kw], preferred_element_type=jnp.float32)

    dt = o_ref.dtype
    o_ref[0, 0] = _apply_act(mm(A0, 1, 1) + bias, act).astype(dt)
    o_ref[0, 1] = _apply_act(mm(B0, 1, 0) + mm(A0, 1, 2) + bias, act).astype(dt)
    o_ref[0, 2] = _apply_act(mm(A1, 0, 1) + mm(A0, 2, 1) + bias, act).astype(dt)
    o_ref[0, 3] = _apply_act(
        mm(B1, 0, 0) + mm(A1, 0, 2) + mm(B0, 2, 0) + mm(A0, 2, 2) + bias,
        act).astype(dt)


def tconv3x3_s2(h0, w, b, act, compute_dtype):
    """ConvTranspose2d(C1, C2, 3, stride=2, padding=1) on (B, 8, 8, C1) NHWC.

    Returns the 15x15 output packed by parity: out[b, 2*rh+rw, 8*a+c, :] ==
    y[b, 2*a+rh, 2*c+rw, :] (entries with spatial index >= 15 hold garbage and
    are cropped by the caller)."""
    C1, C2, K, _ = w.shape
    B = h0.shape[0]
    assert K == 3 and h0.shape[1:] == (8, 8, C1)
    hp = jnp.pad(h0, ((0, 0), (0, 1), (0, 1), (0, 0)))            # (B, 9, 9, C1)
    xa = hp[:, :, 0:8, :].astype(compute_dtype)                   # x[:, i, j]
    xb = hp[:, :, 1:9, :].astype(compute_dtype)                   # x[:, i, j+1]
    w_r = jnp.transpose(w, (2, 3, 0, 1)).astype(compute_dtype)    # (3, 3, C1, C2)
    b_row = b.reshape(1, C2).astype(jnp.float32)
    tc2 = _pick_tile(C2, (256, 128))
    # batch innermost -> the (3,3,C1,tc2) weight tile stays VMEM-resident
    # across the whole batch sweep (weight DMA'd only once per Cout tile).
    grid = (C2 // tc2, B)
    return pl.pallas_call(
        functools.partial(_tconv3x3_s2_kernel, act=act),
        grid=grid,
        in_specs=[
            pl.BlockSpec((1, 9, 8, C1), lambda j, bb: (bb, 0, 0, 0)),
            pl.BlockSpec((1, 9, 8, C1), lambda j, bb: (bb, 0, 0, 0)),
            pl.BlockSpec((3, 3, C1, tc2), lambda j, bb: (0, 0, 0, j)),
            pl.BlockSpec((1, tc2), lambda j, bb: (0, j)),
        ],
        out_specs=pl.BlockSpec((1, 4, 64, tc2), lambda j, bb: (bb, 0, 0, j)),
        out_shape=jax.ShapeDtypeStruct((B, 4, 64, C2), compute_dtype),
        compiler_params=_cparams(2),
    )(xa, xb, w_r, b_row)


# --------- conv2 (2x2, stride 2, pad 1) fused with conv3 (1x1) kernel ---------
def _tconv2x2_fused_1x1_kernel(x_ref, w2_ref, b2_ref, w3_ref, b3_ref, o_ref, *,
                               act, out_act, oc):
    # stride == kernel == 2  =>  the deconv is pointwise per input pixel: each
    # pixel produces an independent 2x2 output block (t = 2*kh + kw), so this
    # is 4 channel matmuls + the fused 1x1 conv3 reduction + both activations.
    x = x_ref[...]                        # (TM, C2)
    b2 = b2_ref[...]                      # (1, C3)  f32
    w3 = w3_ref[...]                      # (C3, oc) f32
    b3 = b3_ref[...]                      # (1, oc)  f32
    for t in range(4):                    # static unroll
        h = jnp.dot(x, w2_ref[t], preferred_element_type=jnp.float32) + b2
        h = _apply_act(h, act)
        z = jnp.dot(h, w3, preferred_element_type=jnp.float32) + b3
        o_ref[:, t * oc:(t + 1) * oc] = _apply_act(z, out_act).astype(o_ref.dtype)


def tconv2x2_fused_1x1(h1_pix, w2, b2, w3, b3, act, out_act, compute_dtype):
    """h1_pix: (Npix, C2) packed pixels. Returns (Npix, 4*oc) f32, column block
    t = 2*kh + kw is the (kh, kw) sub-pixel of each pixel's 2x2 output block."""
    C2, C3, K, _ = w2.shape
    oc = w3.shape[1]
    Npix = h1_pix.shape[0]
    assert K == 2 and w3.shape[0] == C3
    w2_r = jnp.transpose(w2, (2, 3, 0, 1)).reshape(4, C2, C3).astype(compute_dtype)
    b2_row = b2.reshape(1, C3).astype(jnp.float32)
    w3_m = w3.reshape(C3, oc).astype(jnp.float32)
    b3_row = b3.reshape(1, oc).astype(jnp.float32)
    tm = 256
    assert Npix % tm == 0
    return pl.pallas_call(
        functools.partial(_tconv2x2_fused_1x1_kernel, act=act, out_act=out_act, oc=oc),
        grid=(Npix // tm,),
        in_specs=[
            pl.BlockSpec((tm, C2), lambda i: (i, 0)),
            pl.BlockSpec((4, C2, C3), lambda i: (0, 0, 0)),   # resident weights
            pl.BlockSpec((1, C3), lambda i: (0, 0)),
            pl.BlockSpec((C3, oc), lambda i: (0, 0)),
            pl.BlockSpec((1, oc), lambda i: (0, 0)),
        ],
        out_specs=pl.BlockSpec((tm, 4 * oc), lambda i: (i, 0)),
        out_shape=jax.ShapeDtypeStruct((Npix, 4 * oc), jnp.float32),
        compiler_params=_cparams(1),
    )(h1_pix.astype(compute_dtype), w2_r, b2_row, w3_m, b3_row)


# ----------------------------- model ------------------------------------------
def init_deconvnet28_params(key, in_chan=1, out_chan=1, nh=32):
    """Deterministic synthetic init; PyTorch ConvTranspose2d layout (Cin, Cout, K, K)."""
    shapes = [
        (in_chan, nh * 32, 8, 8),   # fc1
        (nh * 32, nh * 16, 3, 3),   # conv1, stride 2, pad 1
        (nh * 16, nh * 8, 2, 2),    # conv2, stride 2, pad 1
        (nh * 8, out_chan, 1, 1),   # conv3
    ]
    params = []
    for i, s in enumerate(shapes):
        kw_, kb_ = jax.random.split(jax.random.fold_in(key, i))
        fan_in = s[0] * s[2] * s[3]
        scale = 1.0 / jnp.sqrt(jnp.float32(fan_in))
        w = scale * jax.random.normal(kw_, s, jnp.float32)
        b = scale * jax.random.normal(kb_, (s[1],), jnp.float32)
        params.append((w, b))
    return params


def deconvnet28_forward(params, x, activation="relu", out_activation="sigmoid",
                        compute_dtype=jnp.float32):
    """Mirrors DeConvNet28.forward for latent inputs.

    Accepts (B, Cin) or (B, Cin, 1, 1); returns NCHW (B, out_chan, 28, 28) f32."""
    if x.ndim == 2:
        x = x[:, :, None, None]
    if x.shape[2] != 1 or x.shape[3] != 1:
        # TODO(synk): fc1 on spatial (H, W > 1) inputs is not implemented in the
        # Pallas path; the decoder is only used with 1x1 latent inputs.
        raise NotImplementedError("DeConvNet28 Pallas path expects a 1x1 latent input")
    out_act = out_activation if out_activation in ("tanh", "sigmoid") else "linear"

    (wf, bf), (w1, b1), (w2, b2), (w3, b3) = params
    B = x.shape[0]
    C2 = w1.shape[1]
    oc = w3.shape[1]

    # fc1: column-tiled matmul, fused bias + activation.  (B, 8, 8, C1)
    h0 = fc_deconv(x[:, :, 0, 0], wf, bf, act=activation, compute_dtype=compute_dtype)

    # conv1 via sub-pixel decomposition -> parity-packed 15x15 activation
    # (B, 4, 64, C2); no zero-dilated input is ever built.
    h1p = tconv3x3_s2(h0, w1, b1, act=activation, compute_dtype=compute_dtype)

    # conv2 + act + conv3 + out_act, fused and pointwise over packed pixels.
    z = tconv2x2_fused_1x1(h1p.reshape(B * 4 * 64, C2), w2, b2, w3, b3,
                           act=activation, out_act=out_act,
                           compute_dtype=compute_dtype)

    # Pure index glue: interleave both 2x sub-pixel levels into the 28x28 map
    # and crop the transposed-conv padding.  For row ((b*4+2rh+rw)*64+8a+c) and
    # column (2*kh+kw)*oc+o, the output pixel is (H, W) = (4a+2rh+kh-1, 4c+2rw+kw-1).
    z = z.reshape(B, 2, 2, 8, 8, 2, 2, oc)            # (b, rh, rw, a, c, kh, kw, o)
    z = jnp.transpose(z, (0, 3, 1, 5, 4, 2, 6, 7))    # (b, a, rh, kh, c, rw, kw, o)
    z = z.reshape(B, 32, 32, oc)[:, 1:29, 1:29, :]    # crop padding=1 edges -> 28x28
    return jnp.transpose(z, (0, 3, 1, 2))             # NCHW (B, oc, 28, 28)


# ----------------------------- pure-JAX reference -----------------------------
def _ref_forward(params, x, activation="relu", out_activation="sigmoid"):
    if x.ndim == 2:
        x = x[:, :, None, None]
    out_act = out_activation if out_activation in ("tanh", "sigmoid") else "linear"

    def tconv(h, w, b, s, p):
        Cin, Cout, K, _ = w.shape
        w_conv = jnp.transpose(jnp.flip(w, axis=(2, 3)), (1, 0, 2, 3))  # OIHW
        y = lax.conv_general_dilated(
            h, w_conv, window_strides=(1, 1),
            padding=[(K - 1 - p, K - 1 - p)] * 2,
            lhs_dilation=(s, s),
            dimension_numbers=("NCHW", "OIHW", "NCHW"))
        return y + b[None, :, None, None]

    (wf, bf), (w1, b1), (w2, b2), (w3, b3) = params
    h = _apply_act(tconv(x.astype(jnp.float32), wf, bf, 1, 0), activation)
    h = _apply_act(tconv(h, w1, b1, 2, 1), activation)
    h = _apply_act(tconv(h, w2, b2, 2, 1), activation)
    h = _apply_act(tconv(h, w3, b3, 1, 0), out_act)
    return h


# ----------------------------- main -------------------------------------------
if __name__ == "__main__":
    key = jax.random.PRNGKey(0)
    batch, in_chan, out_chan, nh = 2, 4, 1, 2      # small synthetic config

    params = init_deconvnet28_params(jax.random.fold_in(key, 123),
                                     in_chan=in_chan, out_chan=out_chan, nh=nh)
    x = jax.random.normal(jax.random.fold_in(key, 7), (batch, in_chan), jnp.float32)

    # f32 path (default): matches the dense XLA reference tightly.
    fwd = jax.jit(lambda p, xx: deconvnet28_forward(p, xx))
    y = jax.block_until_ready(fwd(params, x))
    assert y.shape == (batch, out_chan, 28, 28), y.shape
    y_ref = _ref_forward(params, x)
    assert jnp.allclose(y, y_ref, rtol=2e-4, atol=2e-4), float(jnp.max(jnp.abs(y - y_ref)))

    # bf16 compute path (halved DMA bytes / doubled MXU rate, f32 accumulation).
    fwd_bf16 = jax.jit(lambda p, xx: deconvnet28_forward(p, xx, compute_dtype=jnp.bfloat16))
    y16 = jax.block_until_ready(fwd_bf16(params, x))
    assert float(jnp.max(jnp.abs(y16 - y_ref))) < 5e-2

    print("KERNEL_OK")
</pallas_src>

<mosaic_0001>
module attributes {stable_mosaic.version = 11 : i64} {
  func.func @_fc_deconv_kernel(%arg0: i32, %arg1: memref<2x4xf32, #tpu.memory_space<vmem>>, %arg2: memref<4x2048xf32, #tpu.memory_space<vmem>>, %arg3: memref<1x2048xf32, #tpu.memory_space<vmem>>, %arg4: memref<2x2048xf32, #tpu.memory_space<vmem>>) attributes {dimension_semantics = [#tpu.dimension_semantics<parallel>], iteration_bounds = array<i64: 2>, scalar_prefetch = 0 : i64, scratch_operands = 0 : i64, tpu.core_type = #tpu.core_type<tc>, window_params = [{pipeline_mode = #tpu.pipeline_mode<synchronous>, transform_indices = @transform_0, window_bounds = array<i64: 2, 4>}, {transform_indices = @transform_1, window_bounds = array<i64: 4, 2048>}, {transform_indices = @transform_2, window_bounds = array<i64: 1, 2048>}, {transform_indices = @transform_3, window_bounds = array<i64: 2, 2048>}]} {
    %c0 = arith.constant 0 : index
    %c0_0 = arith.constant 0 : index
    %0 = vector.load %arg1[%c0, %c0_0] : memref<2x4xf32, #tpu.memory_space<vmem>>, vector<2x4xf32>
    %c0_1 = arith.constant 0 : index
    %c0_2 = arith.constant 0 : index
    %1 = vector.load %arg2[%c0_1, %c0_2] : memref<4x2048xf32, #tpu.memory_space<vmem>>, vector<4x2048xf32>
    %cst = arith.constant dense<0.000000e+00> : vector<2x2048xf32>
    %2 = tpu.matmul %0, %1, %cst {dimension_numbers = #tpu.dot_dimension_numbers<[1], [0], [0], [1], [0, 0, 1, 1], [], []>} : vector<2x4xf32>, vector<4x2048xf32>, vector<2x2048xf32> -> vector<2x2048xf32>
    %c0_3 = arith.constant 0 : index
    %c0_4 = arith.constant 0 : index
    %3 = vector.load %arg3[%c0_3, %c0_4] : memref<1x2048xf32, #tpu.memory_space<vmem>>, vector<1x2048xf32>
    %4 = vector.broadcast %3 : vector<1x2048xf32> to vector<2x2048xf32>
    %5 = arith.addf %2, %4 : vector<2x2048xf32>
    %cst_5 = arith.constant 0.000000e+00 : f32
    %6 = vector.broadcast %cst_5 : f32 to vector<2x2048xf32>
    %7 = arith.maximumf %5, %6 : vector<2x2048xf32>
    %c0_6 = arith.constant 0 : index
    %c0_7 = arith.constant 0 : index
    %8 = vector.load %arg4[%c0_6, %c0_7] : memref<2x2048xf32, #tpu.memory_space<vmem>>, vector<2x2048xf32>
    tpu.vector_store %arg4[%c0_6, %c0_7], %7 {strides = array<i32>} : memref<2x2048xf32, #tpu.memory_space<vmem>>, vector<2x2048xf32>,
    return
  }
  func.func @transform_0(%arg0: i32) -> (i32, i32) {
    %c0_i32 = arith.constant 0 : i32
    %c0_i32_0 = arith.constant 0 : i32
    %c0_i32_1 = arith.constant 0 : i32
    return %c0_i32, %c0_i32_0 : i32, i32
  }
  func.func @transform_1(%arg0: i32) -> (i32, i32) {
    %c0_i32 = arith.constant 0 : i32
    %c0_i32_0 = arith.constant 0 : i32
    return %c0_i32, %arg0 : i32, i32
  }
  func.func @transform_2(%arg0: i32) -> (i32, i32) {
    %c0_i32 = arith.constant 0 : i32
    %c0_i32_0 = arith.constant 0 : i32
    return %c0_i32, %arg0 : i32, i32
  }
  func.func @transform_3(%arg0: i32) -> (i32, i32) {
    %c0_i32 = arith.constant 0 : i32
    %c0_i32_0 = arith.constant 0 : i32
    return %c0_i32, %arg0 : i32, i32
  }
}

module attributes {stable_mosaic.version = 11 : i64} {
  func.func @_tconv3x3_s2_kernel(%arg0: i32, %arg1: i32, %arg2: memref<1x9x8x64xf32, #tpu.memory_space<vmem>>, %arg3: memref<1x9x8x64xf32, #tpu.memory_space<vmem>>, %arg4: memref<3x3x64x32xf32, #tpu.memory_space<vmem>>, %arg5: memref<1x32xf32, #tpu.memory_space<vmem>>, %arg6: memref<1x4x64x32xf32, #tpu.memory_space<vmem>>) attributes {dimension_semantics = [#tpu.dimension_semantics<parallel>, #tpu.dimension_semantics<parallel>], iteration_bounds = array<i64: 1, 2>, scalar_prefetch = 0 : i64, scratch_operands = 0 : i64, tpu.core_type = #tpu.core_type<tc>, window_params = [{transform_indices = @transform_0, window_bounds = array<i64: 1, 9, 8, 64>}, {transform_indices = @transform_1, window_bounds = array<i64: 1, 9, 8, 64>}, {transform_indices = @transform_2, window_bounds = array<i64: 3, 3, 64, 32>}, {transform_indices = @transform_3, window_bounds = array<i64: 1, 32>}, {transform_indices = @transform_4, window_bounds = array<i64: 1, 4, 64, 32>}]} {
    %c0 = arith.constant 0 : index
    %c0_0 = arith.constant 0 : index
    %c0_1 = arith.constant 0 : index
    %c0_2 = arith.constant 0 : index
    %0 = vector.load %arg2[%c0, %c0_0, %c0_1, %c0_2] : memref<1x9x8x64xf32, #tpu.memory_space<vmem>>, vector<1x9x8x64xf32>
    %1 = vector.shape_cast %0 : vector<1x9x8x64xf32> to vector<9x8x64xf32>
    %c0_3 = arith.constant 0 : index
    %c0_4 = arith.constant 0 : index
    %c0_5 = arith.constant 0 : index
    %c0_6 = arith.constant 0 : index
    %2 = vector.load %arg3[%c0_3, %c0_4, %c0_5, %c0_6] : memref<1x9x8x64xf32, #tpu.memory_space<vmem>>, vector<1x9x8x64xf32>
    %3 = vector.shape_cast %2 : vector<1x9x8x64xf32> to vector<9x8x64xf32>
    %4 = vector.extract_strided_slice %1 {offsets = [0, 0, 0], sizes = [8, 8, 64], strides = [1, 1, 1]} : vector<9x8x64xf32> to vector<8x8x64xf32>
    %5 = vector.shape_cast %4 : vector<8x8x64xf32> to vector<64x64xf32>
    %6 = vector.extract_strided_slice %1 {offsets = [1, 0, 0], sizes = [8, 8, 64], strides = [1, 1, 1]} : vector<9x8x64xf32> to vector<8x8x64xf32>
    %7 = vector.shape_cast %6 : vector<8x8x64xf32> to vector<64x64xf32>
    %8 = vector.extract_strided_slice %3 {offsets = [0, 0, 0], sizes = [8, 8, 64], strides = [1, 1, 1]} : vector<9x8x64xf32> to vector<8x8x64xf32>
    %9 = vector.shape_cast %8 : vector<8x8x64xf32> to vector<64x64xf32>
    %10 = vector.extract_strided_slice %3 {offsets = [1, 0, 0], sizes = [8, 8, 64], strides = [1, 1, 1]} : vector<9x8x64xf32> to vector<8x8x64xf32>
    %11 = vector.shape_cast %10 : vector<8x8x64xf32> to vector<64x64xf32>
    %c0_7 = arith.constant 0 : index
    %c0_8 = arith.constant 0 : index
    %12 = vector.load %arg5[%c0_7, %c0_8] : memref<1x32xf32, #tpu.memory_space<vmem>>, vector<1x32xf32>
    %c1 = arith.constant 1 : index
    %c1_9 = arith.constant 1 : index
    %c0_10 = arith.constant 0 : index
    %c0_11 = arith.constant 0 : index
    %13 = vector.load %arg4[%c1, %c1_9, %c0_10, %c0_11] : memref<3x3x64x32xf32, #tpu.memory_space<vmem>>, vector<1x1x64x32xf32>
    %14 = vector.shape_cast %13 : vector<1x1x64x32xf32> to vector<64x32xf32>
    %cst = arith.constant dense<0.000000e+00> : vector<64x32xf32>
    %15 = tpu.matmul %5, %14, %cst {dimension_numbers = #tpu.dot_dimension_numbers<[1], [0], [0], [1], [0, 0, 1, 1], [], []>} : vector<64x64xf32>, vector<64x32xf32>, vector<64x32xf32> -> vector<64x32xf32>
    %16 = vector.broadcast %12 : vector<1x32xf32> to vector<64x32xf32>
    %17 = arith.addf %15, %16 : vector<64x32xf32>
    %cst_12 = arith.constant 0.000000e+00 : f32
    %18 = vector.broadcast %cst_12 : f32 to vector<64x32xf32>
    %19 = arith.maximumf %17, %18 : vector<64x32xf32>
    %c0_13 = arith.constant 0 : index
    %c0_14 = arith.constant 0 : index
    %c0_15 = arith.constant 0 : index
    %c0_16 = arith.constant 0 : index
    %20 = vector.load %arg6[%c0_13, %c0_14, %c0_15, %c0_16] : memref<1x4x64x32xf32, #tpu.memory_space<vmem>>, vector<1x1x64x32xf32>
    %21 = vector.shape_cast %20 : vector<1x1x64x32xf32> to vector<64x32xf32>
    %22 = vector.shape_cast %19 : vector<64x32xf32> to vector<1x1x64x32xf32>
    tpu.vector_store %arg6[%c0_13, %c0_14, %c0_15, %c0_16], %22 {strides = array<i32>} : memref<1x4x64x32xf32, #tpu.memory_space<vmem>>, vector<1x1x64x32xf32>,
    %c1_17 = arith.constant 1 : index
    %c0_18 = arith.constant 0 : index
    %c0_19 = arith.constant 0 : index
    %c0_20 = arith.constant 0 : index
    %23 = vector.load %arg4[%c1_17, %c0_18, %c0_19, %c0_20] : memref<3x3x64x32xf32, #tpu.memory_space<vmem>>, vector<1x1x64x32xf32>
    %24 = vector.shape_cast %23 : vector<1x1x64x32xf32> to vector<64x32xf32>
    %cst_21 = arith.constant dense<0.000000e+00> : vector<64x32xf32>
    %25 = tpu.matmul %9, %24, %cst_21 {dimension_numbers = #tpu.dot_dimension_numbers<[1], [0], [0], [1], [0, 0, 1, 1], [], []>} : vector<64x64xf32>, vector<64x32xf32>, vector<64x32xf32> -> vector<64x32xf32>
    %c1_22 = arith.constant 1 : index
    %c2 = arith.constant 2 : index
    %c0_23 = arith.constant 0 : index
    %c0_24 = arith.constant 0 : index
    %26 = vector.load %arg4[%c1_22, %c2, %c0_23, %c0_24] : memref<3x3x64x32xf32, #tpu.memory_space<vmem>>, vector<1x1x64x32xf32>
    %27 = vector.shape_cast %26 : vector<1x1x64x32xf32> to vector<64x32xf32>
    %cst_25 = arith.constant dense<0.000000e+00> : vector<64x32xf32>
    %28 = tpu.matmul %5, %27, %cst_25 {dimension_numbers = #tpu.dot_dimension_numbers<[1], [0], [0], [1], [0, 0, 1, 1], [], []>} : vector<64x64xf32>, vector<64x32xf32>, vector<64x32xf32> -> vector<64x32xf32>
    %29 = arith.addf %25, %28 : vector<64x32xf32>
    %30 = vector.broadcast %12 : vector<1x32xf32> to vector<64x32xf32>
    %31 = arith.addf %29, %30 : vector<64x32xf32>
    %cst_26 = arith.constant 0.000000e+00 : f32
    %32 = vector.broadcast %cst_26 : f32 to vector<64x32xf32>
    %33 = arith.maximumf %31, %32 : vector<64x32xf32>
    %c0_27 = arith.constant 0 : index
    %c1_28 = arith.constant 1 : index
    %c0_29 = arith.constant 0 : index
    %c0_30 = arith.constant 0 : index
    %34 = vector.load %arg6[%c0_27, %c1_28, %c0_29, %c0_30] : memref<1x4x64x32xf32, #tpu.memory_space<vmem>>, vector<1x1x64x32xf32>
    %35 = vector.shape_cast %34 : vector<1x1x64x32xf32> to vector<64x32xf32>
    %36 = vector.shape_cast %33 : vector<64x32xf32> to vector<1x1x64x32xf32>
    tpu.vector_store %arg6[%c0_27, %c1_28, %c0_29, %c0_30], %36 {strides = array<i32>} : memref<1x4x64x32xf32, #tpu.memory_space<vmem>>, vector<1x1x64x32xf32>,
    %c0_31 = arith.constant 0 : index
    %c1_32 = arith.constant 1 : index
    %c0_33 = arith.constant 0 : index
    %c0_34 = arith.constant 0 : index
    %37 = vector.load %arg4[%c0_31, %c1_32, %c0_33, %c0_34] : memref<3x3x64x32xf32, #tpu.memory_space<vmem>>, vector<1x1x64x32xf32>
    %38 = vector.shape_cast %37 : vector<1x1x64x32xf32> to vector<64x32xf32>
    %cst_35 = arith.constant dense<0.000000e+00> : vector<64x32xf32>
    %39 = tpu.matmul %7, %38, %cst_35 {dimension_numbers = #tpu.dot_dimension_numbers<[1], [0], [0], [1], [0, 0, 1, 1], [], []>} : vector<64x64xf32>, vector<64x32xf32>, vector<64x32xf32> -> vector<64x32xf32>
    %c2_36 = arith.constant 2 : index
    %c1_37 = arith.constant 1 : index
    %c0_38 = arith.constant 0 : index
    %c0_39 = arith.constant 0 : index
    %40 = vector.load %arg4[%c2_36, %c1_37, %c0_38, %c0_39] : memref<3x3x64x32xf32, #tpu.memory_space<vmem>>, vector<1x1x64x32xf32>
    %41 = vector.shape_cast %40 : vector<1x1x64x32xf32> to vector<64x32xf32>
    %cst_40 = arith.constant dense<0.000000e+00> : vector<64x32xf32>
    %42 = tpu.matmul %5, %41, %cst_40 {dimension_numbers = #tpu.dot_dimension_numbers<[1], [0], [0], [1], [0, 0, 1, 1], [], []>} : vector<64x64xf32>, vector<64x32xf32>, vector<64x32xf32> -> vector<64x32xf32>
    %43 = arith.addf %39, %42 : vector<64x32xf32>
    %44 = vector.broadcast %12 : vector<1x32xf32> to vector<64x32xf32>
    %45 = arith.addf %43, %44 : vector<64x32xf32>
    %cst_41 = arith.constant 0.000000e+00 : f32
    %46 = vector.broadcast %cst_41 : f32 to vector<64x32xf32>
    %47 = arith.maximumf %45, %46 : vector<64x32xf32>
    %c0_42 = arith.constant 0 : index
    %c2_43 = arith.constant 2 : index
    %c0_44 = arith.constant 0 : index
    %c0_45 = arith.constant 0 : index
    %48 = vector.load %arg6[%c0_42, %c2_43, %c0_44, %c0_45] : memref<1x4x64x32xf32, #tpu.memory_space<vmem>>, vector<1x1x64x32xf32>
    %49 = vector.shape_cast %48 : vector<1x1x64x32xf32> to vector<64x32xf32>
    %50 = vector.shape_cast %47 : vector<64x32xf32> to vector<1x1x64x32xf32>
    tpu.vector_store %arg6[%c0_42, %c2_43, %c0_44, %c0_45], %50 {strides = array<i32>} : memref<1x4x64x32xf32, #tpu.memory_space<vmem>>, vector<1x1x64x32xf32>,
    %c0_46 = arith.constant 0 : index
    %c0_47 = arith.constant 0 : index
    %c0_48 = arith.constant 0 : index
    %c0_49 = arith.constant 0 : index
    %51 = vector.load %arg4[%c0_46, %c0_47, %c0_48, %c0_49] : memref<3x3x64x32xf32, #tpu.memory_space<vmem>>, vector<1x1x64x32xf32>
    %52 = vector.shape_cast %51 : vector<1x1x64x32xf32> to vector<64x32xf32>
    %cst_50 = arith.constant dense<0.000000e+00> : vector<64x32xf32>
    %53 = tpu.matmul %11, %52, %cst_50 {dimension_numbers = #tpu.dot_dimension_numbers<[1], [0], [0], [1], [0, 0, 1, 1], [], []>} : vector<64x64xf32>, vector<64x32xf32>, vector<64x32xf32> -> vector<64x32xf32>
    %c0_51 = arith.constant 0 : index
    %c2_52 = arith.constant 2 : index
    %c0_53 = arith.constant 0 : index
    %c0_54 = arith.constant 0 : index
    %54 = vector.load %arg4[%c0_51, %c2_52, %c0_53, %c0_54] : memref<3x3x64x32xf32, #tpu.memory_space<vmem>>, vector<1x1x64x32xf32>
    %55 = vector.shape_cast %54 : vector<1x1x64x32xf32> to vector<64x32xf32>
    %cst_55 = arith.constant dense<0.000000e+00> : vector<64x32xf32>
    %56 = tpu.matmul %7, %55, %cst_55 {dimension_numbers = #tpu.dot_dimension_numbers<[1], [0], [0], [1], [0, 0, 1, 1], [], []>} : vector<64x64xf32>, vector<64x32xf32>, vector<64x32xf32> -> vector<64x32xf32>
    %57 = arith.addf %53, %56 : vector<64x32xf32>
    %c2_56 = arith.constant 2 : index
    %c0_57 = arith.constant 0 : index
    %c0_58 = arith.constant 0 : index
    %c0_59 = arith.constant 0 : index
    %58 = vector.load %arg4[%c2_56, %c0_57, %c0_58, %c0_59] : memref<3x3x64x32xf32, #tpu.memory_space<vmem>>, vector<1x1x64x32xf32>
    %59 = vector.shape_cast %58 : vector<1x1x64x32xf32> to vector<64x32xf32>
    %cst_60 = arith.constant dense<0.000000e+00> : vector<64x32xf32>
    %60 = tpu.matmul %9, %59, %cst_60 {dimension_numbers = #tpu.dot_dimension_numbers<[1], [0], [0], [1], [0, 0, 1, 1], [], []>} : vector<64x64xf32>, vector<64x32xf32>, vector<64x32xf32> -> vector<64x32xf32>
    %61 = arith.addf %57, %60 : vector<64x32xf32>
    %c2_61 = arith.constant 2 : index
    %c2_62 = arith.constant 2 : index
    %c0_63 = arith.constant 0 : index
    %c0_64 = arith.constant 0 : index
    %62 = vector.load %arg4[%c2_61, %c2_62, %c0_63, %c0_64] : memref<3x3x64x32xf32, #tpu.memory_space<vmem>>, vector<1x1x64x32xf32>
    %63 = vector.shape_cast %62 : vector<1x1x64x32xf32> to vector<64x32xf32>
    %cst_65 = arith.constant dense<0.000000e+00> : vector<64x32xf32>
    %64 = tpu.matmul %5, %63, %cst_65 {dimension_numbers = #tpu.dot_dimension_numbers<[1], [0], [0], [1], [0, 0, 1, 1], [], []>} : vector<64x64xf32>, vector<64x32xf32>, vector<64x32xf32> -> vector<64x32xf32>
    %65 = arith.addf %61, %64 : vector<64x32xf32>
    %66 = vector.broadcast %12 : vector<1x32xf32> to vector<64x32xf32>
    %67 = arith.addf %65, %66 : vector<64x32xf32>
    %cst_66 = arith.constant 0.000000e+00 : f32
    %68 = vector.broadcast %cst_66 : f32 to vector<64x32xf32>
    %69 = arith.maximumf %67, %68 : vector<64x32xf32>
    %c0_67 = arith.constant 0 : index
    %c3 = arith.constant 3 : index
    %c0_68 = arith.constant 0 : index
    %c0_69 = arith.constant 0 : index
    %70 = vector.load %arg6[%c0_67, %c3, %c0_68, %c0_69] : memref<1x4x64x32xf32, #tpu.memory_space<vmem>>, vector<1x1x64x32xf32>
    %71 = vector.shape_cast %70 : vector<1x1x64x32xf32> to vector<64x32xf32>
    %72 = vector.shape_cast %69 : vector<64x32xf32> to vector<1x1x64x32xf32>
    tpu.vector_store %arg6[%c0_67, %c3, %c0_68, %c0_69], %72 {strides = array<i32>} : memref<1x4x64x32xf32, #tpu.memory_space<vmem>>, vector<1x1x64x32xf32>,
    return
  }
  func.func @transform_0(%arg0: i32, %arg1: i32) -> (i32, i32, i32, i32) {
    %c0_i32 = arith.constant 0 : i32
    %c0_i32_0 = arith.constant 0 : i32
    %c0_i32_1 = arith.constant 0 : i32
    %c0_i32_2 = arith.constant 0 : i32
    return %arg1, %c0_i32, %c0_i32_0, %c0_i32_1 : i32, i32, i32, i32
  }
  func.func @transform_1(%arg0: i32, %arg1: i32) -> (i32, i32, i32, i32) {
    %c0_i32 = arith.constant 0 : i32
    %c0_i32_0 = arith.constant 0 : i32
    %c0_i32_1 = arith.constant 0 : i32
    %c0_i32_2 = arith.constant 0 : i32
    return %arg1, %c0_i32, %c0_i32_0, %c0_i32_1 : i32, i32, i32, i32
  }
  func.func @transform_2(%arg0: i32, %arg1: i32) -> (i32, i32, i32, i32) {
    %c0_i32 = arith.constant 0 : i32
    %c0_i32_0 = arith.constant 0 : i32
    %c0_i32_1 = arith.constant 0 : i32
    %c0_i32_2 = arith.constant 0 : i32
    return %c0_i32, %c0_i32_0, %c0_i32_1, %arg0 : i32, i32, i32, i32
  }
  func.func @transform_3(%arg0: i32, %arg1: i32) -> (i32, i32) {
    %c0_i32 = arith.constant 0 : i32
    %c0_i32_0 = arith.constant 0 : i32
    return %c0_i32, %arg0 : i32, i32
  }
  func.func @transform_4(%arg0: i32, %arg1: i32) -> (i32, i32, i32, i32) {
    %c0_i32 = arith.constant 0 : i32
    %c0_i32_0 = arith.constant 0 : i32
    %c0_i32_1 = arith.constant 0 : i32
    return %arg1, %c0_i32, %c0_i32_0, %arg0 : i32, i32, i32, i32
  }
}

module attributes {stable_mosaic.version = 11 : i64} {
  func.func @_tconv2x2_fused_1x1_kernel(%arg0: i32, %arg1: memref<256x32xf32, #tpu.memory_space<vmem>>, %arg2: memref<4x32x16xf32, #tpu.memory_space<vmem>>, %arg3: memref<1x16xf32, #tpu.memory_space<vmem>>, %arg4: memref<16x1xf32, #tpu.memory_space<vmem>>, %arg5: memref<1x1xf32, #tpu.memory_space<vmem>>, %arg6: memref<256x4xf32, #tpu.memory_space<vmem>>) attributes {dimension_semantics = [#tpu.dimension_semantics<parallel>], iteration_bounds = array<i64: 2>, scalar_prefetch = 0 : i64, scratch_operands = 0 : i64, tpu.core_type = #tpu.core_type<tc>, window_params = [{transform_indices = @transform_0, window_bounds = array<i64: 256, 32>}, {pipeline_mode = #tpu.pipeline_mode<synchronous>, transform_indices = @transform_1, window_bounds = array<i64: 4, 32, 16>}, {pipeline_mode = #tpu.pipeline_mode<synchronous>, transform_indices = @transform_2, window_bounds = array<i64: 1, 16>}, {pipeline_mode = #tpu.pipeline_mode<synchronous>, transform_indices = @transform_3, window_bounds = array<i64: 16, 1>}, {pipeline_mode = #tpu.pipeline_mode<synchronous>, transform_indices = @transform_4, window_bounds = array<i64: 1, 1>}, {transform_indices = @transform_5, window_bounds = array<i64: 256, 4>}]} {
    %c0 = arith.constant 0 : index
    %c0_0 = arith.constant 0 : index
    %0 = vector.load %arg1[%c0, %c0_0] : memref<256x32xf32, #tpu.memory_space<vmem>>, vector<256x32xf32>
    %c0_1 = arith.constant 0 : index
    %c0_2 = arith.constant 0 : index
    %1 = vector.load %arg3[%c0_1, %c0_2] : memref<1x16xf32, #tpu.memory_space<vmem>>, vector<1x16xf32>
    %c0_3 = arith.constant 0 : index
    %c0_4 = arith.constant 0 : index
    %2 = vector.load %arg4[%c0_3, %c0_4] : memref<16x1xf32, #tpu.memory_space<vmem>>, vector<16x1xf32>
    %c0_5 = arith.constant 0 : index
    %c0_6 = arith.constant 0 : index
    %3 = vector.load %arg5[%c0_5, %c0_6] : memref<1x1xf32, #tpu.memory_space<vmem>>, vector<1x1xf32>
    %c0_7 = arith.constant 0 : index
    %c0_8 = arith.constant 0 : index
    %c0_9 = arith.constant 0 : index
    %4 = vector.load %arg2[%c0_7, %c0_8, %c0_9] : memref<4x32x16xf32, #tpu.memory_space<vmem>>, vector<1x32x16xf32>
    %5 = vector.shape_cast %4 : vector<1x32x16xf32> to vector<32x16xf32>
    %cst = arith.constant dense<0.000000e+00> : vector<256x16xf32>
    %6 = tpu.matmul %0, %5, %cst {dimension_numbers = #tpu.dot_dimension_numbers<[1], [0], [0], [1], [0, 0, 1, 1], [], []>} : vector<256x32xf32>, vector<32x16xf32>, vector<256x16xf32> -> vector<256x16xf32>
    %7 = vector.broadcast %1 : vector<1x16xf32> to vector<256x16xf32>
    %8 = arith.addf %6, %7 : vector<256x16xf32>
    %cst_10 = arith.constant 0.000000e+00 : f32
    %9 = vector.broadcast %cst_10 : f32 to vector<256x16xf32>
    %10 = arith.maximumf %8, %9 : vector<256x16xf32>
    %cst_11 = arith.constant dense<0.000000e+00> : vector<256x1xf32>
    %11 = tpu.matmul %10, %2, %cst_11 {dimension_numbers = #tpu.dot_dimension_numbers<[1], [0], [0], [1], [0, 0, 1, 1], [], []>} : vector<256x16xf32>, vector<16x1xf32>, vector<256x1xf32> -> vector<256x1xf32>
    %12 = vector.broadcast %3 : vector<1x1xf32> to vector<256x1xf32>
    %13 = arith.addf %11, %12 : vector<256x1xf32>
    %cst_12 = arith.constant 0.000000e+00 : f32
    %14 = vector.broadcast %cst_12 : f32 to vector<256x1xf32>
    %15 = arith.subf %14, %13 : vector<256x1xf32>
    %16 = math.exp %15 : vector<256x1xf32>
    %cst_13 = arith.constant 1.000000e+00 : f32
    %17 = vector.broadcast %cst_13 : f32 to vector<256x1xf32>
    %18 = arith.addf %17, %16 : vector<256x1xf32>
    %cst_14 = arith.constant 1.000000e+00 : f32
    %19 = vector.broadcast %cst_14 : f32 to vector<256x1xf32>
    %20 = arith.divf %19, %18 : vector<256x1xf32>
    %c0_15 = arith.constant 0 : index
    %c0_16 = arith.constant 0 : index
    %21 = vector.load %arg6[%c0_15, %c0_16] : memref<256x4xf32, #tpu.memory_space<vmem>>, vector<256x1xf32>
    tpu.vector_store %arg6[%c0_15, %c0_16], %20 {strides = array<i32>} : memref<256x4xf32, #tpu.memory_space<vmem>>, vector<256x1xf32>,
    %c1 = arith.constant 1 : index
    %c0_17 = arith.constant 0 : index
    %c0_18 = arith.constant 0 : index
    %22 = vector.load %arg2[%c1, %c0_17, %c0_18] : memref<4x32x16xf32, #tpu.memory_space<vmem>>, vector<1x32x16xf32>
    %23 = vector.shape_cast %22 : vector<1x32x16xf32> to vector<32x16xf32>
    %cst_19 = arith.constant dense<0.000000e+00> : vector<256x16xf32>
    %24 = tpu.matmul %0, %23, %cst_19 {dimension_numbers = #tpu.dot_dimension_numbers<[1], [0], [0], [1], [0, 0, 1, 1], [], []>} : vector<256x32xf32>, vector<32x16xf32>, vector<256x16xf32> -> vector<256x16xf32>
    %25 = vector.broadcast %1 : vector<1x16xf32> to vector<256x16xf32>
    %26 = arith.addf %24, %25 : vector<256x16xf32>
    %cst_20 = arith.constant 0.000000e+00 : f32
    %27 = vector.broadcast %cst_20 : f32 to vector<256x16xf32>
    %28 = arith.maximumf %26, %27 : vector<256x16xf32>
    %cst_21 = arith.constant dense<0.000000e+00> : vector<256x1xf32>
    %29 = tpu.matmul %28, %2, %cst_21 {dimension_numbers = #tpu.dot_dimension_numbers<[1], [0], [0], [1], [0, 0, 1, 1], [], []>} : vector<256x16xf32>, vector<16x1xf32>, vector<256x1xf32> -> vector<256x1xf32>
    %30 = vector.broadcast %3 : vector<1x1xf32> to vector<256x1xf32>
    %31 = arith.addf %29, %30 : vector<256x1xf32>
    %cst_22 = arith.constant 0.000000e+00 : f32
    %32 = vector.broadcast %cst_22 : f32 to vector<256x1xf32>
    %33 = arith.subf %32, %31 : vector<256x1xf32>
    %34 = math.exp %33 : vector<256x1xf32>
    %cst_23 = arith.constant 1.000000e+00 : f32
    %35 = vector.broadcast %cst_23 : f32 to vector<256x1xf32>
    %36 = arith.addf %35, %34 : vector<256x1xf32>
    %cst_24 = arith.constant 1.000000e+00 : f32
    %37 = vector.broadcast %cst_24 : f32 to vector<256x1xf32>
    %38 = arith.divf %37, %36 : vector<256x1xf32>
    %c0_25 = arith.constant 0 : index
    %c1_26 = arith.constant 1 : index
    %39 = vector.load %arg6[%c0_25, %c1_26] : memref<256x4xf32, #tpu.memory_space<vmem>>, vector<256x1xf32>
    tpu.vector_store %arg6[%c0_25, %c1_26], %38 {strides = array<i32>} : memref<256x4xf32, #tpu.memory_space<vmem>>, vector<256x1xf32>,
    %c2 = arith.constant 2 : index
    %c0_27 = arith.constant 0 : index
    %c0_28 = arith.constant 0 : index
    %40 = vector.load %arg2[%c2, %c0_27, %c0_28] : memref<4x32x16xf32, #tpu.memory_space<vmem>>, vector<1x32x16xf32>
    %41 = vector.shape_cast %40 : vector<1x32x16xf32> to vector<32x16xf32>
    %cst_29 = arith.constant dense<0.000000e+00> : vector<256x16xf32>
    %42 = tpu.matmul %0, %41, %cst_29 {dimension_numbers = #tpu.dot_dimension_numbers<[1], [0], [0], [1], [0, 0, 1, 1], [], []>} : vector<256x32xf32>, vector<32x16xf32>, vector<256x16xf32> -> vector<256x16xf32>
    %43 = vector.broadcast %1 : vector<1x16xf32> to vector<256x16xf32>
    %44 = arith.addf %42, %43 : vector<256x16xf32>
    %cst_30 = arith.constant 0.000000e+00 : f32
    %45 = vector.broadcast %cst_30 : f32 to vector<256x16xf32>
    %46 = arith.maximumf %44, %45 : vector<256x16xf32>
    %cst_31 = arith.constant dense<0.000000e+00> : vector<256x1xf32>
    %47 = tpu.matmul %46, %2, %cst_31 {dimension_numbers = #tpu.dot_dimension_numbers<[1], [0], [0], [1], [0, 0, 1, 1], [], []>} : vector<256x16xf32>, vector<16x1xf32>, vector<256x1xf32> -> vector<256x1xf32>
    %48 = vector.broadcast %3 : vector<1x1xf32> to vector<256x1xf32>
    %49 = arith.addf %47, %48 : vector<256x1xf32>
    %cst_32 = arith.constant 0.000000e+00 : f32
    %50 = vector.broadcast %cst_32 : f32 to vector<256x1xf32>
    %51 = arith.subf %50, %49 : vector<256x1xf32>
    %52 = math.exp %51 : vector<256x1xf32>
    %cst_33 = arith.constant 1.000000e+00 : f32
    %53 = vector.broadcast %cst_33 : f32 to vector<256x1xf32>
    %54 = arith.addf %53, %52 : vector<256x1xf32>
    %cst_34 = arith.constant 1.000000e+00 : f32
    %55 = vector.broadcast %cst_34 : f32 to vector<256x1xf32>
    %56 = arith.divf %55, %54 : vector<256x1xf32>
    %c0_35 = arith.constant 0 : index
    %c2_36 = arith.constant 2 : index
    %57 = vector.load %arg6[%c0_35, %c2_36] : memref<256x4xf32, #tpu.memory_space<vmem>>, vector<256x1xf32>
    tpu.vector_store %arg6[%c0_35, %c2_36], %56 {strides = array<i32>} : memref<256x4xf32, #tpu.memory_space<vmem>>, vector<256x1xf32>,
    %c3 = arith.constant 3 : index
    %c0_37 = arith.constant 0 : index
    %c0_38 = arith.constant 0 : index
    %58 = vector.load %arg2[%c3, %c0_37, %c0_38] : memref<4x32x16xf32, #tpu.memory_space<vmem>>, vector<1x32x16xf32>
    %59 = vector.shape_cast %58 : vector<1x32x16xf32> to vector<32x16xf32>
    %cst_39 = arith.constant dense<0.000000e+00> : vector<256x16xf32>
    %60 = tpu.matmul %0, %59, %cst_39 {dimension_numbers = #tpu.dot_dimension_numbers<[1], [0], [0], [1], [0, 0, 1, 1], [], []>} : vector<256x32xf32>, vector<32x16xf32>, vector<256x16xf32> -> vector<256x16xf32>
    %61 = vector.broadcast %1 : vector<1x16xf32> to vector<256x16xf32>
    %62 = arith.addf %60, %61 : vector<256x16xf32>
    %cst_40 = arith.constant 0.000000e+00 : f32
    %63 = vector.broadcast %cst_40 : f32 to vector<256x16xf32>
    %64 = arith.maximumf %62, %63 : vector<256x16xf32>
    %cst_41 = arith.constant dense<0.000000e+00> : vector<256x1xf32>
    %65 = tpu.matmul %64, %2, %cst_41 {dimension_numbers = #tpu.dot_dimension_numbers<[1], [0], [0], [1], [0, 0, 1, 1], [], []>} : vector<256x16xf32>, vector<16x1xf32>, vector<256x1xf32> -> vector<256x1xf32>
    %66 = vector.broadcast %3 : vector<1x1xf32> to vector<256x1xf32>
    %67 = arith.addf %65, %66 : vector<256x1xf32>
    %cst_42 = arith.constant 0.000000e+00 : f32
    %68 = vector.broadcast %cst_42 : f32 to vector<256x1xf32>
    %69 = arith.subf %68, %67 : vector<256x1xf32>
    %70 = math.exp %69 : vector<256x1xf32>
    %cst_43 = arith.constant 1.000000e+00 : f32
    %71 = vector.broadcast %cst_43 : f32 to vector<256x1xf32>
    %72 = arith.addf %71, %70 : vector<256x1xf32>
    %cst_44 = arith.constant 1.000000e+00 : f32
    %73 = vector.broadcast %cst_44 : f32 to vector<256x1xf32>
    %74 = arith.divf %73, %72 : vector<256x1xf32>
    %c0_45 = arith.constant 0 : index
    %c3_46 = arith.constant 3 : index
    %75 = vector.load %arg6[%c0_45, %c3_46] : memref<256x4xf32, #tpu.memory_space<vmem>>, vector<256x1xf32>
    tpu.vector_store %arg6[%c0_45, %c3_46], %74 {strides = array<i32>} : memref<256x4xf32, #tpu.memory_space<vmem>>, vector<256x1xf32>,
    return
  }
  func.func @transform_0(%arg0: i32) -> (i32, i32) {
    %c0_i32 = arith.constant 0 : i32
    %c0_i32_0 = arith.constant 0 : i32
    return %arg0, %c0_i32 : i32, i32
  }
  func.func @transform_1(%arg0: i32) -> (i32, i32, i32) {
    %c0_i32 = arith.constant 0 : i32
    %c0_i32_0 = arith.constant 0 : i32
    %c0_i32_1 = arith.constant 0 : i32
    %c0_i32_2 = arith.constant 0 : i32
    return %c0_i32, %c0_i32_0, %c0_i32_1 : i32, i32, i32
  }
  func.func @transform_2(%arg0: i32) -> (i32, i32) {
    %c0_i32 = arith.constant 0 : i32
    %c0_i32_0 = arith.constant 0 : i32
    %c0_i32_1 = arith.constant 0 : i32
    return %c0_i32, %c0_i32_0 : i32, i32
  }
  func.func @transform_3(%arg0: i32) -> (i32, i32) {
    %c0_i32 = arith.constant 0 : i32
    %c0_i32_0 = arith.constant 0 : i32
    %c0_i32_1 = arith.constant 0 : i32
    return %c0_i32, %c0_i32_0 : i32, i32
  }
  func.func @transform_4(%arg0: i32) -> (i32, i32) {
    %c0_i32 = arith.constant 0 : i32
    %c0_i32_0 = arith.constant 0 : i32
    %c0_i32_1 = arith.constant 0 : i32
    return %c0_i32, %c0_i32_0 : i32, i32
  }
  func.func @transform_5(%arg0: i32) -> (i32, i32) {
    %c0_i32 = arith.constant 0 : i32
    %c0_i32_0 = arith.constant 0 : i32
    return %arg0, %c0_i32 : i32, i32
  }
}

</mosaic_0001>

<bundles_post_ra>
// kernel: tile.8
= control target key start
LH: loop header
LB: loop body
LE: loop exit
PB: predicated region body
PF: predicated region fallthrough
CT: control target
= control target key end

     0   :  { %s64_s0 = inlined_call_operand.vmem [shape: f32[64], index: 0, kind: input, shape index: {}]   ;;  %s65_s1 = inlined_call_operand.vmem [shape: f32[64,64], index: 1, kind: output, shape index: {}]  }
   0x1   :  { %v4_v0 = vld [vmem:[%s64_s0] ss:$0 sm:$0xff] }
   0x2   :  { %5 = vst [vmem:[%s65_s1] sm:$0xff] %v4_v0  ;;  %20 = vst [vmem:[%s65_s1 + $0x8] sm:$0xff] %v4_v0 }
   0x3   :  { %21 = vst [vmem:[%s65_s1 + $0x10] sm:$0xff] %v4_v0  ;;  %22 = vst [vmem:[%s65_s1 + $0x18] sm:$0xff] %v4_v0 }
   0x4   :  { %23 = vst [vmem:[%s65_s1 + $0x20] sm:$0xff] %v4_v0  ;;  %24 = vst [vmem:[%s65_s1 + $0x28] sm:$0xff] %v4_v0 }
   0x5   :  { %25 = vst [vmem:[%s65_s1 + $0x30] sm:$0xff] %v4_v0  ;;  %26 = vst [vmem:[%s65_s1 + $0x38] sm:$0xff] %v4_v0 }

// kernel: tile.9
= control target key start
LH: loop header
LB: loop body
LE: loop exit
PB: predicated region body
PF: predicated region fallthrough
CT: control target
= control target key end

     0   :  { %s321_s10 = smov 64   ;;  %vm3_vm0 = vcmask 523264   ;;  %vm31_vm1 = vcmask 1048064   ;;  %s452_s0 = inlined_call_operand.vmem [shape: f32[64,64], index: 0, kind: input, shape index: {}]   ;;  %s453_s1 = inlined_call_operand.vmem [shape: f32[1,4096], index: 1, kind: output, shape index: {}]  }
   0x1   :  { %v287_v0 = vld [vmem:[%s452_s0 + $0x21] ss:$2 sm:$0xff]   ;;  %v288_v2 = vld [vmem:[%s452_s0 + $0x31] ss:$2 sm:$0xff]   ;;  %v283_v4 = vld [vmem:[%s452_s0 + $0x20] ss:$2 sm:$0xff]  }
   0x2   :  { %v285_v1 = vld [vmem:[%s452_s0 + $0x1] ss:$2 sm:$0xff]   ;;  %45 = vrot.lane.b32.xlu1 %v287_v0, %s321_s10  ;;  %v286_v3 = vld [vmem:[%s452_s0 + $0x11] ss:$2 sm:$0xff]   ;;  %v2_v5 = vld [vmem:[%s452_s0] ss:$2 sm:$0xff]  }
   0x3   :  { %29 = vrot.lane.b32.xlu0 %v285_v1, %s321_s10  ;;  %v284_v6 = vld [vmem:[%s452_s0 + $0x30] ss:$2 sm:$0xff]   ;;  %17 = vst.msk [vmem:[#allocation0 + $0x80] ss:$8 sm:$0xf] %vm3_vm0, %v283_v4  }
   0x4   :  { %19 = vst.msk [vmem:[#allocation0 + $0x80] ss:$8 sm:$0xf0] %vm3_vm0, %v283_v4   ;;  %4 = vst.msk [vmem:[#allocation0] ss:$8 sm:$0xf] %vm3_vm0, %v2_v5  }
   0x5   :  { %5 = vst.msk [vmem:[#allocation0] ss:$8 sm:$0xf0] %vm3_vm0, %v2_v5   ;;  %24 = vst.msk [vmem:[#allocation0 + $0xc0] ss:$8 sm:$0xf] %vm3_vm0, %v284_v6  }
   0x6   :  { %26 = vst.msk [vmem:[#allocation0 + $0xc0] ss:$8 sm:$0xf0] %vm3_vm0, %v284_v6   ;;  %v282_v7 = vld [vmem:[%s452_s0 + $0x10] ss:$2 sm:$0xff]   ;;  %54 = vrot.lane.b32.xlu1 %v288_v2, %s321_s10 }
   0x7   :  { %10 = vst.msk [vmem:[#allocation0 + $0x40] ss:$8 sm:$0xf] %vm3_vm0, %v282_v7   ;;  %12 = vst.msk [vmem:[#allocation0 + $0x40] ss:$8 sm:$0xf0] %vm3_vm0, %v282_v7   ;;  %36 = vrot.lane.b32.xlu0 %v286_v3, %s321_s10 }
  0x74   :  { %v46_v8 = vpop.permute.xlu1 %45  }
  0x75   :  { %v30_v9 = vpop.permute.xlu0 %29   ;;  %49 = vst.msk [vmem:[#allocation0 + $0x80] ss:$8 sm:$0xf] %vm31_vm1, %v46_v8   ;;  %51 = vst.msk [vmem:[#allocation0 + $0x80] ss:$8 sm:$0xf0] %vm31_vm1, %v46_v8  }
  0x76   :  { %32 = vst.msk [vmem:[#allocation0] ss:$8 sm:$0xf] %vm31_vm1, %v30_v9   ;;  %33 = vst.msk [vmem:[#allocation0] ss:$8 sm:$0xf0] %vm31_vm1, %v30_v9  }
  0x78   :  { %v55_v10 = vpop.permute.xlu1 %54  }
  0x79   :  { %v37_v11 = vpop.permute.xlu0 %36   ;;  %58 = vst.msk [vmem:[#allocation0 + $0xc0] ss:$8 sm:$0xf] %vm31_vm1, %v55_v10   ;;  %60 = vst.msk [vmem:[#allocation0 + $0xc0] ss:$8 sm:$0xf0] %vm31_vm1, %v55_v10  }
  0x7a   :  { %40 = vst.msk [vmem:[#allocation0 + $0x40] ss:$8 sm:$0xf] %vm31_vm1, %v37_v11   ;;  %42 = vst.msk [vmem:[#allocation0 + $0x40] ss:$8 sm:$0xf0] %vm31_vm1, %v37_v11  }
  0x7c   :  { %v157_v12 = vld [vmem:[#allocation0 + $0x80] sm:$0x1]  ;;  %v163_v13 = vld [vmem:[#allocation0 + $0x88] sm:$0x1]  ;;  %v169_v14 = vld [vmem:[#allocation0 + $0x90] sm:$0x1] }
  0x7d   :  { %304 = vst [vmem:[%s453_s1 + $0x10] sm:$0x1] %v157_v12  ;;  %305 = vst [vmem:[%s453_s1 + $0x11] sm:$0x1] %v163_v13  ;;  %v175_v15 = vld [vmem:[#allocation0 + $0x98] sm:$0x1] }
  0x7e   :  { %306 = vst [vmem:[%s453_s1 + $0x12] sm:$0x1] %v169_v14  ;;  %v181_v16 = vld [vmem:[#allocation0 + $0xa0] sm:$0x1]  ;;  %v187_v17 = vld [vmem:[#allocation0 + $0xa8] sm:$0x1] }
  0x7f   :  { %307 = vst [vmem:[%s453_s1 + $0x13] sm:$0x1] %v175_v15  ;;  %308 = vst [vmem:[%s453_s1 + $0x14] sm:$0x1] %v181_v16  ;;  %v193_v18 = vld [vmem:[#allocation0 + $0xb0] sm:$0x1] }
  0x80   :  { %309 = vst [vmem:[%s453_s1 + $0x15] sm:$0x1] %v187_v17  ;;  %v199_v19 = vld [vmem:[#allocation0 + $0xb8] sm:$0x1]  ;;  %v64_v20 = vld [vmem:[#allocation0] sm:$0x1] }
  0x81   :  { %310 = vst [vmem:[%s453_s1 + $0x16] sm:$0x1] %v193_v18  ;;  %311 = vst [vmem:[%s453_s1 + $0x17] sm:$0x1] %v199_v19  ;;  %v68_v21 = vld [vmem:[#allocation0 + $0x8] sm:$0x1] }
  0x82   :  { %66 = vst [vmem:[%s453_s1] sm:$0x1] %v64_v20  ;;  %v73_v22 = vld [vmem:[#allocation0 + $0x10] sm:$0x1]  ;;  %v79_v23 = vld [vmem:[#allocation0 + $0x18] sm:$0x1] }
  0x83   :  { %289 = vst [vmem:[%s453_s1 + $0x1] sm:$0x1] %v68_v21  ;;  %290 = vst [vmem:[%s453_s1 + $0x2] sm:$0x1] %v73_v22  ;;  %v85_v24 = vld [vmem:[#allocation0 + $0x20] sm:$0x1] }
  0x84   :  { %291 = vst [vmem:[%s453_s1 + $0x3] sm:$0x1] %v79_v23  ;;  %v91_v25 = vld [vmem:[#allocation0 + $0x28] sm:$0x1]  ;;  %v97_v26 = vld [vmem:[#allocation0 + $0x30] sm:$0x1] }
  0x85   :  { %292 = vst [vmem:[%s453_s1 + $0x4] sm:$0x1] %v85_v24  ;;  %293 = vst [vmem:[%s453_s1 + $0x5] sm:$0x1] %v91_v25  ;;  %v103_v27 = vld [vmem:[#allocation0 + $0x38] sm:$0x1] }
  0x86   :  { %294 = vst [vmem:[%s453_s1 + $0x6] sm:$0x1] %v97_v26  ;;  %v205_v28 = vld [vmem:[#allocation0 + $0xc0] sm:$0x1]  ;;  %v211_v29 = vld [vmem:[#allocation0 + $0xc8] sm:$0x1] }
  0x87   :  { %295 = vst [vmem:[%s453_s1 + $0x7] sm:$0x1] %v103_v27  ;;  %312 = vst [vmem:[%s453_s1 + $0x18] sm:$0x1] %v205_v28  ;;  %v217_v30 = vld [vmem:[#allocation0 + $0xd0] sm:$0x1] }
  0x88   :  { %313 = vst [vmem:[%s453_s1 + $0x19] sm:$0x1] %v211_v29  ;;  %v223_v31 = vld [vmem:[#allocation0 + $0xd8] sm:$0x1]  ;;  %v229_v32 = vld [vmem:[#allocation0 + $0xe0] sm:$0x1] }
  0x89   :  { %314 = vst [vmem:[%s453_s1 + $0x1a] sm:$0x1] %v217_v30  ;;  %315 = vst [vmem:[%s453_s1 + $0x1b] sm:$0x1] %v223_v31  ;;  %v235_v33 = vld [vmem:[#allocation0 + $0xe8] sm:$0x1] }
  0x8a   :  { %316 = vst [vmem:[%s453_s1 + $0x1c] sm:$0x1] %v229_v32  ;;  %v241_v34 = vld [vmem:[#allocation0 + $0xf0] sm:$0x1]  ;;  %v247_v35 = vld [vmem:[#allocation0 + $0xf8] sm:$0x1] }
  0x8b   :  { %317 = vst [vmem:[%s453_s1 + $0x1d] sm:$0x1] %v235_v33  ;;  %318 = vst [vmem:[%s453_s1 + $0x1e] sm:$0x1] %v241_v34  ;;  %v109_v36 = vld [vmem:[#allocation0 + $0x40] sm:$0x1] }
  0x8c   :  { %319 = vst [vmem:[%s453_s1 + $0x1f] sm:$0x1] %v247_v35  ;;  %v115_v37 = vld [vmem:[#allocation0 + $0x48] sm:$0x1]  ;;  %v121_v38 = vld [vmem:[#allocation0 + $0x50] sm:$0x1] }
  0x8d   :  { %296 = vst [vmem:[%s453_s1 + $0x8] sm:$0x1] %v109_v36  ;;  %297 = vst [vmem:[%s453_s1 + $0x9] sm:$0x1] %v115_v37  ;;  %v127_v39 = vld [vmem:[#allocation0 + $0x58] sm:$0x1] }
  0x8e   :  { %298 = vst [vmem:[%s453_s1 + $0xa] sm:$0x1] %v121_v38  ;;  %v133_v40 = vld [vmem:[#allocation0 + $0x60] sm:$0x1]  ;;  %v139_v41 = vld [vmem:[#allocation0 + $0x68] sm:$0x1] }
  0x8f   :  { %299 = vst [vmem:[%s453_s1 + $0xb] sm:$0x1] %v127_v39  ;;  %300 = vst [vmem:[%s453_s1 + $0xc] sm:$0x1] %v133_v40  ;;  %v145_v42 = vld [vmem:[#allocation0 + $0x70] sm:$0x1] }
  0x90   :  { %301 = vst [vmem:[%s453_s1 + $0xd] sm:$0x1] %v139_v41  ;;  %v151_v43 = vld [vmem:[#allocation0 + $0x78] sm:$0x1]  ;;  %302 = vst [vmem:[%s453_s1 + $0xe] sm:$0x1] %v145_v42 }
  0x91   :  { %303 = vst [vmem:[%s453_s1 + $0xf] sm:$0x1] %v151_v43 }

// kernel: _lambda_.3
= control target key start
LH: loop header
LB: loop body
LE: loop exit
PB: predicated region body
PF: predicated region fallthrough
CT: control target
= control target key end

     0   :  { %s1164_s12 = smov 0   ;;  %s1243_s0 = inlined_call_operand.vmem [shape: f32[2,4], index: 0, kind: input, shape index: {}]   ;;  %s1244_s1 = inlined_call_operand.vmem [shape: f32[4,4096], index: 1, kind: input, shape index: {}]   ;;  %s1245_s2 = inlined_call_operand.vmem [shape: f32[1,4096], index: 2, kind: input, shape index: {}]   ;;  %s1246_s3 = inlined_call_operand.vmem [shape: f32[2,4096], index: 3, kind: output, shape index: {}]  }
   0x1 LB: > { %s1080_s13 = sadd.s32 4294967295, %s1140_s12   ;;  %p1084_p0 = scmp.ge.s32.totalorder %s1140_s12, 1  ;;  %s1140_s12 = sphi %s1164_s12, %s13_s12  }
   0x2   : > { %p148_p1 = scmp.lt.s32.totalorder %s1140_s12, 3 }
   0x4   : > { %p149_p2 = pnand %p1084_p0, %p148_p1 }
   0x5   : > { %s1085_s14 = sshll.u32 (!%p149_p2), %s1080_s13, 4  ;;  %v1142_v0 = vmov (!%p149_p2), 0.0   ;;  %vm306_vm0 = vcmask (!%p149_p2), 1043456   ;;  %v193_v7 = vld [vmem:[%s1243_s0] sm:$0x3] (!%p149_p2)  ;;  %vm302_vm1 = vcmask (!%p149_p2), 31744   ;;  %v206_v18 = vlaneseq (!%p149_p2) }
   0x6   : > { %152 = sbr.rel (%p149_p2) target bundleno = 257 (0x101), region = 32  ;;  %p177_p3 = scmp.lt.s32.totalorder (!%p149_p2), %s1085_s14, 31  ;;  %403 = vmatprep.mubr.f32.mxu0 (!%p149_p2), %v1142_v0  ;;  %474 = vmatprep.mubr.f32.mxu1 (!%p149_p2), %v1142_v0  ;;  %v1143_v25 = vmov (!%p149_p2), 1983009808  }
   0x7   : > { %v1205_v19 = vshrl.u32 (!%p149_p2), %v206_v18, 7  ;;  %v942_v26 = vunpack.c.l.s4 (!%p149_p2), %v1143_v25 }
   0x9   : > { %v208_v20 = vsub.s32 (!%p149_p2), 0, %v1205_v19  ;;  %v216_v21 = vsub.s32 (!%p149_p2), 2, %v1205_v19  ;;  %v212_v23 = vsub.s32 (!%p149_p2), 1, %v1205_v19  ;;  %v220_v24 = vsub.s32 (!%p149_p2), 3, %v1205_v19 }
   0xa   : > { %v224_v29 = vsub.s32 (!%p149_p2), 4, %v1205_v19  ;;  %v232_v30 = vsub.s32 (!%p149_p2), 6, %v1205_v19  ;;  %v228_v33 = vsub.s32 (!%p149_p2), 5, %v1205_v19  ;;  %v236_v34 = vsub.s32 (!%p149_p2), 7, %v1205_v19 }
   0xb   : > { %v943_v35 = vunpack.c.0.s8 (!%p149_p2), %v942_v26 }
   0xd   : > { %s1248_s14 = smov (!%p177_p3, %s1085_s14), 31  ;;  %v1220_v51 = vsub.s32 %v943_v35, %v1205_v19 }
   0xe   : > { %s1086_s15 = sshll.u32 %s1248_s14, 2  ;;  %s185_s23 = scalar_lea.vmem %s1245_s2, %s1248_s14 }
   0xf   : > { %s180_s18 = scalar_lea.vmem %s1244_s1, %s1086_s15  ;;  %v202_v22 = vld [vmem:[%s185_s23] sm:$0xff]  ;;  %v203_v44 = vld [vmem:[%s185_s23 + $0x8] sm:$0xff]  ;;  %s1089_s24 = sshll.u32 %s1248_s14, 1 }
  0x10   : > { %v194_v1 = vld [vmem:[%s180_s18] sm:$0xff]  ;;  %v195_v2 = vld [vmem:[%s180_s18 + $0x8] sm:$0xff]  ;;  %v196_v3 = vld [vmem:[%s180_s18 + $0x10] sm:$0xff]  ;;  %v209_v27 = vrot.slane %v202_v22, %v208_v20  ;;  %v217_v28 = vrot.slane %v202_v22, %v216_v21  ;;  %v213_v31 = vrot.slane %v202_v22, %v212_v23  ;;  %v221_v32 = vrot.slane %v202_v22, %v220_v24  ;;  %s1228_s27 = scalar_lea.vmem %s1246_s3, %s1089_s24 }
  0x11   : > { %v294_v4 = vcombine.high %v194_v1, %v194_v1  ;;  %v295_v5 = vcombine.high %v195_v2, %v195_v2  ;;  %v197_v6 = vld [vmem:[%s180_s18 + $0x18] sm:$0xff]  ;;  %v296_v8 = vcombine.high %v196_v3, %v196_v3  ;;  %v198_v10 = vld [vmem:[%s180_s18 + $0x20] sm:$0xff]  ;;  %v199_v11 = vld [vmem:[%s180_s18 + $0x28] sm:$0xff]  ;;  %v225_v42 = vrot.slane %v202_v22, %v224_v29 }
  0x12   : > { %v297_v9 = vcombine.high %v197_v6, %v197_v6  ;;  %v298_v12 = vcombine.high %v198_v10, %v198_v10  ;;  %v299_v13 = vcombine.high %v199_v11, %v199_v11  ;;  %v200_v14 = vld [vmem:[%s180_s18 + $0x30] sm:$0xff]  ;;  %v201_v15 = vld [vmem:[%s180_s18 + $0x38] sm:$0xff]  ;;  %v233_v43 = vrot.slane %v202_v22, %v232_v30 }
  0x13   : > { %1090 = vmatprep.subr.msk.mxu0 %vm306_vm0, %v294_v4  ;;  %1093 = vmatprep.subr.msk.mxu1 %vm306_vm0, %v295_v5  ;;  %v300_v16 = vcombine.high %v200_v14, %v200_v14  ;;  %v301_v17 = vcombine.high %v201_v15, %v201_v15  ;;  %v229_v47 = vrot.slane %v202_v22, %v228_v33 }
  0x14   : > { %1091 = vmatpush1.msk.msra.mxu0 %vm306_vm0, %v194_v1  ;;  %1094 = vmatpush1.msk.msra.mxu1 %vm306_vm0, %v195_v2  ;;  %v237_v48 = vrot.slane %v202_v22, %v236_v34  ;;  %v241_v56 = vrot.slane %v203_v44, %v208_v20  ;;  %v249_v57 = vrot.slane %v203_v44, %v216_v21 }
  0x15   : > { %1092 = vmatmul.mubr.msk.f32.vlgmr.msra.gmra.mrb[0].mxu0 %vm302_vm1, %v193_v7  ;;  %1095 = vmatmul.mubr.msk.f32.vlgmr.msra.gmra.mrb[0].mxu1 %vm302_vm1, %v193_v7  ;;  %v245_v62 = vrot.slane %v203_v44, %v212_v23  ;;  %v253_v63 = vrot.slane %v203_v44, %v220_v24  ;;  %v261_v18 = vrot.slane %v203_v44, %v228_v33 }
  0x16   : > { %1096 = vmatprep.subr.msk.mxu0 %vm306_vm0, %v296_v8  ;;  %1099 = vmatprep.subr.msk.mxu1 %vm306_vm0, %v297_v9  ;;  %v269_v19 = vrot.slane %v203_v44, %v236_v34 }
  0x17   : > { %1097 = vmatpush1.msk.msra.mxu0 %vm306_vm0, %v196_v3  ;;  %1100 = vmatpush1.msk.msra.mxu1 %vm306_vm0, %v197_v6  ;;  %v257_v6 = vrot.slane %v203_v44, %v224_v29 }
  0x18   : > { %545 = vmatprep.mubr.f32.mxu0 %v1142_v0  ;;  %616 = vmatprep.mubr.f32.mxu1 %v1142_v0 }
  0x19   : > { %1098 = vmatmul.mubr.msk.f32.vlgmr.msra.gmra.mrb[2].mxu0 %vm302_vm1, %v193_v7  ;;  %1101 = vmatmul.mubr.msk.f32.vlgmr.msra.gmra.mrb[2].mxu1 %vm302_vm1, %v193_v7 }
  0x1a   : > { %1102 = vmatprep.subr.msk.mxu0 %vm306_vm0, %v298_v12  ;;  %1105 = vmatprep.subr.msk.mxu1 %vm306_vm0, %v299_v13 }
  0x1b   : > { %1103 = vmatpush1.msk.msra.mxu0 %vm306_vm0, %v198_v10  ;;  %1106 = vmatpush1.msk.msra.mxu1 %vm306_vm0, %v199_v11 }
  0x1c   : > { %687 = vmatprep.mubr.f32.mxu0 %v1142_v0  ;;  %758 = vmatprep.mubr.f32.mxu1 %v1142_v0 }
  0x1d   : > { %1104 = vmatmul.mubr.msk.f32.vlgmr.msra.gmra.mrb[4].mxu0 %vm302_vm1, %v193_v7  ;;  %1107 = vmatmul.mubr.msk.f32.vlgmr.msra.gmra.mrb[4].mxu1 %vm302_vm1, %v193_v7 }
  0x1e   : > { %1108 = vmatprep.subr.msk.mxu0 %vm306_vm0, %v300_v16  ;;  %1111 = vmatprep.subr.msk.mxu1 %vm306_vm0, %v301_v17 }
  0x1f   : > { %1109 = vmatpush1.msk.msra.mxu0 %vm306_vm0, %v200_v14  ;;  %1112 = vmatpush1.msk.msra.mxu1 %vm306_vm0, %v201_v15 }
  0x20   : > { %829 = vmatprep.mubr.f32.mxu0 %v1142_v0  ;;  %900 = vmatprep.mubr.f32.mxu1 %v1142_v0 }
  0x21   : > { %1110 = vmatmul.mubr.msk.f32.vlgmr.msra.gmra.mrb[6].mxu0 %vm302_vm1, %v193_v7  ;;  %1113 = vmatmul.mubr.msk.f32.vlgmr.msra.gmra.mrb[6].mxu1 %vm302_vm1, %v193_v7  ;;  %v265_v7 = vrot.slane %v203_v44, %v232_v30 }
  0xe8   : > { %v405_v36 = vpop.f32.mrb[0].mxu0  ;;  %v476_v37 = vpop.f32.mrb[0].mxu1 }
  0xe9   : > { %v406_v38 = vadd.f32 %v405_v36, %v209_v27  ;;  %v477_v39 = vadd.f32 %v476_v37, %v217_v28  ;;  %v407_v40 = vpop.f32.mrb[1].mxu0  ;;  %v478_v41 = vpop.f32.mrb[1].mxu1 }
  0xea   : > { %v408_v45 = vadd.f32 %v407_v40, %v213_v31  ;;  %v479_v46 = vadd.f32 %v478_v41, %v221_v32 }
  0xeb   : > { %v907_v49 = vmax.f32 %v406_v38, 0.0  ;;  %v909_v50 = vmax.f32 %v477_v39, 0.0 }
  0xec   : > { %v908_v52 = vmax.f32 %v408_v45, 0.0  ;;  %v910_v53 = vmax.f32 %v479_v46, 0.0  ;;  %v547_v54 = vpop.f32.mrb[2].mxu0  ;;  %v618_v55 = vpop.f32.mrb[2].mxu1 }
  0xed   : > { %v548_v58 = vadd.f32 %v547_v54, %v225_v42  ;;  %v619_v59 = vadd.f32 %v618_v55, %v233_v43  ;;  %v549_v60 = vpop.f32.mrb[3].mxu0  ;;  %v620_v61 = vpop.f32.mrb[3].mxu1 }
  0xee   : > { %v939_v0 = vcombine.low %v907_v49, %v908_v52  ;;  %v940_v1 = vcombine.low %v909_v50, %v910_v53  ;;  %v550_v2 = vadd.f32 %v549_v60, %v229_v47  ;;  %v621_v3 = vadd.f32 %v620_v61, %v237_v48 }
  0xef   : > { %v911_v4 = vmax.f32 %v548_v58, 0.0  ;;  %v913_v5 = vmax.f32 %v619_v59, 0.0 }
  0xf0   : > { %v947_v8 = vrot.slane %v939_v0, %v1220_v51  ;;  %v954_v9 = vrot.slane %v940_v1, %v1220_v51  ;;  %v912_v10 = vmax.f32 %v550_v2, 0.0  ;;  %v914_v11 = vmax.f32 %v621_v3, 0.0  ;;  %v689_v12 = vpop.f32.mrb[4].mxu0  ;;  %v760_v13 = vpop.f32.mrb[4].mxu1 }
  0xf1   : > { %v690_v14 = vadd.f32 %v689_v12, %v241_v56  ;;  %v761_v15 = vadd.f32 %v760_v13, %v249_v57  ;;  %v691_v16 = vpop.f32.mrb[5].mxu0  ;;  %v762_v17 = vpop.f32.mrb[5].mxu1 }
  0xf2   : > { %v955_v20 = vcombine.low %v947_v8, %v954_v9  ;;  %v956_v21 = vcombine.low %v911_v4, %v912_v10  ;;  %v957_v22 = vcombine.low %v913_v5, %v914_v11  ;;  %v692_v23 = vadd.f32 %v691_v16, %v245_v62 }
  0xf3   : > { %v915_v24 = vmax.f32 %v690_v14, 0.0  ;;  %v917_v25 = vmax.f32 %v761_v15, 0.0  ;;  %v763_v26 = vadd.f32 %v762_v17, %v253_v63 }
  0xf4   : > { %1011 = vst [vmem:[%s1228_s27] sm:$0xff] %v955_v20  ;;  %v964_v27 = vrot.slane %v956_v21, %v1220_v51  ;;  %v971_v28 = vrot.slane %v957_v22, %v1220_v51  ;;  %v916_v29 = vmax.f32 %v692_v23, 0.0  ;;  %v831_v30 = vpop.f32.mrb[6].mxu0  ;;  %v902_v31 = vpop.f32.mrb[6].mxu1 }
  0xf5   : > { %v918_v32 = vmax.f32 %v763_v26, 0.0  ;;  %v832_v35 = vadd.f32 %v831_v30, %v257_v6  ;;  %v903_v33 = vadd.f32 %v902_v31, %v265_v7  ;;  %v833_v34 = vpop.f32.mrb[7].mxu0  ;;  %v904_v36 = vpop.f32.mrb[7].mxu1 }
  0xf6   : > { %v972_v37 = vcombine.low %v964_v27, %v971_v28  ;;  %v973_v38 = vcombine.low %v915_v24, %v916_v29  ;;  %v834_v39 = vadd.f32 %v833_v34, %v261_v18  ;;  %v905_v40 = vadd.f32 %v904_v36, %v269_v19 }
  0xf7   : > { %v974_v41 = vcombine.low %v917_v25, %v918_v32  ;;  %v919_v42 = vmax.f32 %v832_v35, 0.0  ;;  %v921_v43 = vmax.f32 %v903_v33, 0.0 }
  0xf8   : > { %1012 = vst [vmem:[%s1228_s27 + $0x8] sm:$0xff] %v972_v37  ;;  %v981_v44 = vrot.slane %v973_v38, %v1220_v51  ;;  %v920_v45 = vmax.f32 %v834_v39, 0.0  ;;  %v922_v46 = vmax.f32 %v905_v40, 0.0 }
  0xf9   : > { %v988_v47 = vrot.slane %v974_v41, %v1220_v51 }
  0xfa   : > { %v990_v48 = vcombine.low %v919_v42, %v920_v45  ;;  %v991_v49 = vcombine.low %v921_v43, %v922_v46 }
  0xfb   : > { %v989_v50 = vcombine.low %v981_v44, %v988_v47 }
  0xfc   : > { %v998_v52 = vrot.slane %v990_v48, %v1220_v51  ;;  %v1005_v53 = vrot.slane %v991_v49, %v1220_v51 }
  0xfd   : > { %1013 = vst [vmem:[%s1228_s27 + $0x10] sm:$0xff] %v989_v50 }
  0xfe   : > { %v1006_v54 = vcombine.low %v998_v52, %v1005_v53 }
 0x100   : > { %1014 = vst [vmem:[%s1228_s27 + $0x18] sm:$0xff] %v1006_v54 }
 0x101 PF: > { %s13_s12 = sadd.s32 1, %s1140_s12  }
 0x102   : > { %p10_p4 = scmp.ge.s32.totalorder %s13_s12, 4  }
 0x104   :  { %12 = sbr.rel (!%p10_p4) target bundleno = 1 (0x1), region = 65 }

// kernel: _lambda_.4
= control target key start
LH: loop header
LB: loop body
LE: loop exit
PB: predicated region body
PF: predicated region fallthrough
CT: control target
= control target key end

     0   :  { %s2436_s15 = smov 0   ;;  %s2438_s16 = smov 0   ;;  %s2994_s0 = inlined_call_operand.vmem [shape: f32[2,9,8,64], index: 0, kind: input, shape index: {}]   ;;  %s2995_s1 = inlined_call_operand.vmem [shape: f32[2,9,8,64], index: 1, kind: input, shape index: {}]   ;;  %s2996_s2 = inlined_call_operand.vmem [shape: f32[3,3,64,32], index: 2, kind: input, shape index: {}]   ;;  %s2997_s3 = inlined_call_operand.vmem [shape: f32[1,32], index: 3, kind: input, shape index: {}]   ;;  %s2998_s4 = inlined_call_operand.vmem [shape: f32[2,4,64,32], index: 4, kind: output, shape index: {}]  }
   0x1   :  { %s2440_s17 = smov 0  }
   0x2 LB: > { %s23_s18 = sadd.s32 1, %s2405_s16  ;;  %p1605_p0 = scmp.ge.s32.totalorder %s2409_s17, 1  ;;  %s2409_s17 = sphi %s2440_s17, %s14_s17   ;;  %s2405_s16 = sphi %s2438_s16, %s3000_s16   ;;  %s2401_s15 = sphi %s2436_s15, %s2999_s15  }
   0x3   : > { %p24_p1 = scmp.ge.s32.totalorder %s23_s18, 2  ;;  %p203_p2 = scmp.lt.s32.totalorder %s2409_s17, 3 }
   0x5   : > { %s3002_s18 = smov (%p24_p1, %s23_s18), 0  ;;  %p204_p3 = pnand %p1605_p0, %p203_p2 }
   0x6   : > { %v1610_v0 = vld [vmem:[%s2996_s2 + $0x100] sm:$0xff] (!%p204_p3)  ;;  %v1611_v1 = vld [vmem:[%s2996_s2 + $0x108] sm:$0xff] (!%p204_p3)  ;;  %p244_p4 = scmp.lt.s32.totalorder (!%p204_p3), %s2401_s15, 1  ;;  %v1612_v5 = vld [vmem:[%s2996_s2 + $0x110] sm:$0xff] (!%p204_p3)  ;;  %vm303_vm0 = vcmask (!%p204_p3), 523264   ;;  %vm441_vm1 = vcmask (!%p204_p3), 261120  }
   0x7   : > { %207 = sbr.rel (%p204_p3) target bundleno = 313 (0x139), region = 36  ;;  %v1627_v2 = vld [vmem:[%s2996_s2 + $0xc0] sm:$0xff] (!%p204_p3)  ;;  %v2170_v3 = vpack.c.bf16 (!%p204_p3), %v1611_v1, %v1610_v0  ;;  %v1628_v4 = vld [vmem:[%s2996_s2 + $0xc8] sm:$0xff] (!%p204_p3)  ;;  %v1613_v6 = vld [vmem:[%s2996_s2 + $0x118] sm:$0xff] (!%p204_p3) }
   0x8   : > { %v2202_v7 = vpack.c.bf16 (!%p204_p3), %v1628_v4, %v1627_v2  ;;  %v2174_v8 = vpack.c.bf16 (!%p204_p3), %v1613_v6, %v1612_v5  ;;  %v1629_v9 = vld [vmem:[%s2996_s2 + $0xd0] sm:$0xff] (!%p204_p3)  ;;  %v1630_v10 = vld [vmem:[%s2996_s2 + $0xd8] sm:$0xff] (!%p204_p3)  ;;  %v1614_v11 = vld [vmem:[%s2996_s2 + $0x120] sm:$0xff] (!%p204_p3) }
   0x9   : > { %2171 = vmatprep.subr.bf16.mxu0 (!%p204_p3), %v2170_v3  ;;  %v2206_v12 = vpack.c.bf16 (!%p204_p3), %v1630_v10, %v1629_v9  ;;  %v1615_v13 = vld [vmem:[%s2996_s2 + $0x128] sm:$0xff] (!%p204_p3)  ;;  %v1631_v14 = vld [vmem:[%s2996_s2 + $0xe0] sm:$0xff] (!%p204_p3)  ;;  %v1616_v18 = vld [vmem:[%s2996_s2 + $0x130] sm:$0xff] (!%p204_p3) }
   0xa   : > { %v1632_v15 = vld [vmem:[%s2996_s2 + $0xe8] sm:$0xff] (!%p204_p3)  ;;  %2203 = vmatprep.subr.bf16.mxu1 (!%p204_p3), %v2202_v7  ;;  %2173 = vmatpush3.bf16.msra.mxu0 (!%p204_p3), %v2170_v3  ;;  %v2178_v16 = vpack.c.bf16 (!%p204_p3), %v1615_v13, %v1614_v11  ;;  %v1617_v19 = vld [vmem:[%s2996_s2 + $0x138] sm:$0xff] (!%p204_p3)  ;;  %v1633_v20 = vld [vmem:[%s2996_s2 + $0xf0] sm:$0xff] (!%p204_p3) }
   0xb   : > { %2205 = vmatpush3.bf16.msra.mxu1 (!%p204_p3), %v2202_v7  ;;  %2175 = vmatprep.subr.bf16.mxu0 (!%p204_p3), %v2174_v8  ;;  %v2210_v17 = vpack.c.bf16 (!%p204_p3), %v1632_v15, %v1631_v14  ;;  %v1634_v21 = vld [vmem:[%s2996_s2 + $0xf8] sm:$0xff] (!%p204_p3)  ;;  %v2182_v24 = vpack.c.bf16 (!%p204_p3), %v1617_v19, %v1616_v18  ;;  %v1635_v26 = vld [vmem:[%s2996_s2 + $0x140] sm:$0xff] (!%p204_p3)  ;;  %v1636_v27 = vld [vmem:[%s2996_s2 + $0x148] sm:$0xff] (!%p204_p3) }
   0xc   : > { %2207 = vmatprep.subr.bf16.mxu1 (!%p204_p3), %v2206_v12  ;;  %v2214_v25 = vpack.c.bf16 (!%p204_p3), %v1634_v21, %v1633_v20  ;;  %v1707_v28 = vld [vmem:[%s2996_s2 + $0x80] sm:$0xff] (!%p204_p3)  ;;  %v1708_v29 = vld [vmem:[%s2996_s2 + $0x88] sm:$0xff] (!%p204_p3)  ;;  %v2186_v30 = vpack.c.bf16 (!%p204_p3), %v1636_v27, %v1635_v26  ;;  %v1637_v32 = vld [vmem:[%s2996_s2 + $0x150] sm:$0xff] (!%p204_p3) }
   0xd   : > { %v2250_v31 = vpack.c.bf16 (!%p204_p3), %v1708_v29, %v1707_v28  ;;  %v1638_v33 = vld [vmem:[%s2996_s2 + $0x158] sm:$0xff] (!%p204_p3)  ;;  %v1709_v35 = vld [vmem:[%s2996_s2 + $0x90] sm:$0xff] (!%p204_p3)  ;;  %v1639_v42 = vld [vmem:[%s2996_s2 + $0x160] sm:$0xff] (!%p204_p3) }
   0xe   : > { %s3004_s15 = smov (!%p244_p4, %s2401_s15), 1  ;;  %2177 = vmatpush3.bf16.msra.mxu0 %v2174_v8  ;;  %v1710_v36 = vld [vmem:[%s2996_s2 + $0x98] sm:$0xff]  ;;  %v2190_v39 = vpack.c.bf16 %v1638_v33, %v1637_v32  ;;  %v1640_v43 = vld [vmem:[%s2996_s2 + $0x168] sm:$0xff]  ;;  %v1711_v45 = vld [vmem:[%s2996_s2 + $0xa0] sm:$0xff] }
   0xf   : > { %s2362_s21 = smul.u32 72, %s3004_s15  ;;  %2209 = vmatpush3.bf16.msra.mxu1 %v2206_v12  ;;  %2179 = vmatprep.subr.bf16.mxu0 %v2178_v16  ;;  %v2254_v41 = vpack.c.bf16 %v1710_v36, %v1709_v35  ;;  %v1712_v46 = vld [vmem:[%s2996_s2 + $0xa8] sm:$0xff]  ;;  %v2194_v49 = vpack.c.bf16 %v1640_v43, %v1639_v42  ;;  %v1641_v52 = vld [vmem:[%s2996_s2 + $0x170] sm:$0xff]  ;;  %v1642_v53 = vld [vmem:[%s2996_s2 + $0x178] sm:$0xff]  ;;  %s1773_s25 = sshll.u32 %s3004_s15, 8 }
  0x10   : > { %2211 = vmatprep.subr.bf16.mxu1 %v2210_v17  ;;  %v2258_v51 = vpack.c.bf16 %v1712_v46, %v1711_v45  ;;  %v1713_v55 = vld [vmem:[%s2996_s2 + $0xb0] sm:$0xff]  ;;  %v1714_v56 = vld [vmem:[%s2996_s2 + $0xb8] sm:$0xff]  ;;  %v2198_v59 = vpack.c.bf16 %v1642_v53, %v1641_v52  ;;  %v1675_v62 = vld [vmem:[%s2996_s2 + $0x1c0] sm:$0xff]  ;;  %s2888_s28 = scalar_lea.vmem %s2998_s4, %s1773_s25 }
  0x11   : > { %s2505_s30 = scalar_lea.vmem %s2994_s0, %s2362_s21  ;;  %s2510_s7 = scalar_lea.vmem %s2995_s1, %s2362_s21  ;;  %v2262_v61 = vpack.c.bf16 %v1714_v56, %v1713_v55  ;;  %v1676_v63 = vld [vmem:[%s2996_s2 + $0x1c8] sm:$0xff]  ;;  %v983_v1 = vld [vmem:[%s2996_s2] sm:$0xff]  ;;  %v1677_v6 = vld [vmem:[%s2996_s2 + $0x1d0] sm:$0xff] }
  0x12   : > { %v2516_v22 = vld [vmem:[%s2505_s30] sm:$0xff]  ;;  %2181 = vmatpush3.bf16.msra.mxu0 %v2178_v16  ;;  %v2544_v34 = vld [vmem:[%s2505_s30 + $0x8] sm:$0xff]  ;;  %v2556_v38 = vld [vmem:[%s2505_s30 + $0x10] sm:$0xff]  ;;  %v2218_v4 = vpack.c.bf16 %v1676_v63, %v1675_v62 }
  0x13   : > { %v2519_v23 = vld [vmem:[%s2510_s7] sm:$0xff]  ;;  %1934 = vmatprep.mubr.msk.f32.mxu0 %vm303_vm0, %v2516_v22  ;;  %2213 = vmatpush3.bf16.msra.mxu1 %v2210_v17  ;;  %v2553_v37 = vld [vmem:[%s2510_s7 + $0x8] sm:$0xff]  ;;  %v2561_v40 = vld [vmem:[%s2510_s7 + $0x10] sm:$0xff] }
  0x14   : > { %1990 = vmatprep.mubr.msk.f32.mxu1 %vm303_vm0, %v2519_v23  ;;  %2183 = vmatprep.subr.bf16.mxu0 %v2182_v24  ;;  %v2572_v44 = vld [vmem:[%s2505_s30 + $0x18] sm:$0xff]  ;;  %v2588_v48 = vld [vmem:[%s2505_s30 + $0x20] sm:$0xff]  ;;  %v2604_v54 = vld [vmem:[%s2505_s30 + $0x28] sm:$0xff] }
  0x15   : > { %2215 = vmatprep.subr.bf16.mxu1 %v2214_v25  ;;  %v2583_v47 = vld [vmem:[%s2510_s7 + $0x18] sm:$0xff]  ;;  %v2593_v50 = vld [vmem:[%s2510_s7 + $0x20] sm:$0xff]  ;;  %v2615_v57 = vld [vmem:[%s2510_s7 + $0x28] sm:$0xff] }
  0x16   : > { %2185 = vmatpush3.bf16.msra.mxu0 %v2182_v24  ;;  %v2620_v58 = vld [vmem:[%s2505_s30 + $0x30] sm:$0xff]  ;;  %v2636_v0 = vld [vmem:[%s2505_s30 + $0x38] sm:$0xff]  ;;  %v984_v2 = vld [vmem:[%s2996_s2 + $0x8] sm:$0xff] }
  0x17   : > { %2217 = vmatpush3.bf16.msra.mxu1 %v2214_v25  ;;  %2187 = vmatprep.subr.bf16.mxu0 %v2186_v30  ;;  %v2625_v60 = vld [vmem:[%s2510_s7 + $0x30] sm:$0xff]  ;;  %v2647_v3 = vld [vmem:[%s2510_s7 + $0x38] sm:$0xff]  ;;  %v2266_v5 = vpack.c.bf16 %v984_v2, %v983_v1  ;;  %v1679_v12 = vld [vmem:[%s2996_s2 + $0x1e0] sm:$0xff] }
  0x18   : > { %2251 = vmatprep.subr.bf16.mxu1 %v2250_v31  ;;  %v1678_v7 = vld [vmem:[%s2996_s2 + $0x1d8] sm:$0xff]  ;;  %v985_v8 = vld [vmem:[%s2996_s2 + $0x10] sm:$0xff]  ;;  %v1680_v13 = vld [vmem:[%s2996_s2 + $0x1e8] sm:$0xff] }
  0x19   : > { %1935 = vmatmul.mubr.msk.f32.vlgmr.msra.gmra.mrb[0].mxu0 %vm303_vm0, %v2544_v34  ;;  %v986_v9 = vld [vmem:[%s2996_s2 + $0x18] sm:$0xff]  ;;  %v2222_v10 = vpack.c.bf16 %v1678_v7, %v1677_v6  ;;  %v987_v14 = vld [vmem:[%s2996_s2 + $0x20] sm:$0xff]  ;;  %v988_v15 = vld [vmem:[%s2996_s2 + $0x28] sm:$0xff]  ;;  %v2226_v16 = vpack.c.bf16 %v1680_v13, %v1679_v12 }
  0x1a   : > { %1991 = vmatmul.mubr.msk.f32.vlgmr.msra.gmra.mrb[0].mxu1 %vm303_vm0, %v2553_v37  ;;  %2189 = vmatpush3.bf16.msra.mxu0 %v2186_v30  ;;  %v2270_v11 = vpack.c.bf16 %v986_v9, %v985_v8  ;;  %v2274_v17 = vpack.c.bf16 %v988_v15, %v987_v14  ;;  %v1681_v18 = vld [vmem:[%s2996_s2 + $0x1f0] sm:$0xff]  ;;  %v1682_v19 = vld [vmem:[%s2996_s2 + $0x1f8] sm:$0xff]  ;;  %v1667_v26 = vld [vmem:[%s2996_s2 + $0x40] sm:$0xff] }
  0x1b   : > { %2253 = vmatpush3.bf16.msra.mxu1 %v2250_v31  ;;  %1937 = vmatprep.mubr.msk.f32.mxu0 %vm303_vm0, %v2556_v38  ;;  %v989_v20 = vld [vmem:[%s2996_s2 + $0x30] sm:$0xff]  ;;  %v990_v21 = vld [vmem:[%s2996_s2 + $0x38] sm:$0xff]  ;;  %v2230_v24 = vpack.c.bf16 %v1682_v19, %v1681_v18  ;;  %v1668_v27 = vld [vmem:[%s2996_s2 + $0x48] sm:$0xff] }
  0x1c   : > { %1993 = vmatprep.mubr.msk.f32.mxu1 %vm303_vm0, %v2561_v40  ;;  %2191 = vmatprep.subr.bf16.mxu0 %v2190_v39  ;;  %v2278_v25 = vpack.c.bf16 %v990_v21, %v989_v20  ;;  %v1731_v28 = vld [vmem:[%s2996_s2 + $0x180] sm:$0xff]  ;;  %v1732_v29 = vld [vmem:[%s2996_s2 + $0x188] sm:$0xff]  ;;  %v2234_v31 = vpack.c.bf16 %v1668_v27, %v1667_v26  ;;  %v1669_v33 = vld [vmem:[%s2996_s2 + $0x50] sm:$0xff] }
  0x1d   : > { %1938 = vmatmul.mubr.msk.f32.gmra.mrb[2].mxu0 %vm303_vm0, %v2572_v44  ;;  %2255 = vmatprep.subr.bf16.mxu1 %v2254_v41  ;;  %v2730_v30 = vld [vmem:[%s2505_s30 + $0x40] sm:$0xff]  ;;  %v2282_v32 = vpack.c.bf16 %v1732_v29, %v1731_v28  ;;  %v1670_v35 = vld [vmem:[%s2996_s2 + $0x58] sm:$0xff]  ;;  %v1733_v36 = vld [vmem:[%s2996_s2 + $0x190] sm:$0xff] }
  0x1e   : > { %1994 = vmatmul.mubr.msk.f32.gmra.mrb[2].mxu1 %vm303_vm0, %v2583_v47  ;;  %2193 = vmatpush3.bf16.msra.mxu0 %v2190_v39  ;;  %v1734_v39 = vld [vmem:[%s2996_s2 + $0x198] sm:$0xff]  ;;  %v1671_v43 = vld [vmem:[%s2996_s2 + $0x60] sm:$0xff]  ;;  %v1672_v45 = vld [vmem:[%s2996_s2 + $0x68] sm:$0xff] }
  0x1f   : > { %2257 = vmatpush3.bf16.msra.mxu1 %v2254_v41  ;;  %1940 = vmatprep.mubr.msk.f32.mxu0 %vm303_vm0, %v2588_v48  ;;  %v2238_v41 = vpack.c.bf16 %v1670_v35, %v1669_v33  ;;  %v2286_v42 = vpack.c.bf16 %v1734_v39, %v1733_v36  ;;  %v1735_v46 = vld [vmem:[%s2996_s2 + $0x1a0] sm:$0xff]  ;;  %v1673_v53 = vld [vmem:[%s2996_s2 + $0x70] sm:$0xff]  ;;  %v1674_v55 = vld [vmem:[%s2996_s2 + $0x78] sm:$0xff] }
  0x20   : > { %1996 = vmatprep.mubr.msk.f32.mxu1 %vm303_vm0, %v2593_v50  ;;  %2195 = vmatprep.subr.bf16.mxu0 %v2194_v49  ;;  %v1737_v56 = vld [vmem:[%s2996_s2 + $0x1b0] sm:$0xff]  ;;  %v1747_v63 = vld [vmem:[%s2996_s2 + $0x200] sm:$0xff]  ;;  %v1748_v1 = vld [vmem:[%s2996_s2 + $0x208] sm:$0xff] }
  0x21   : > { %1941 = vmatmul.mubr.msk.f32.gmra.mrb[4].mxu0 %vm303_vm0, %v2604_v54  ;;  %2259 = vmatprep.subr.bf16.mxu1 %v2258_v51  ;;  %v286_v2 = vld [vmem:[%s2510_s7 + $0x40] sm:$0xff]  ;;  %v1750_v6 = vld [vmem:[%s2996_s2 + $0x218] sm:$0xff]  ;;  %v1752_v9 = vld [vmem:[%s2996_s2 + $0x228] sm:$0xff] }
  0x22   : > { %1997 = vmatmul.mubr.msk.f32.gmra.mrb[4].mxu1 %vm303_vm0, %v2615_v57  ;;  %2197 = vmatpush3.bf16.msra.mxu0 %v2194_v49  ;;  %v1736_v49 = vld [vmem:[%s2996_s2 + $0x1a8] sm:$0xff]  ;;  %v1751_v8 = vld [vmem:[%s2996_s2 + $0x220] sm:$0xff] }
  0x23   : > { %2261 = vmatpush3.bf16.msra.mxu1 %v2258_v51  ;;  %1943 = vmatprep.mubr.msk.f32.mxu0 %vm303_vm0, %v2620_v58  ;;  %v2242_v51 = vpack.c.bf16 %v1672_v45, %v1671_v43  ;;  %v2290_v52 = vpack.c.bf16 %v1736_v49, %v1735_v46 }
  0x24   : > { %1999 = vmatprep.mubr.msk.f32.mxu1 %vm303_vm0, %v2625_v60  ;;  %2199 = vmatprep.subr.bf16.mxu0 %v2198_v59 }
  0x25   : > { %1944 = vmatmul.mubr.msk.f32.gmra.mrb[6].mxu0 %vm303_vm0, %v2636_v0  ;;  %2263 = vmatprep.subr.bf16.mxu1 %v2262_v61 }
  0x26   : > { %2000 = vmatmul.mubr.msk.f32.gmra.mrb[6].mxu1 %vm303_vm0, %v2647_v3  ;;  %2201 = vmatpush3.bf16.msra.mxu0 %v2198_v59  ;;  %v1738_v59 = vld [vmem:[%s2996_s2 + $0x1b8] sm:$0xff] }
  0x27   : > { %2265 = vmatpush3.bf16.msra.mxu1 %v2262_v61  ;;  %1962 = vmatprep.mubr.msk.f32.mxu0 %vm303_vm0, %v2516_v22  ;;  %v2246_v61 = vpack.c.bf16 %v1674_v55, %v1673_v53  ;;  %v2294_v62 = vpack.c.bf16 %v1738_v59, %v1737_v56 }
  0x28   : > { %2074 = vmatprep.mubr.msk.f32.mxu1 %vm303_vm0, %v2544_v34  ;;  %2219 = vmatprep.subr.bf16.mxu0 %v2218_v4 }
  0x29   : > { %1963 = vmatmul.mubr.msk.f32.vlgmr.msra.gmra.mrb[8].mxu0 %vm303_vm0, %v2544_v34  ;;  %2267 = vmatprep.subr.bf16.mxu1 %v2266_v5 }
  0x2a   : > { %2075 = vmatmul.mubr.msk.f32.vlgmr.msra.gmra.mrb[8].mxu1 %vm303_vm0, %v2556_v38  ;;  %2221 = vmatpush3.bf16.msra.mxu0 %v2218_v4  ;;  %v2298_v4 = vpack.c.bf16 %v1748_v1, %v1747_v63 }
  0x2b   : > { %2269 = vmatpush3.bf16.msra.mxu1 %v2266_v5  ;;  %1965 = vmatprep.mubr.msk.f32.mxu0 %vm303_vm0, %v2556_v38  ;;  %v1749_v5 = vld [vmem:[%s2996_s2 + $0x210] sm:$0xff] }
  0x2c   : > { %2077 = vmatprep.mubr.msk.f32.mxu1 %vm303_vm0, %v2572_v44  ;;  %2223 = vmatprep.subr.bf16.mxu0 %v2222_v10  ;;  %v2302_v7 = vpack.c.bf16 %v1750_v6, %v1749_v5 }
  0x2d   : > { %1966 = vmatmul.mubr.msk.f32.gmra.mrb[10].mxu0 %vm303_vm0, %v2572_v44  ;;  %2271 = vmatprep.subr.bf16.mxu1 %v2270_v11 }
  0x2e   : > { %2078 = vmatmul.mubr.msk.f32.gmra.mrb[10].mxu1 %vm303_vm0, %v2588_v48  ;;  %2225 = vmatpush3.bf16.msra.mxu0 %v2222_v10  ;;  %v1753_v10 = vld [vmem:[%s2996_s2 + $0x230] sm:$0xff] }
  0x2f   : > { %2273 = vmatpush3.bf16.msra.mxu1 %v2270_v11  ;;  %1968 = vmatprep.mubr.msk.f32.mxu0 %vm303_vm0, %v2588_v48 }
  0x30   : > { %2080 = vmatprep.mubr.msk.f32.mxu1 %vm303_vm0, %v2604_v54  ;;  %2227 = vmatprep.subr.bf16.mxu0 %v2226_v16 }
  0x31   : > { %1969 = vmatmul.mubr.msk.f32.gmra.mrb[12].mxu0 %vm303_vm0, %v2604_v54  ;;  %2275 = vmatprep.subr.bf16.mxu1 %v2274_v17 }
  0x32   : > { %2081 = vmatmul.mubr.msk.f32.gmra.mrb[12].mxu1 %vm303_vm0, %v2620_v58  ;;  %2229 = vmatpush3.bf16.msra.mxu0 %v2226_v16 }
  0x33   : > { %2277 = vmatpush3.bf16.msra.mxu1 %v2274_v17  ;;  %1971 = vmatprep.mubr.msk.f32.mxu0 %vm303_vm0, %v2620_v58 }
  0x34   : > { %2083 = vmatprep.mubr.msk.f32.mxu1 %vm303_vm0, %v2636_v0  ;;  %2231 = vmatprep.subr.bf16.mxu0 %v2230_v24 }
  0x35   : > { %1972 = vmatmul.mubr.msk.f32.gmra.mrb[14].mxu0 %vm303_vm0, %v2636_v0  ;;  %2279 = vmatprep.subr.bf16.mxu1 %v2278_v25 }
  0x36   : > { %2084 = vmatmul.mubr.msk.f32.gmra.mrb[14].mxu1 %vm303_vm0, %v2730_v30  ;;  %2233 = vmatpush3.bf16.msra.mxu0 %v2230_v24 }
  0x37   : > { %2281 = vmatpush3.bf16.msra.mxu1 %v2278_v25  ;;  %2018 = vmatprep.mubr.msk.f32.mxu0 %vm303_vm0, %v2516_v22 }
  0x38   : > { %2102 = vmatprep.mubr.msk.f32.mxu1 %vm303_vm0, %v2553_v37  ;;  %2235 = vmatprep.subr.bf16.mxu0 %v2234_v31 }
  0x39   : > { %2019 = vmatmul.mubr.msk.f32.vlgmr.msra.gmra.mrb[16].mxu0 %vm303_vm0, %v2544_v34  ;;  %2283 = vmatprep.subr.bf16.mxu1 %v2282_v32 }
  0x3a   : > { %2103 = vmatmul.mubr.msk.f32.vlgmr.msra.gmra.mrb[8].mxu1 %vm303_vm0, %v2561_v40  ;;  %2237 = vmatpush3.bf16.msra.mxu0 %v2234_v31 }
  0x3b   : > { %2285 = vmatpush3.bf16.msra.mxu1 %v2282_v32  ;;  %2021 = vmatprep.mubr.msk.f32.mxu0 %vm303_vm0, %v2556_v38 }
  0x3c   : > { %2105 = vmatprep.mubr.msk.f32.mxu1 %vm303_vm0, %v2583_v47  ;;  %2239 = vmatprep.subr.bf16.mxu0 %v2238_v41 }
  0x3d   : > { %2022 = vmatmul.mubr.msk.f32.gmra.mrb[18].mxu0 %vm303_vm0, %v2572_v44  ;;  %2287 = vmatprep.subr.bf16.mxu1 %v2286_v42 }
  0x3e   : > { %2106 = vmatmul.mubr.msk.f32.gmra.mrb[10].mxu1 %vm303_vm0, %v2593_v50  ;;  %2241 = vmatpush3.bf16.msra.mxu0 %v2238_v41 }
  0x3f   : > { %2289 = vmatpush3.bf16.msra.mxu1 %v2286_v42  ;;  %2024 = vmatprep.mubr.msk.f32.mxu0 %vm303_vm0, %v2588_v48 }
  0x40   : > { %2108 = vmatprep.mubr.msk.f32.mxu1 %vm303_vm0, %v2615_v57  ;;  %2243 = vmatprep.subr.bf16.mxu0 %v2242_v51 }
  0x41   : > { %2025 = vmatmul.mubr.msk.f32.gmra.mrb[20].mxu0 %vm303_vm0, %v2604_v54  ;;  %2291 = vmatprep.subr.bf16.mxu1 %v2290_v52 }
  0x42   : > { %2109 = vmatmul.mubr.msk.f32.gmra.mrb[12].mxu1 %vm303_vm0, %v2625_v60  ;;  %2245 = vmatpush3.bf16.msra.mxu0 %v2242_v51 }
  0x43   : > { %2293 = vmatpush3.bf16.msra.mxu1 %v2290_v52  ;;  %2027 = vmatprep.mubr.msk.f32.mxu0 %vm303_vm0, %v2620_v58 }
  0x44   : > { %2111 = vmatprep.mubr.msk.f32.mxu1 %vm303_vm0, %v2647_v3  ;;  %2247 = vmatprep.subr.bf16.mxu0 %v2246_v61 }
  0x45   : > { %2028 = vmatmul.mubr.msk.f32.gmra.mrb[22].mxu0 %vm303_vm0, %v2636_v0  ;;  %2295 = vmatprep.subr.bf16.mxu1 %v2294_v62 }
  0x46   : > { %2112 = vmatmul.mubr.msk.f32.gmra.mrb[14].mxu1 %vm303_vm0, %v286_v2  ;;  %2249 = vmatpush3.bf16.msra.mxu0 %v2246_v61 }
  0x47   : > { %2297 = vmatpush3.bf16.msra.mxu1 %v2294_v62  ;;  %2046 = vmatprep.mubr.msk.f32.mxu0 %vm303_vm0, %v2544_v34 }
  0x48   : > { %2130 = vmatprep.mubr.msk.f32.mxu1 %vm303_vm0, %v2519_v23  ;;  %2299 = vmatprep.subr.bf16.mxu0 %v2298_v4  ;;  %v2306_v23 = vpack.c.bf16 %v1752_v9, %v1751_v8 }
  0x49   : > { %2047 = vmatmul.mubr.msk.f32.vlgmr.msra.gmra.mrb[16].mxu0 %vm303_vm0, %v2556_v38  ;;  %2314 = vmatprep.subr.bf16.mxu1 %v2298_v4 }
  0x4a   : > { %2131 = vmatmul.mubr.msk.f32.vlgmr.msra.gmra.mrb[8].mxu1 %vm303_vm0, %v2553_v37  ;;  %2301 = vmatpush3.bf16.msra.mxu0 %v2298_v4  ;;  %v1754_v37 = vld [vmem:[%s2996_s2 + $0x238] sm:$0xff] }
  0x4b   : > { %2318 = vmatpush3.bf16.msra.mxu1 %v2298_v4  ;;  %2049 = vmatprep.mubr.msk.f32.mxu0 %vm303_vm0, %v2572_v44 }
  0x4c   : > { %2133 = vmatprep.mubr.msk.f32.mxu1 %vm303_vm0, %v2561_v40  ;;  %2303 = vmatprep.subr.bf16.mxu0 %v2302_v7  ;;  %v2310_v40 = vpack.c.bf16 %v1754_v37, %v1753_v10 }
  0x4d   : > { %2050 = vmatmul.mubr.msk.f32.gmra.mrb[18].mxu0 %vm303_vm0, %v2588_v48  ;;  %2315 = vmatprep.subr.bf16.mxu1 %v2302_v7 }
  0x4e   : > { %2134 = vmatmul.mubr.msk.f32.gmra.mrb[10].mxu1 %vm303_vm0, %v2583_v47  ;;  %2305 = vmatpush3.bf16.msra.mxu0 %v2302_v7 }
  0x4f   : > { %2319 = vmatpush3.bf16.msra.mxu1 %v2302_v7  ;;  %2052 = vmatprep.mubr.msk.f32.mxu0 %vm303_vm0, %v2604_v54 }
  0x50   : > { %2136 = vmatprep.mubr.msk.f32.mxu1 %vm303_vm0, %v2593_v50  ;;  %2307 = vmatprep.subr.bf16.mxu0 %v2306_v23 }
  0x51   : > { %2053 = vmatmul.mubr.msk.f32.gmra.mrb[20].mxu0 %vm303_vm0, %v2620_v58  ;;  %2316 = vmatprep.subr.bf16.mxu1 %v2306_v23 }
  0x52   : > { %2137 = vmatmul.mubr.msk.f32.gmra.mrb[12].mxu1 %vm303_vm0, %v2615_v57  ;;  %2309 = vmatpush3.bf16.msra.mxu0 %v2306_v23 }
  0x53   : > { %2320 = vmatpush3.bf16.msra.mxu1 %v2306_v23  ;;  %2055 = vmatprep.mubr.msk.f32.mxu0 %vm303_vm0, %v2636_v0 }
  0x54   : > { %2139 = vmatprep.mubr.msk.f32.mxu1 %vm303_vm0, %v2625_v60  ;;  %2311 = vmatprep.subr.bf16.mxu0 %v2310_v40 }
  0x55   : > { %2056 = vmatmul.mubr.msk.f32.gmra.mrb[22].mxu0 %vm303_vm0, %v2730_v30  ;;  %2317 = vmatprep.subr.bf16.mxu1 %v2310_v40 }
  0x56   : > { %2140 = vmatmul.mubr.msk.f32.gmra.mrb[14].mxu1 %vm303_vm0, %v2647_v3  ;;  %2313 = vmatpush3.bf16.msra.mxu0 %v2310_v40 }
  0x57   : > { %2321 = vmatpush3.bf16.msra.mxu1 %v2310_v40  ;;  %2158 = vmatprep.mubr.msk.f32.mxu0 %vm303_vm0, %v2516_v22  ;;  %v2881_v22 = vld [vmem:[%s2997_s3] ss:$0 sm:$0xff] }
  0x58   : > { %2164 = vmatprep.mubr.msk.f32.mxu1 %vm303_vm0, %v2588_v48 }
  0x59   : > { %2159 = vmatmul.mubr.msk.f32.vlgmr.msra.gmra.mrb[24].mxu0 %vm303_vm0, %v2544_v34 }
  0x5a   : > { %2165 = vmatmul.mubr.msk.f32.vlgmr.msra.gmra.mrb[12].mxu1 %vm303_vm0, %v2604_v54  ;;  %2161 = vmatprep.mubr.msk.f32.mxu0 %vm303_vm0, %v2556_v38 }
  0x5b   : > { %2167 = vmatprep.mubr.msk.f32.mxu1 %vm303_vm0, %v2620_v58 }
  0x5d   : > { %2162 = vmatmul.mubr.msk.f32.gmra.mrb[26].mxu0 %vm303_vm0, %v2572_v44 }
  0x5e   : > { %2168 = vmatmul.mubr.msk.f32.gmra.mrb[14].mxu1 %vm303_vm0, %v2636_v0 }
  0xec   : > { %v1936_v34 = vpop.f32.mrb[0].mxu0 }
  0xed   : > { %v400_v47 = vadd.f32 %v1936_v34, %v2881_v22  ;;  %v394_v48 = vpop.f32.mrb[1].mxu0  ;;  %v1992_v38 = vpop.f32.mrb[0].mxu1 }
  0xee   : > { %v395_v44 = vadd.f32 %v2881_v22, %v394_v48  ;;  %v663_v50 = vpop.f32.mrb[1].mxu1 }
  0xef   : > { %v434_v54 = vmax.f32 %v400_v47, 0.0 }
  0xf0   : > { %v433_v57 = vmax.f32 %v395_v44, 0.0  ;;  %v1939_v58 = vpop.f32.mrb[2].mxu0 }
  0xf1   : > { %443 = vst.msk [vmem:[%s2888_s28 + $0x8] sm:$0xff] %vm441_vm1, %v434_v54  ;;  %v410_v60 = vadd.f32 %v1939_v58, %v2881_v22  ;;  %v404_v0 = vpop.f32.mrb[3].mxu0  ;;  %v1995_v3 = vpop.f32.mrb[2].mxu1 }
  0xf2   : > { %442 = vst.msk [vmem:[%s2888_s28] sm:$0xff] %vm441_vm1, %v433_v57  ;;  %v405_v11 = vadd.f32 %v2881_v22, %v404_v0  ;;  %v673_v12 = vpop.f32.mrb[3].mxu1 }
  0xf3   : > { %v436_v13 = vmax.f32 %v410_v60, 0.0 }
  0xf4   : > { %v435_v14 = vmax.f32 %v405_v11, 0.0  ;;  %v1942_v15 = vpop.f32.mrb[4].mxu0 }
  0xf5   : > { %445 = vst.msk [vmem:[%s2888_s28 + $0x18] sm:$0xff] %vm441_vm1, %v436_v13  ;;  %v420_v16 = vadd.f32 %v1942_v15, %v2881_v22  ;;  %v414_v17 = vpop.f32.mrb[5].mxu0  ;;  %v1998_v18 = vpop.f32.mrb[4].mxu1 }
  0xf6   : > { %444 = vst.msk [vmem:[%s2888_s28 + $0x10] sm:$0xff] %vm441_vm1, %v435_v14  ;;  %v415_v19 = vadd.f32 %v2881_v22, %v414_v17  ;;  %v683_v20 = vpop.f32.mrb[5].mxu1 }
  0xf7   : > { %v438_v21 = vmax.f32 %v420_v16, 0.0 }
  0xf8   : > { %v437_v24 = vmax.f32 %v415_v19, 0.0  ;;  %v1945_v25 = vpop.f32.mrb[6].mxu0 }
  0xf9   : > { %447 = vst.msk [vmem:[%s2888_s28 + $0x28] sm:$0xff] %vm441_vm1, %v438_v21  ;;  %v430_v26 = vadd.f32 %v1945_v25, %v2881_v22  ;;  %v424_v27 = vpop.f32.mrb[7].mxu0  ;;  %v2001_v28 = vpop.f32.mrb[6].mxu1 }
  0xfa   : > { %446 = vst.msk [vmem:[%s2888_s28 + $0x20] sm:$0xff] %vm441_vm1, %v437_v24  ;;  %v425_v29 = vadd.f32 %v2881_v22, %v424_v27  ;;  %v693_v30 = vpop.f32.mrb[7].mxu1 }
  0xfb   : > { %v440_v31 = vmax.f32 %v430_v26, 0.0 }
  0xfc   : > { %v439_v32 = vmax.f32 %v425_v29, 0.0  ;;  %v1964_v33 = vpop.f32.mrb[8].mxu0 }
  0xfd   : > { %449 = vst.msk [vmem:[%s2888_s28 + $0x38] sm:$0xff] %vm441_vm1, %v440_v31  ;;  %v669_v35 = vadd.f32 %v1992_v38, %v1964_v33  ;;  %v534_v36 = vpop.f32.mrb[9].mxu0 }
  0xfe   : > { %448 = vst.msk [vmem:[%s2888_s28 + $0x30] sm:$0xff] %vm441_vm1, %v439_v32  ;;  %v664_v39 = vadd.f32 %v663_v50, %v534_v36 }
  0xff   : > { %v703_v41 = vadd.f32 %v2881_v22, %v669_v35 }
 0x100   : > { %v702_v42 = vadd.f32 %v2881_v22, %v664_v39  ;;  %v1967_v43 = vpop.f32.mrb[10].mxu0 }
 0x101   : > { %v711_v45 = vmax.f32 %v703_v41, 0.0  ;;  %v679_v46 = vadd.f32 %v1995_v3, %v1967_v43  ;;  %v544_v49 = vpop.f32.mrb[11].mxu0 }
 0x102   : > { %v710_v51 = vmax.f32 %v702_v42, 0.0  ;;  %v674_v52 = vadd.f32 %v673_v12, %v544_v49 }
 0x103   : > { %1660 = vst.msk [vmem:[%s2888_s28 + $0x48] sm:$0xff] %vm441_vm1, %v711_v45  ;;  %v705_v53 = vadd.f32 %v2881_v22, %v679_v46 }
 0x104   : > { %1659 = vst.msk [vmem:[%s2888_s28 + $0x40] sm:$0xff] %vm441_vm1, %v710_v51  ;;  %v704_v55 = vadd.f32 %v2881_v22, %v674_v52  ;;  %v1970_v56 = vpop.f32.mrb[12].mxu0 }
 0x105   : > { %v713_v59 = vmax.f32 %v705_v53, 0.0  ;;  %v689_v61 = vadd.f32 %v1998_v18, %v1970_v56  ;;  %v554_v62 = vpop.f32.mrb[13].mxu0 }
 0x106   : > { %v712_v63 = vmax.f32 %v704_v55, 0.0  ;;  %v684_v1 = vadd.f32 %v683_v20, %v554_v62 }
 0x107   : > { %1662 = vst.msk [vmem:[%s2888_s28 + $0x58] sm:$0xff] %vm441_vm1, %v713_v59  ;;  %v707_v2 = vadd.f32 %v2881_v22, %v689_v61 }
 0x108   : > { %1661 = vst.msk [vmem:[%s2888_s28 + $0x50] sm:$0xff] %vm441_vm1, %v712_v63  ;;  %v706_v4 = vadd.f32 %v2881_v22, %v684_v1  ;;  %v1973_v5 = vpop.f32.mrb[14].mxu0 }
 0x109   : > { %v715_v6 = vmax.f32 %v707_v2, 0.0  ;;  %v699_v7 = vadd.f32 %v2001_v28, %v1973_v5  ;;  %v564_v8 = vpop.f32.mrb[15].mxu0 }
 0x10a   : > { %v714_v9 = vmax.f32 %v706_v4, 0.0  ;;  %v694_v23 = vadd.f32 %v693_v30, %v564_v8 }
 0x10b   : > { %1664 = vst.msk [vmem:[%s2888_s28 + $0x68] sm:$0xff] %vm441_vm1, %v715_v6  ;;  %v709_v10 = vadd.f32 %v2881_v22, %v699_v7 }
 0x10c   : > { %1663 = vst.msk [vmem:[%s2888_s28 + $0x60] sm:$0xff] %vm441_vm1, %v714_v9  ;;  %v708_v37 = vadd.f32 %v2881_v22, %v694_v23 }
 0x10d   : > { %v717_v40 = vmax.f32 %v709_v10, 0.0 }
 0x10e   : > { %v716_v34 = vmax.f32 %v708_v37, 0.0 }
 0x10f   : > { %1666 = vst.msk [vmem:[%s2888_s28 + $0x78] sm:$0xff] %vm441_vm1, %v717_v40 }
 0x110   : > { %1665 = vst.msk [vmem:[%s2888_s28 + $0x70] sm:$0xff] %vm441_vm1, %v716_v34 }
 0x11c   : > { %v2048_v47 = vpop.f32.mrb[16].mxu0 }
 0x11d   : > { %v959_v48 = vadd.f32 %v2048_v47, %v2881_v22  ;;  %v2132_v38 = vpop.f32.mrb[8].mxu1  ;;  %v919_v44 = vpop.f32.mrb[17].mxu0 }
 0x11e   : > { %v958_v50 = vadd.f32 %v2881_v22, %v919_v44  ;;  %v1288_v54 = vpop.f32.mrb[9].mxu1 }
 0x11f   : > { %v967_v57 = vmax.f32 %v959_v48, 0.0 }
 0x120   : > { %v966_v58 = vmax.f32 %v958_v50, 0.0  ;;  %v2051_v60 = vpop.f32.mrb[18].mxu0 }
 0x121   : > { %1700 = vst.msk [vmem:[%s2888_s28 + $0x88] sm:$0xff] %vm441_vm1, %v967_v57  ;;  %v961_v0 = vadd.f32 %v2051_v60, %v2881_v22  ;;  %v2135_v3 = vpop.f32.mrb[10].mxu1  ;;  %v929_v11 = vpop.f32.mrb[19].mxu0 }
 0x122   : > { %1699 = vst.msk [vmem:[%s2888_s28 + $0x80] sm:$0xff] %vm441_vm1, %v966_v58  ;;  %v960_v12 = vadd.f32 %v2881_v22, %v929_v11  ;;  %v1298_v13 = vpop.f32.mrb[11].mxu1 }
 0x123   : > { %v969_v14 = vmax.f32 %v961_v0, 0.0 }
 0x124   : > { %v968_v15 = vmax.f32 %v960_v12, 0.0  ;;  %v2054_v16 = vpop.f32.mrb[20].mxu0 }
 0x125   : > { %1702 = vst.msk [vmem:[%s2888_s28 + $0x98] sm:$0xff] %vm441_vm1, %v969_v14  ;;  %v963_v17 = vadd.f32 %v2054_v16, %v2881_v22  ;;  %v939_v18 = vpop.f32.mrb[21].mxu0 }
 0x126   : > { %1701 = vst.msk [vmem:[%s2888_s28 + $0x90] sm:$0xff] %vm441_vm1, %v968_v15  ;;  %v962_v19 = vadd.f32 %v2881_v22, %v939_v18 }
 0x127   : > { %v971_v20 = vmax.f32 %v963_v17, 0.0 }
 0x128   : > { %v970_v21 = vmax.f32 %v962_v19, 0.0  ;;  %v2057_v24 = vpop.f32.mrb[22].mxu0 }
 0x129   : > { %1704 = vst.msk [vmem:[%s2888_s28 + $0xa8] sm:$0xff] %vm441_vm1, %v971_v20  ;;  %v965_v25 = vadd.f32 %v2057_v24, %v2881_v22  ;;  %v949_v26 = vpop.f32.mrb[23].mxu0 }
 0x12a   : > { %1703 = vst.msk [vmem:[%s2888_s28 + $0xa0] sm:$0xff] %vm441_vm1, %v970_v21  ;;  %v964_v27 = vadd.f32 %v2881_v22, %v949_v26 }
 0x12b   : > { %v973_v28 = vmax.f32 %v965_v25, 0.0 }
 0x12c   : > { %v972_v29 = vmax.f32 %v964_v27, 0.0  ;;  %v2160_v30 = vpop.f32.mrb[24].mxu0 }
 0x12d   : > { %1706 = vst.msk [vmem:[%s2888_s28 + $0xb8] sm:$0xff] %vm441_vm1, %v973_v28  ;;  %v2330_v31 = vadd.f32 %v2160_v30, %v2132_v38  ;;  %v2166_v32 = vpop.f32.mrb[12].mxu1  ;;  %v1410_v33 = vpop.f32.mrb[25].mxu0 }
 0x12e   : > { %1705 = vst.msk [vmem:[%s2888_s28 + $0xb0] sm:$0xff] %vm441_vm1, %v972_v29  ;;  %v1462_v35 = vadd.f32 %v2166_v32, %v2881_v22  ;;  %v2331_v36 = vadd.f32 %v1410_v33, %v1288_v54  ;;  %v1430_v39 = vpop.f32.mrb[13].mxu1 }
 0x12f   : > { %v1458_v41 = vadd.f32 %v2330_v31, %v2881_v22  ;;  %v1461_v42 = vadd.f32 %v2881_v22, %v1430_v39 }
 0x130   : > { %v1470_v43 = vmax.f32 %v1462_v35, 0.0  ;;  %v1457_v45 = vadd.f32 %v2331_v36, %v2881_v22  ;;  %v2163_v46 = vpop.f32.mrb[26].mxu0 }
 0x131   : > { %v1466_v49 = vmax.f32 %v1458_v41, 0.0  ;;  %v1469_v51 = vmax.f32 %v1461_v42, 0.0  ;;  %v2332_v52 = vadd.f32 %v2163_v46, %v2135_v3  ;;  %v2169_v53 = vpop.f32.mrb[14].mxu1  ;;  %v1420_v55 = vpop.f32.mrb[27].mxu0 }
 0x132   : > { %1768 = vst.msk [vmem:[%s2888_s28 + $0xe8] sm:$0xff] %vm441_vm1, %v1470_v43  ;;  %v1465_v56 = vmax.f32 %v1457_v45, 0.0  ;;  %v1464_v59 = vadd.f32 %v2169_v53, %v2881_v22  ;;  %v2333_v61 = vadd.f32 %v1420_v55, %v1298_v13  ;;  %v1440_v62 = vpop.f32.mrb[15].mxu1 }
 0x133   : > { %1764 = vst.msk [vmem:[%s2888_s28 + $0xc8] sm:$0xff] %vm441_vm1, %v1466_v49  ;;  %1767 = vst.msk [vmem:[%s2888_s28 + $0xe0] sm:$0xff] %vm441_vm1, %v1469_v51  ;;  %v1460_v63 = vadd.f32 %v2332_v52, %v2881_v22  ;;  %v1463_v1 = vadd.f32 %v2881_v22, %v1440_v62 }
 0x134   : > { %1763 = vst.msk [vmem:[%s2888_s28 + $0xc0] sm:$0xff] %vm441_vm1, %v1465_v56  ;;  %v1472_v2 = vmax.f32 %v1464_v59, 0.0  ;;  %v1459_v4 = vadd.f32 %v2333_v61, %v2881_v22 }
 0x135   : > { %v1468_v5 = vmax.f32 %v1460_v63, 0.0  ;;  %v1471_v6 = vmax.f32 %v1463_v1, 0.0 }
 0x136   : > { %1770 = vst.msk [vmem:[%s2888_s28 + $0xf8] sm:$0xff] %vm441_vm1, %v1472_v2  ;;  %v1467_v7 = vmax.f32 %v1459_v4, 0.0 }
 0x137   : > { %1766 = vst.msk [vmem:[%s2888_s28 + $0xd8] sm:$0xff] %vm441_vm1, %v1468_v5  ;;  %1769 = vst.msk [vmem:[%s2888_s28 + $0xf0] sm:$0xff] %vm441_vm1, %v1471_v6 }
 0x138   : > { %1765 = vst.msk [vmem:[%s2888_s28 + $0xd0] sm:$0xff] %vm441_vm1, %v1467_v7 }
 0x139 PF: > { %s14_s17 = sadd.s32 1, %s2409_s17   ;;  %s2999_s15 = smov %s2405_s16 }
 0x13a   : > { %p11_p5 = scmp.ge.s32.totalorder %s14_s17, 4   ;;  %s3000_s16 = smov %s3002_s18 }
 0x13c   :  { %13 = sbr.rel (!%p11_p5) target bundleno = 2 (0x2), region = 86 }

// kernel: _lambda_.5
= control target key start
LH: loop header
LB: loop body
LE: loop exit
PB: predicated region body
PF: predicated region fallthrough
CT: control target
= control target key end

     0   :  { %s5658_s20 = smov 0   ;;  %s6858_s0 = inlined_call_operand.vmem [shape: f32[512,32], index: 0, kind: input, shape index: {}]   ;;  %s6859_s1 = inlined_call_operand.vmem [shape: f32[4,32,16], index: 1, kind: input, shape index: {}]   ;;  %s6860_s2 = inlined_call_operand.vmem [shape: f32[1,16], index: 2, kind: input, shape index: {}]   ;;  %s6861_s3 = inlined_call_operand.vmem [shape: f32[16,1], index: 3, kind: input, shape index: {}]   ;;  %s6862_s4 = inlined_call_operand.<no memory space> [shape: f32[1,1], index: 4, kind: input, shape index: {}]   ;;  %s6863_s5 = inlined_call_operand.vmem [shape: f32[512,4], index: 5, kind: output, shape index: {}]  }
   0x1   :  { %v10_v0 = vstv %s6862_s4 }
   0x2   :  { %11 = vst [vmem:[#allocation2] sm:$0x1] %v10_v0 }
   0x3 LB: > { %s4047_s21 = sadd.s32 4294967295, %s5620_s20   ;;  %p4051_p0 = scmp.ge.s32.totalorder %s5620_s20, 1  ;;  %s5620_s20 = sphi %s5658_s20, %s17_s20  }
   0x4   : > { %p190_p1 = scmp.lt.s32.totalorder %s5620_s20, 3 }
   0x6   : > { %p191_p2 = pnand %p4051_p0, %p190_p1 }
   0x7   : > { %v266_v1 = vld [vmem:[%s6859_s1] sm:$0xff] (!%p191_p2)  ;;  %v267_v2 = vld [vmem:[%s6859_s1 + $0x8] sm:$0xff] (!%p191_p2)  ;;  %v268_v3 = vld [vmem:[%s6859_s1 + $0x10] sm:$0xff] (!%p191_p2)  ;;  %s4052_s27 = sshll.u32 (!%p191_p2), %s4047_s21, 5  ;;  %vm276_vm0 = vcmask (!%p191_p2), 261120   ;;  %vm636_vm1 = vcmask (!%p191_p2), 130048  }
   0x8   : > { %194 = sbr.rel (%p191_p2) target bundleno = 1072 (0x430), region = 40  ;;  %v5040_v4 = vpack.c.bf16 (!%p191_p2), %v267_v2, %v266_v1  ;;  %v269_v5 = vld [vmem:[%s6859_s1 + $0x18] sm:$0xff] (!%p191_p2)  ;;  %p219_p3 = scmp.lt.s32.totalorder (!%p191_p2), %s4052_s27, 63  ;;  %v263_v39 = vld [vmem:[%s6861_s3] sm:$0xff] (!%p191_p2)  ;;  %v264_v40 = vld [vmem:[%s6861_s3 + $0x8] sm:$0xff] (!%p191_p2)  ;;  %vm1150_vm2 = vcmask (!%p191_p2), 7168  }
   0x9   : > { %v5044_v6 = vpack.c.bf16 (!%p191_p2), %v269_v5, %v268_v3  ;;  %v5854_v41 = vpack.c.bf16 (!%p191_p2), %v264_v40, %v263_v39  ;;  %v4122_v42 = vld [vmem:[%s6859_s1 + $0x20] sm:$0xff] (!%p191_p2)  ;;  %v4123_v43 = vld [vmem:[%s6859_s1 + $0x28] sm:$0xff] (!%p191_p2)  ;;  %v4124_v50 = vld [vmem:[%s6859_s1 + $0x30] sm:$0xff] (!%p191_p2)  ;;  %s5622_s19 = smov (!%p191_p2), 1   ;;  %s5623_s21 = smov (!%p191_p2), 2   ;;  %vm2086_vm3 = vcmask (!%p191_p2), 15368  }
   0xa   : > { %5041 = vmatprep.subr.bf16.mxu0 (!%p191_p2), %v5040_v4  ;;  %v5052_v44 = vpack.c.bf16 (!%p191_p2), %v4123_v43, %v4122_v42  ;;  %v5870_v45 = vld [vmem:[%s6860_s2] ss:$0 sm:$0xff] (!%p191_p2)  ;;  %v4125_v51 = vld [vmem:[%s6859_s1 + $0x38] sm:$0xff] (!%p191_p2)  ;;  %v4191_v60 = vld [vmem:[%s6859_s1 + $0x48] sm:$0xff] (!%p191_p2)  ;;  %s5624_s22 = smov (!%p191_p2), 3   ;;  %vm3022_vm4 = vcmask (!%p191_p2), 23568  }
   0xb   : > { %5043 = vmatpush3.bf16.msra.mxu0 (!%p191_p2), %v5040_v4  ;;  %5049 = vmatprep.subr.bf16.mxu1 (!%p191_p2), %v5854_v41  ;;  %v5056_v57 = vpack.c.bf16 (!%p191_p2), %v4125_v51, %v4124_v50  ;;  %v4190_v59 = vld [vmem:[%s6859_s1 + $0x40] sm:$0xff] (!%p191_p2)  ;;  %vm3958_vm5 = vcmask (!%p191_p2), 31768  }
   0xc   : > { %5045 = vmatprep.subr.bf16.mxu0 (!%p191_p2), %v5044_v6  ;;  %5051 = vmatpush3.bf16.msra.mxu1 (!%p191_p2), %v5854_v41  ;;  %v5891_v2 = vpack.c.bf16 (!%p191_p2), %v4191_v60, %v4190_v59 }
   0xd   : > { %5053 = vmatprep.subr.bf16.mxu1 (!%p191_p2), %v5052_v44 }
   0xf   : > { %s6865_s27 = smov (!%p219_p3, %s4052_s27), 63  ;;  %5047 = vmatpush3.bf16.msra.mxu0 %v5044_v6 }
  0x10   : > { %s4053_s30 = sshll.u32 %s6865_s27, 3  ;;  %5061 = vmatprep.subr.bf16.mxu0 %v5854_v41 }
  0x11   : > { %s5686_s8 = scalar_lea.vmem %s6858_s0, %s4053_s30  ;;  %s6169_s18 = scalar_lea.vmem %s6863_s5, %s4053_s30 }
  0x12   : > { %v5689_v7 = vld [vmem:[%s5686_s8] sm:$0xff]  ;;  %v5694_v8 = vld [vmem:[%s5686_s8 + $0x8] sm:$0xff]  ;;  %v5697_v9 = vld [vmem:[%s5686_s8 + $0x10] sm:$0xff] }
  0x13   : > { %4616 = vmatprep.mubr.msk.f32.mxu0 %vm276_vm0, %v5689_v7  ;;  %v5704_v10 = vld [vmem:[%s5686_s8 + $0x18] sm:$0xff]  ;;  %v5707_v11 = vld [vmem:[%s5686_s8 + $0x20] sm:$0xff]  ;;  %v5714_v12 = vld [vmem:[%s5686_s8 + $0x28] sm:$0xff] }
  0x14   : > { %4617 = vmatmul.mubr.msk.f32.vlgmr.msra.gmra.mrb[0].mxu0 %vm276_vm0, %v5694_v8  ;;  %v5717_v13 = vld [vmem:[%s5686_s8 + $0x30] sm:$0xff]  ;;  %v5724_v14 = vld [vmem:[%s5686_s8 + $0x38] sm:$0xff]  ;;  %v5727_v15 = vld [vmem:[%s5686_s8 + $0x40] sm:$0xff] }
  0x15   : > { %4619 = vmatprep.mubr.msk.f32.mxu0 %vm276_vm0, %v5697_v9  ;;  %v5734_v16 = vld [vmem:[%s5686_s8 + $0x48] sm:$0xff]  ;;  %v5737_v17 = vld [vmem:[%s5686_s8 + $0x50] sm:$0xff]  ;;  %v5744_v18 = vld [vmem:[%s5686_s8 + $0x58] sm:$0xff]  ;;  %5063 = vmatpush3.bf16.msra.mxu0 %v5854_v41 }
  0x16   : > { %v5747_v19 = vld [vmem:[%s5686_s8 + $0x60] sm:$0xff]  ;;  %v5754_v20 = vld [vmem:[%s5686_s8 + $0x68] sm:$0xff]  ;;  %v5757_v21 = vld [vmem:[%s5686_s8 + $0x70] sm:$0xff]  ;;  %5073 = vmatprep.subr.bf16.mxu0 %v5854_v41 }
  0x17   : > { %v5764_v22 = vld [vmem:[%s5686_s8 + $0x78] sm:$0xff]  ;;  %v5767_v23 = vld [vmem:[%s5686_s8 + $0x80] sm:$0xff]  ;;  %v5774_v24 = vld [vmem:[%s5686_s8 + $0x88] sm:$0xff] }
  0x18   : > { %4620 = vmatmul.mubr.msk.f32.gmra.mrb[2].mxu0 %vm276_vm0, %v5704_v10  ;;  %v5777_v25 = vld [vmem:[%s5686_s8 + $0x90] sm:$0xff]  ;;  %v5784_v26 = vld [vmem:[%s5686_s8 + $0x98] sm:$0xff]  ;;  %v5787_v27 = vld [vmem:[%s5686_s8 + $0xa0] sm:$0xff] }
  0x19   : > { %4622 = vmatprep.mubr.msk.f32.mxu0 %vm276_vm0, %v5707_v11  ;;  %v5794_v28 = vld [vmem:[%s5686_s8 + $0xa8] sm:$0xff]  ;;  %v5797_v29 = vld [vmem:[%s5686_s8 + $0xb0] sm:$0xff]  ;;  %v5804_v30 = vld [vmem:[%s5686_s8 + $0xb8] sm:$0xff] }
  0x1a   : > { %v5807_v31 = vld [vmem:[%s5686_s8 + $0xc0] sm:$0xff]  ;;  %v5814_v32 = vld [vmem:[%s5686_s8 + $0xc8] sm:$0xff]  ;;  %v5817_v33 = vld [vmem:[%s5686_s8 + $0xd0] sm:$0xff] }
  0x1b   : > { %v5824_v34 = vld [vmem:[%s5686_s8 + $0xd8] sm:$0xff]  ;;  %v5827_v35 = vld [vmem:[%s5686_s8 + $0xe0] sm:$0xff]  ;;  %v5834_v36 = vld [vmem:[%s5686_s8 + $0xe8] sm:$0xff] }
  0x1c   : > { %4623 = vmatmul.mubr.msk.f32.gmra.mrb[4].mxu0 %vm276_vm0, %v5714_v12  ;;  %v5837_v37 = vld [vmem:[%s5686_s8 + $0xf0] sm:$0xff]  ;;  %v5844_v38 = vld [vmem:[%s5686_s8 + $0xf8] sm:$0xff] }
  0x1d   : > { %4625 = vmatprep.mubr.msk.f32.mxu0 %vm276_vm0, %v5717_v13 }
  0x20   : > { %4626 = vmatmul.mubr.msk.f32.gmra.mrb[6].mxu0 %vm276_vm0, %v5724_v14 }
  0x21   : > { %4628 = vmatprep.mubr.msk.f32.mxu0 %vm276_vm0, %v5727_v15 }
  0x24   : > { %4629 = vmatmul.mubr.msk.f32.gmra.mrb[8].mxu0 %vm276_vm0, %v5734_v16 }
  0x25   : > { %4631 = vmatprep.mubr.msk.f32.mxu0 %vm276_vm0, %v5737_v17 }
  0x28   : > { %4632 = vmatmul.mubr.msk.f32.gmra.mrb[10].mxu0 %vm276_vm0, %v5744_v18 }
  0x29   : > { %4634 = vmatprep.mubr.msk.f32.mxu0 %vm276_vm0, %v5747_v19 }
  0x2c   : > { %4635 = vmatmul.mubr.msk.f32.gmra.mrb[12].mxu0 %vm276_vm0, %v5754_v20 }
  0x2d   : > { %4637 = vmatprep.mubr.msk.f32.mxu0 %vm276_vm0, %v5757_v21 }
  0x30   : > { %4638 = vmatmul.mubr.msk.f32.gmra.mrb[14].mxu0 %vm276_vm0, %v5764_v22 }
  0x31   : > { %4640 = vmatprep.mubr.msk.f32.mxu0 %vm276_vm0, %v5767_v23 }
  0x34   : > { %4641 = vmatmul.mubr.msk.f32.gmra.mrb[16].mxu0 %vm276_vm0, %v5774_v24 }
  0x35   : > { %4643 = vmatprep.mubr.msk.f32.mxu0 %vm276_vm0, %v5777_v25 }
  0x38   : > { %4644 = vmatmul.mubr.msk.f32.gmra.mrb[18].mxu0 %vm276_vm0, %v5784_v26 }
  0x39   : > { %4646 = vmatprep.mubr.msk.f32.mxu0 %vm276_vm0, %v5787_v27 }
  0x3c   : > { %4647 = vmatmul.mubr.msk.f32.gmra.mrb[20].mxu0 %vm276_vm0, %v5794_v28 }
  0x3d   : > { %4649 = vmatprep.mubr.msk.f32.mxu0 %vm276_vm0, %v5797_v29 }
  0x40   : > { %4650 = vmatmul.mubr.msk.f32.gmra.mrb[22].mxu0 %vm276_vm0, %v5804_v30 }
  0x41   : > { %4652 = vmatprep.mubr.msk.f32.mxu0 %vm276_vm0, %v5807_v31 }
  0x44   : > { %4653 = vmatmul.mubr.msk.f32.gmra.mrb[24].mxu0 %vm276_vm0, %v5814_v32 }
  0x45   : > { %4655 = vmatprep.mubr.msk.f32.mxu0 %vm276_vm0, %v5817_v33 }
  0x48   : > { %4656 = vmatmul.mubr.msk.f32.gmra.mrb[26].mxu0 %vm276_vm0, %v5824_v34 }
  0x49   : > { %4658 = vmatprep.mubr.msk.f32.mxu0 %vm276_vm0, %v5827_v35 }
  0x4c   : > { %4659 = vmatmul.mubr.msk.f32.gmra.mrb[28].mxu0 %vm276_vm0, %v5834_v36 }
  0x4d   : > { %4661 = vmatprep.mubr.msk.f32.mxu0 %vm276_vm0, %v5837_v37 }
  0x50   : > { %4662 = vmatmul.mubr.msk.f32.gmra.mrb[30].mxu0 %vm276_vm0, %v5844_v38 }
  0xe7   : > { %v4618_v46 = vpop.f32.mrb[0].mxu0 }
  0xe8   : > { %v445_v47 = vadd.f32 %v4618_v46, %v5870_v45  ;;  %v439_v48 = vpop.f32.mrb[1].mxu0 }
  0xe9   : > { %v440_v49 = vadd.f32 %v5870_v45, %v439_v48 }
  0xea   : > { %v599_v54 = vmax.f32 %v445_v47, 0.0 }
  0xeb   : > { %v598_v52 = vmax.f32 %v440_v49, 0.0  ;;  %v4621_v53 = vpop.f32.mrb[2].mxu0 }
  0xec   : > { %v455_v55 = vadd.f32 %v4621_v53, %v5870_v45  ;;  %v449_v56 = vpop.f32.mrb[3].mxu0 }
  0xed   : > { %v450_v58 = vadd.f32 %v5870_v45, %v449_v56  ;;  %4668 = vmatprep.mubr.msk.f32.mxu1 %vm636_vm1, %v598_v52 }
  0xee   : > { %4669 = vmatmul.mubr.msk.f32.vlgmr.msra.gmra.mrb[0].mxu1 %vm636_vm1, %v599_v54  ;;  %v601_v63 = vmax.f32 %v455_v55, 0.0 }
  0xef   : > { %v600_v61 = vmax.f32 %v450_v58, 0.0  ;;  %5055 = vmatpush3.bf16.msra.mxu1 %v5052_v44  ;;  %v4624_v62 = vpop.f32.mrb[4].mxu0 }
  0xf0   : > { %v465_v0 = vadd.f32 %v4624_v62, %v5870_v45  ;;  %v459_v1 = vpop.f32.mrb[5].mxu0  ;;  %5057 = vmatprep.subr.bf16.mxu1 %v5056_v57 }
  0xf1   : > { %v460_v3 = vadd.f32 %v5870_v45, %v459_v1  ;;  %4671 = vmatprep.mubr.msk.f32.mxu1 %vm636_vm1, %v600_v61 }
  0xf2   : > { %4672 = vmatmul.mubr.msk.f32.gmra.mrb[2].mxu1 %vm636_vm1, %v601_v63  ;;  %v603_v6 = vmax.f32 %v465_v0, 0.0 }
  0xf3   : > { %v602_v4 = vmax.f32 %v460_v3, 0.0  ;;  %v4627_v5 = vpop.f32.mrb[6].mxu0  ;;  %5059 = vmatpush3.bf16.msra.mxu1 %v5056_v57 }
  0xf4   : > { %v475_v39 = vadd.f32 %v4627_v5, %v5870_v45  ;;  %v469_v40 = vpop.f32.mrb[7].mxu0  ;;  %5065 = vmatprep.subr.bf16.mxu1 %v5891_v2 }
  0xf5   : > { %v470_v42 = vadd.f32 %v5870_v45, %v469_v40  ;;  %4674 = vmatprep.mubr.msk.f32.mxu1 %vm636_vm1, %v602_v4 }
  0xf6   : > { %4675 = vmatmul.mubr.msk.f32.gmra.mrb[4].mxu1 %vm636_vm1, %v603_v6  ;;  %v605_v46 = vmax.f32 %v475_v39, 0.0 }
  0xf7   : > { %v604_v43 = vmax.f32 %v470_v42, 0.0  ;;  %v4630_v44 = vpop.f32.mrb[8].mxu0 }
  0xf8   : > { %v485_v47 = vadd.f32 %v4630_v44, %v5870_v45  ;;  %v479_v48 = vpop.f32.mrb[9].mxu0 }
  0xf9   : > { %v480_v49 = vadd.f32 %v5870_v45, %v479_v48  ;;  %4677 = vmatprep.mubr.msk.f32.mxu1 %vm636_vm1, %v604_v43 }
  0xfa   : > { %4678 = vmatmul.mubr.msk.f32.gmra.mrb[6].mxu1 %vm636_vm1, %v605_v46  ;;  %v607_v52 = vmax.f32 %v485_v47, 0.0 }
  0xfb   : > { %v606_v50 = vmax.f32 %v480_v49, 0.0  ;;  %v4633_v51 = vpop.f32.mrb[10].mxu0 }
  0xfc   : > { %v495_v53 = vadd.f32 %v4633_v51, %v5870_v45  ;;  %v489_v54 = vpop.f32.mrb[11].mxu0 }
  0xfd   : > { %v490_v55 = vadd.f32 %v5870_v45, %v489_v54  ;;  %4680 = vmatprep.mubr.msk.f32.mxu1 %vm636_vm1, %v606_v50 }
  0xfe   : > { %4681 = vmatmul.mubr.msk.f32.gmra.mrb[8].mxu1 %vm636_vm1, %v607_v52  ;;  %v609_v58 = vmax.f32 %v495_v53, 0.0 }
  0xff   : > { %v608_v56 = vmax.f32 %v490_v55, 0.0  ;;  %v4636_v57 = vpop.f32.mrb[12].mxu0 }
 0x100   : > { %v505_v59 = vadd.f32 %v4636_v57, %v5870_v45  ;;  %v499_v60 = vpop.f32.mrb[13].mxu0 }
 0x101   : > { %v500_v61 = vadd.f32 %v5870_v45, %v499_v60  ;;  %4683 = vmatprep.mubr.msk.f32.mxu1 %vm636_vm1, %v608_v56 }
 0x102   : > { %4684 = vmatmul.mubr.msk.f32.gmra.mrb[10].mxu1 %vm636_vm1, %v609_v58  ;;  %v611_v0 = vmax.f32 %v505_v59, 0.0 }
 0x103   : > { %v610_v62 = vmax.f32 %v500_v61, 0.0  ;;  %v4639_v63 = vpop.f32.mrb[14].mxu0 }
 0x104   : > { %v515_v1 = vadd.f32 %v4639_v63, %v5870_v45  ;;  %v509_v3 = vpop.f32.mrb[15].mxu0 }
 0x105   : > { %v510_v4 = vadd.f32 %v5870_v45, %v509_v3  ;;  %4686 = vmatprep.mubr.msk.f32.mxu1 %vm636_vm1, %v610_v62 }
 0x106   : > { %4687 = vmatmul.mubr.msk.f32.gmra.mrb[12].mxu1 %vm636_vm1, %v611_v0  ;;  %v613_v39 = vmax.f32 %v515_v1, 0.0 }
 0x107   : > { %v612_v5 = vmax.f32 %v510_v4, 0.0  ;;  %v4642_v6 = vpop.f32.mrb[16].mxu0 }
 0x108   : > { %v525_v40 = vadd.f32 %v4642_v6, %v5870_v45  ;;  %v519_v42 = vpop.f32.mrb[17].mxu0 }
 0x109   : > { %v520_v43 = vadd.f32 %v5870_v45, %v519_v42  ;;  %4689 = vmatprep.mubr.msk.f32.mxu1 %vm636_vm1, %v612_v5 }
 0x10a   : > { %4690 = vmatmul.mubr.msk.f32.gmra.mrb[14].mxu1 %vm636_vm1, %v613_v39  ;;  %v615_v47 = vmax.f32 %v525_v40, 0.0 }
 0x10b   : > { %v614_v44 = vmax.f32 %v520_v43, 0.0  ;;  %v4645_v46 = vpop.f32.mrb[18].mxu0 }
 0x10c   : > { %v535_v48 = vadd.f32 %v4645_v46, %v5870_v45  ;;  %v529_v49 = vpop.f32.mrb[19].mxu0 }
 0x10d   : > { %v530_v50 = vadd.f32 %v5870_v45, %v529_v49  ;;  %4692 = vmatprep.mubr.msk.f32.mxu1 %vm636_vm1, %v614_v44 }
 0x10e   : > { %4693 = vmatmul.mubr.msk.f32.gmra.mrb[16].mxu1 %vm636_vm1, %v615_v47  ;;  %v617_v53 = vmax.f32 %v535_v48, 0.0 }
 0x10f   : > { %v616_v51 = vmax.f32 %v530_v50, 0.0  ;;  %v4648_v52 = vpop.f32.mrb[20].mxu0 }
 0x110   : > { %v545_v54 = vadd.f32 %v4648_v52, %v5870_v45  ;;  %v539_v55 = vpop.f32.mrb[21].mxu0 }
 0x111   : > { %v540_v56 = vadd.f32 %v5870_v45, %v539_v55  ;;  %4695 = vmatprep.mubr.msk.f32.mxu1 %vm636_vm1, %v616_v51 }
 0x112   : > { %4696 = vmatmul.mubr.msk.f32.gmra.mrb[18].mxu1 %vm636_vm1, %v617_v53  ;;  %v619_v59 = vmax.f32 %v545_v54, 0.0 }
 0x113   : > { %v618_v57 = vmax.f32 %v540_v56, 0.0  ;;  %v4651_v58 = vpop.f32.mrb[22].mxu0 }
 0x114   : > { %v555_v60 = vadd.f32 %v4651_v58, %v5870_v45  ;;  %v549_v61 = vpop.f32.mrb[23].mxu0 }
 0x115   : > { %v550_v62 = vadd.f32 %v5870_v45, %v549_v61  ;;  %4698 = vmatprep.mubr.msk.f32.mxu1 %vm636_vm1, %v618_v57  ;;  %v4193_v61 = vld [vmem:[%s6859_s1 + $0x58] sm:$0xff] }
 0x116   : > { %4699 = vmatmul.mubr.msk.f32.gmra.mrb[20].mxu1 %vm636_vm1, %v619_v59  ;;  %v621_v1 = vmax.f32 %v555_v60, 0.0  ;;  %v4192_v60 = vld [vmem:[%s6859_s1 + $0x50] sm:$0xff] }
 0x117   : > { %v620_v63 = vmax.f32 %v550_v62, 0.0  ;;  %v4654_v0 = vpop.f32.mrb[24].mxu0  ;;  %v4258_v62 = vld [vmem:[%s6859_s1 + $0x60] sm:$0xff] }
 0x118   : > { %v565_v3 = vadd.f32 %v4654_v0, %v5870_v45  ;;  %v559_v4 = vpop.f32.mrb[25].mxu0 }
 0x119   : > { %v560_v5 = vadd.f32 %v5870_v45, %v559_v4  ;;  %4701 = vmatprep.mubr.msk.f32.mxu1 %vm636_vm1, %v620_v63  ;;  %v4259_v63 = vld [vmem:[%s6859_s1 + $0x68] sm:$0xff] }
 0x11a   : > { %4702 = vmatmul.mubr.msk.f32.gmra.mrb[22].mxu1 %vm636_vm1, %v621_v1  ;;  %v623_v40 = vmax.f32 %v565_v3, 0.0  ;;  %v5076_v0 = vpack.c.bf16 %v4259_v63, %v4258_v62  ;;  %v4261_v1 = vld [vmem:[%s6859_s1 + $0x78] sm:$0xff] }
 0x11b   : > { %v622_v6 = vmax.f32 %v560_v5, 0.0  ;;  %v4657_v39 = vpop.f32.mrb[26].mxu0 }
 0x11c   : > { %v575_v42 = vadd.f32 %v4657_v39, %v5870_v45  ;;  %v569_v43 = vpop.f32.mrb[27].mxu0 }
 0x11d   : > { %v570_v44 = vadd.f32 %v5870_v45, %v569_v43  ;;  %4704 = vmatprep.mubr.msk.f32.mxu1 %vm636_vm1, %v622_v6 }
 0x11e   : > { %4705 = vmatmul.mubr.msk.f32.gmra.mrb[24].mxu1 %vm636_vm1, %v623_v40  ;;  %v625_v48 = vmax.f32 %v575_v42, 0.0 }
 0x11f   : > { %v624_v46 = vmax.f32 %v570_v44, 0.0  ;;  %v4660_v47 = vpop.f32.mrb[28].mxu0 }
 0x120   : > { %v585_v49 = vadd.f32 %v4660_v47, %v5870_v45  ;;  %v579_v50 = vpop.f32.mrb[29].mxu0 }
 0x121   : > { %v580_v51 = vadd.f32 %v5870_v45, %v579_v50  ;;  %4707 = vmatprep.mubr.msk.f32.mxu1 %vm636_vm1, %v624_v46 }
 0x122   : > { %4708 = vmatmul.mubr.msk.f32.gmra.mrb[26].mxu1 %vm636_vm1, %v625_v48  ;;  %v627_v54 = vmax.f32 %v585_v49, 0.0 }
 0x123   : > { %v626_v52 = vmax.f32 %v580_v51, 0.0  ;;  %v4663_v53 = vpop.f32.mrb[30].mxu0 }
 0x124   : > { %v595_v55 = vadd.f32 %v4663_v53, %v5870_v45  ;;  %v589_v56 = vpop.f32.mrb[31].mxu0 }
 0x125   : > { %v590_v57 = vadd.f32 %v5870_v45, %v589_v56  ;;  %4710 = vmatprep.mubr.msk.f32.mxu1 %vm636_vm1, %v626_v52  ;;  %v5068_v45 = vpack.c.bf16 %v4193_v61, %v4192_v60 }
 0x126   : > { %4711 = vmatmul.mubr.msk.f32.gmra.mrb[28].mxu1 %vm636_vm1, %v627_v54  ;;  %v629_v59 = vmax.f32 %v595_v55, 0.0 }
 0x127   : > { %v628_v58 = vmax.f32 %v590_v57, 0.0 }
 0x129   : > { %4713 = vmatprep.mubr.msk.f32.mxu1 %vm636_vm1, %v628_v58 }
 0x12a   : > { %4714 = vmatmul.mubr.msk.f32.gmra.mrb[30].mxu1 %vm636_vm1, %v629_v59 }
 0x12b   : > { %4724 = vmatprep.mubr.msk.f32.mxu1 %vm276_vm0, %v5689_v7 }
 0x12e   : > { %4725 = vmatmul.mubr.msk.f32.vlgmr.msra.gmra.mrb[32].mxu1 %vm276_vm0, %v5694_v8 }
 0x12f   : > { %4727 = vmatprep.mubr.msk.f32.mxu1 %vm276_vm0, %v5697_v9  ;;  %5067 = vmatpush3.bf16.msra.mxu1 %v5891_v2  ;;  %v4260_v2 = vld [vmem:[%s6859_s1 + $0x70] sm:$0xff] }
 0x130   : > { %5069 = vmatprep.subr.bf16.mxu1 %v5068_v45  ;;  %v5080_v3 = vpack.c.bf16 %v4261_v1, %v4260_v2 }
 0x132   : > { %4728 = vmatmul.mubr.msk.f32.gmra.mrb[34].mxu1 %vm276_vm0, %v5704_v10 }
 0x133   : > { %4730 = vmatprep.mubr.msk.f32.mxu1 %vm276_vm0, %v5707_v11  ;;  %5071 = vmatpush3.bf16.msra.mxu1 %v5068_v45 }
 0x134   : > { %5077 = vmatprep.subr.bf16.mxu1 %v5076_v0 }
 0x136   : > { %4731 = vmatmul.mubr.msk.f32.gmra.mrb[36].mxu1 %vm276_vm0, %v5714_v12 }
 0x137   : > { %4733 = vmatprep.mubr.msk.f32.mxu1 %vm276_vm0, %v5717_v13 }
 0x13a   : > { %4734 = vmatmul.mubr.msk.f32.gmra.mrb[38].mxu1 %vm276_vm0, %v5724_v14 }
 0x13b   : > { %4736 = vmatprep.mubr.msk.f32.mxu1 %vm276_vm0, %v5727_v15 }
 0x13e   : > { %4737 = vmatmul.mubr.msk.f32.gmra.mrb[40].mxu1 %vm276_vm0, %v5734_v16 }
 0x13f   : > { %4739 = vmatprep.mubr.msk.f32.mxu1 %vm276_vm0, %v5737_v17 }
 0x142   : > { %4740 = vmatmul.mubr.msk.f32.gmra.mrb[42].mxu1 %vm276_vm0, %v5744_v18 }
 0x143   : > { %4742 = vmatprep.mubr.msk.f32.mxu1 %vm276_vm0, %v5747_v19 }
 0x146   : > { %4743 = vmatmul.mubr.msk.f32.gmra.mrb[44].mxu1 %vm276_vm0, %v5754_v20 }
 0x147   : > { %4745 = vmatprep.mubr.msk.f32.mxu1 %vm276_vm0, %v5757_v21 }
 0x14a   : > { %4746 = vmatmul.mubr.msk.f32.gmra.mrb[46].mxu1 %vm276_vm0, %v5764_v22 }
 0x14b   : > { %4748 = vmatprep.mubr.msk.f32.mxu1 %vm276_vm0, %v5767_v23 }
 0x14e   : > { %4749 = vmatmul.mubr.msk.f32.gmra.mrb[48].mxu1 %vm276_vm0, %v5774_v24 }
 0x14f   : > { %4751 = vmatprep.mubr.msk.f32.mxu1 %vm276_vm0, %v5777_v25 }
 0x152   : > { %4752 = vmatmul.mubr.msk.f32.gmra.mrb[50].mxu1 %vm276_vm0, %v5784_v26 }
 0x153   : > { %4754 = vmatprep.mubr.msk.f32.mxu1 %vm276_vm0, %v5787_v27 }
 0x156   : > { %4755 = vmatmul.mubr.msk.f32.gmra.mrb[52].mxu1 %vm276_vm0, %v5794_v28 }
 0x157   : > { %4757 = vmatprep.mubr.msk.f32.mxu1 %vm276_vm0, %v5797_v29 }
 0x15a   : > { %4758 = vmatmul.mubr.msk.f32.gmra.mrb[54].mxu1 %vm276_vm0, %v5804_v30 }
 0x15b   : > { %4760 = vmatprep.mubr.msk.f32.mxu1 %vm276_vm0, %v5807_v31 }
 0x15e   : > { %4761 = vmatmul.mubr.msk.f32.gmra.mrb[56].mxu1 %vm276_vm0, %v5814_v32 }
 0x15f   : > { %4763 = vmatprep.mubr.msk.f32.mxu1 %vm276_vm0, %v5817_v33 }
 0x162   : > { %4764 = vmatmul.mubr.msk.f32.gmra.mrb[58].mxu1 %vm276_vm0, %v5824_v34 }
 0x163   : > { %4766 = vmatprep.mubr.msk.f32.mxu1 %vm276_vm0, %v5827_v35 }
 0x166   : > { %4767 = vmatmul.mubr.msk.f32.gmra.mrb[60].mxu1 %vm276_vm0, %v5834_v36 }
 0x167   : > { %4769 = vmatprep.mubr.msk.f32.mxu1 %vm276_vm0, %v5837_v37 }
 0x16a   : > { %4770 = vmatmul.mubr.msk.f32.gmra.mrb[62].mxu1 %vm276_vm0, %v5844_v38 }
 0x16b   : > { %4832 = vmatprep.mubr.msk.f32.mxu1 %vm276_vm0, %v5689_v7 }
 0x16e   : > { %4833 = vmatmul.mubr.msk.f32.vlgmr.msra.gmra.mrb[64].mxu1 %vm276_vm0, %v5694_v8 }
 0x16f   : > { %4835 = vmatprep.mubr.msk.f32.mxu1 %vm276_vm0, %v5697_v9  ;;  %5079 = vmatpush3.bf16.msra.mxu1 %v5076_v0 }
 0x170   : > { %5081 = vmatprep.subr.bf16.mxu1 %v5080_v3 }
 0x172   : > { %4836 = vmatmul.mubr.msk.f32.gmra.mrb[66].mxu1 %vm276_vm0, %v5704_v10 }
 0x173   : > { %4838 = vmatprep.mubr.msk.f32.mxu1 %vm276_vm0, %v5707_v11  ;;  %5083 = vmatpush3.bf16.msra.mxu1 %v5080_v3 }
 0x176   : > { %4839 = vmatmul.mubr.msk.f32.gmra.mrb[68].mxu1 %vm276_vm0, %v5714_v12 }
 0x177   : > { %4841 = vmatprep.mubr.msk.f32.mxu1 %vm276_vm0, %v5717_v13 }
 0x17a   : > { %4842 = vmatmul.mubr.msk.f32.gmra.mrb[70].mxu1 %vm276_vm0, %v5724_v14 }
 0x17b   : > { %4844 = vmatprep.mubr.msk.f32.mxu1 %vm276_vm0, %v5727_v15 }
 0x17e   : > { %4845 = vmatmul.mubr.msk.f32.gmra.mrb[72].mxu1 %vm276_vm0, %v5734_v16 }
 0x17f   : > { %4847 = vmatprep.mubr.msk.f32.mxu1 %vm276_vm0, %v5737_v17 }
 0x182   : > { %4848 = vmatmul.mubr.msk.f32.gmra.mrb[74].mxu1 %vm276_vm0, %v5744_v18 }
 0x183   : > { %4850 = vmatprep.mubr.msk.f32.mxu1 %vm276_vm0, %v5747_v19 }
 0x186   : > { %4851 = vmatmul.mubr.msk.f32.gmra.mrb[76].mxu1 %vm276_vm0, %v5754_v20 }
 0x187   : > { %4853 = vmatprep.mubr.msk.f32.mxu1 %vm276_vm0, %v5757_v21 }
 0x18a   : > { %4854 = vmatmul.mubr.msk.f32.gmra.mrb[78].mxu1 %vm276_vm0, %v5764_v22 }
 0x18b   : > { %4856 = vmatprep.mubr.msk.f32.mxu1 %vm276_vm0, %v5767_v23 }
 0x18e   : > { %4857 = vmatmul.mubr.msk.f32.gmra.mrb[80].mxu1 %vm276_vm0, %v5774_v24 }
 0x18f   : > { %4859 = vmatprep.mubr.msk.f32.mxu1 %vm276_vm0, %v5777_v25 }
 0x192   : > { %4860 = vmatmul.mubr.msk.f32.gmra.mrb[82].mxu1 %vm276_vm0, %v5784_v26 }
 0x193   : > { %4862 = vmatprep.mubr.msk.f32.mxu1 %vm276_vm0, %v5787_v27 }
 0x196   : > { %4863 = vmatmul.mubr.msk.f32.gmra.mrb[84].mxu1 %vm276_vm0, %v5794_v28 }
 0x197   : > { %4865 = vmatprep.mubr.msk.f32.mxu1 %vm276_vm0, %v5797_v29 }
 0x19a   : > { %4866 = vmatmul.mubr.msk.f32.gmra.mrb[86].mxu1 %vm276_vm0, %v5804_v30 }
 0x19b   : > { %4868 = vmatprep.mubr.msk.f32.mxu1 %vm276_vm0, %v5807_v31 }
 0x19e   : > { %4869 = vmatmul.mubr.msk.f32.gmra.mrb[88].mxu1 %vm276_vm0, %v5814_v32 }
 0x19f   : > { %4871 = vmatprep.mubr.msk.f32.mxu1 %vm276_vm0, %v5817_v33 }
 0x1a2   : > { %4872 = vmatmul.mubr.msk.f32.gmra.mrb[90].mxu1 %vm276_vm0, %v5824_v34 }
 0x1a3   : > { %4874 = vmatprep.mubr.msk.f32.mxu1 %vm276_vm0, %v5827_v35 }
 0x1a6   : > { %4875 = vmatmul.mubr.msk.f32.gmra.mrb[92].mxu1 %vm276_vm0, %v5834_v36 }
 0x1a7   : > { %4877 = vmatprep.mubr.msk.f32.mxu1 %vm276_vm0, %v5837_v37 }
 0x1aa   : > { %4878 = vmatmul.mubr.msk.f32.gmra.mrb[94].mxu1 %vm276_vm0, %v5844_v38 }
 0x1ab   : > { %4940 = vmatprep.mubr.msk.f32.mxu1 %vm276_vm0, %v5689_v7  ;;  %v6118_v7 = vld [vmem:[#allocation2] ss:$0 sm:$0xff] }
 0x1ae   : > { %4941 = vmatmul.mubr.msk.f32.vlgmr.msra.gmra.mrb[96].mxu1 %vm276_vm0, %v5694_v8 }
 0x1af   : > { %4943 = vmatprep.mubr.msk.f32.mxu1 %vm276_vm0, %v5697_v9 }
 0x1b2   : > { %4944 = vmatmul.mubr.msk.f32.gmra.mrb[98].mxu1 %vm276_vm0, %v5704_v10 }
 0x1b3   : > { %4946 = vmatprep.mubr.msk.f32.mxu1 %vm276_vm0, %v5707_v11 }
 0x1b6   : > { %4947 = vmatmul.mubr.msk.f32.gmra.mrb[100].mxu1 %vm276_vm0, %v5714_v12 }
 0x1b7   : > { %4949 = vmatprep.mubr.msk.f32.mxu1 %vm276_vm0, %v5717_v13 }
 0x1ba   : > { %4950 = vmatmul.mubr.msk.f32.gmra.mrb[102].mxu1 %vm276_vm0, %v5724_v14 }
 0x1bb   : > { %4952 = vmatprep.mubr.msk.f32.mxu1 %vm276_vm0, %v5727_v15 }
 0x1be   : > { %4953 = vmatmul.mubr.msk.f32.gmra.mrb[104].mxu1 %vm276_vm0, %v5734_v16 }
 0x1bf   : > { %4955 = vmatprep.mubr.msk.f32.mxu1 %vm276_vm0, %v5737_v17 }
 0x1c1   : > { %v4670_v8 = vpop.f32.mrb[0].mxu1 }
 0x1c2   : > { %v805_v9 = vadd.f32 %v4670_v8, %v6118_v7  ;;  %v799_v10 = vpop.f32.mrb[1].mxu1  ;;  %4956 = vmatmul.mubr.msk.f32.gmra.mrb[106].mxu1 %vm276_vm0, %v5744_v18 }
 0x1c3   : > { %v800_v11 = vadd.f32 %v6118_v7, %v799_v10  ;;  %4958 = vmatprep.mubr.msk.f32.mxu1 %vm276_vm0, %v5747_v19 }
 0x1c4   : > { %v959_v12 = vsub.f32 0.0, %v805_v9 }
 0x1c5   : > { %v958_v13 = vsub.f32 0.0, %v800_v11  ;;  %v4673_v14 = vpop.f32.mrb[2].mxu1 }
 0x1c6   : > { %v992_v15 = vmul.f32 1.442695, %v959_v12  ;;  %v815_v16 = vadd.f32 %v4673_v14, %v6118_v7  ;;  %v809_v4 = vpop.f32.mrb[3].mxu1  ;;  %4959 = vmatmul.mubr.msk.f32.gmra.mrb[108].mxu1 %vm276_vm0, %v5754_v20 }
 0x1c7   : > { %v990_v17 = vmul.f32 1.442695, %v958_v13  ;;  %v810_v5 = vadd.f32 %v6118_v7, %v809_v4  ;;  %4961 = vmatprep.mubr.msk.f32.mxu1 %vm276_vm0, %v5757_v21 }
 0x1c8   : > { %5099 = vpow2.f32 %v992_v15  ;;  %v961_v18 = vsub.f32 0.0, %v815_v16 }
 0x1c9   : > { %5101 = vpow2.f32 %v990_v17  ;;  %v960_v19 = vsub.f32 0.0, %v810_v5  ;;  %v4676_v6 = vpop.f32.mrb[4].mxu1 }
 0x1ca   : > { %v996_v39 = vmul.f32 1.442695, %v961_v18  ;;  %v825_v40 = vadd.f32 %v4676_v6, %v6118_v7  ;;  %v819_v42 = vpop.f32.mrb[5].mxu1  ;;  %4962 = vmatmul.mubr.msk.f32.gmra.mrb[110].mxu1 %vm276_vm0, %v5764_v22 }
 0x1cb   : > { %v994_v43 = vmul.f32 1.442695, %v960_v19  ;;  %v820_v20 = vadd.f32 %v6118_v7, %v819_v42  ;;  %4964 = vmatprep.mubr.msk.f32.mxu1 %vm276_vm0, %v5767_v23 }
 0x1cc   : > { %5103 = vpow2.f32 %v996_v39  ;;  %v963_v21 = vsub.f32 0.0, %v825_v40 }
 0x1cd   : > { %5105 = vpow2.f32 %v994_v43  ;;  %v962_v44 = vsub.f32 0.0, %v820_v20  ;;  %v4679_v46 = vpop.f32.mrb[6].mxu1 }
 0x1ce   : > { %v1000_v47 = vmul.f32 1.442695, %v963_v21  ;;  %v835_v48 = vadd.f32 %v4679_v46, %v6118_v7  ;;  %v829_v49 = vpop.f32.mrb[7].mxu1  ;;  %4965 = vmatmul.mubr.msk.f32.gmra.mrb[112].mxu1 %vm276_vm0, %v5774_v24 }
 0x1cf   : > { %v998_v50 = vmul.f32 1.442695, %v962_v44  ;;  %v830_v22 = vadd.f32 %v6118_v7, %v829_v49  ;;  %4967 = vmatprep.mubr.msk.f32.mxu1 %vm276_vm0, %v5777_v25 }
 0x1d0   : > { %5107 = vpow2.f32 %v1000_v47  ;;  %v965_v23 = vsub.f32 0.0, %v835_v48 }
 0x1d1   : > { %5109 = vpow2.f32 %v998_v50  ;;  %v964_v51 = vsub.f32 0.0, %v830_v22  ;;  %v4682_v52 = vpop.f32.mrb[8].mxu1 }
 0x1d2   : > { %v5100_v53 = vpop.eup %5099  ;;  %v1004_v54 = vmul.f32 1.442695, %v965_v23  ;;  %v845_v55 = vadd.f32 %v4682_v52, %v6118_v7  ;;  %v839_v56 = vpop.f32.mrb[9].mxu1  ;;  %4968 = vmatmul.mubr.msk.f32.gmra.mrb[114].mxu1 %vm276_vm0, %v5784_v26 }
 0x1d3   : > { %v5102_v24 = vpop.eup %5101  ;;  %v1055_v57 = vadd.f32 1.0, %v5100_v53  ;;  %v1002_v58 = vmul.f32 1.442695, %v964_v51  ;;  %v840_v59 = vadd.f32 %v6118_v7, %v839_v56  ;;  %4970 = vmatprep.mubr.msk.f32.mxu1 %vm276_vm0, %v5787_v27 }
 0x1d4   : > { %v1054_v25 = vadd.f32 1.0, %v5102_v24  ;;  %5111 = vpow2.f32 %v1004_v54  ;;  %v967_v60 = vsub.f32 0.0, %v845_v55 }
 0x1d5   : > { %5113 = vrcp.f32 %v1055_v57  ;;  %v966_v61 = vsub.f32 0.0, %v840_v59  ;;  %v4685_v45 = vpop.f32.mrb[10].mxu1 }
 0x1d6   : > { %v5104_v62 = vpop.eup %5103  ;;  %5115 = vrcp.f32 %v1054_v25  ;;  %v1008_v63 = vmul.f32 1.442695, %v967_v60  ;;  %v855_v0 = vadd.f32 %v4685_v45, %v6118_v7  ;;  %v849_v26 = vpop.f32.mrb[11].mxu1  ;;  %4971 = vmatmul.mubr.msk.f32.gmra.mrb[116].mxu1 %vm276_vm0, %v5794_v28 }
 0x1d7   : > { %v5106_v2 = vpop.eup %5105  ;;  %v1057_v1 = vadd.f32 1.0, %v5104_v62  ;;  %5117 = vpow2.f32 %v1002_v58  ;;  %v1006_v3 = vmul.f32 1.442695, %v966_v61  ;;  %v850_v27 = vadd.f32 %v6118_v7, %v849_v26  ;;  %4973 = vmatprep.mubr.msk.f32.mxu1 %vm276_vm0, %v5797_v29 }
 0x1d8   : > { %v1056_v8 = vadd.f32 1.0, %v5106_v2  ;;  %5119 = vpow2.f32 %v1008_v63  ;;  %v969_v9 = vsub.f32 0.0, %v855_v0 }
 0x1d9   : > { %5121 = vrcp.f32 %v1057_v1  ;;  %v968_v10 = vsub.f32 0.0, %v850_v27  ;;  %v4688_v11 = vpop.f32.mrb[12].mxu1 }
 0x1da   : > { %v5108_v12 = vpop.eup %5107  ;;  %5123 = vrcp.f32 %v1056_v8  ;;  %v1012_v13 = vmul.f32 1.442695, %v969_v9  ;;  %v865_v28 = vadd.f32 %v4688_v11, %v6118_v7  ;;  %v859_v14 = vpop.f32.mrb[13].mxu1  ;;  %4974 = vmatmul.mubr.msk.f32.gmra.mrb[118].mxu1 %vm276_vm0, %v5804_v30 }
 0x1db   : > { %v5110_v15 = vpop.eup %5109  ;;  %v1059_v16 = vadd.f32 1.0, %v5108_v12  ;;  %5125 = vpow2.f32 %v1006_v3  ;;  %v1010_v29 = vmul.f32 1.442695, %v968_v10  ;;  %v860_v4 = vadd.f32 %v6118_v7, %v859_v14  ;;  %4976 = vmatprep.mubr.msk.f32.mxu1 %vm276_vm0, %v5807_v31 }
 0x1dc   : > { %v1058_v17 = vadd.f32 1.0, %v5110_v15  ;;  %5127 = vpow2.f32 %v1012_v13  ;;  %v971_v5 = vsub.f32 0.0, %v865_v28 }
 0x1dd   : > { %5129 = vrcp.f32 %v1059_v16  ;;  %v970_v30 = vsub.f32 0.0, %v860_v4  ;;  %v4691_v18 = vpop.f32.mrb[14].mxu1 }
 0x1de   : > { %v5112_v19 = vpop.eup %5111  ;;  %5131 = vrcp.f32 %v1058_v17  ;;  %v1016_v6 = vmul.f32 1.442695, %v971_v5  ;;  %v875_v39 = vadd.f32 %v4691_v18, %v6118_v7  ;;  %v869_v31 = vpop.f32.mrb[15].mxu1  ;;  %4977 = vmatmul.mubr.msk.f32.gmra.mrb[120].mxu1 %vm276_vm0, %v5814_v32 }
 0x1df   : > { %v5114_v40 = vpop.eup %5113  ;;  %v1061_v42 = vadd.f32 1.0, %v5112_v19  ;;  %5133 = vpow2.f32 %v1010_v29  ;;  %v1014_v43 = vmul.f32 1.442695, %v970_v30  ;;  %v870_v20 = vadd.f32 %v6118_v7, %v869_v31  ;;  %4979 = vmatprep.mubr.msk.f32.mxu1 %vm276_vm0, %v5817_v33 }
 0x1e0   : > { %v5116_v21 = vpop.eup %5115  ;;  %5135 = vpow2.f32 %v1016_v6  ;;  %v973_v44 = vsub.f32 0.0, %v875_v39  ;;  %1152 = vst.msk [vmem:[%s6169_s18 + $0x8] sm:$0xff] %vm1150_vm2, %v5114_v40 }
 0x1e1   : > { %v5118_v46 = vpop.eup %5117  ;;  %5137 = vrcp.f32 %v1061_v42  ;;  %v972_v47 = vsub.f32 0.0, %v870_v20  ;;  %v4694_v48 = vpop.f32.mrb[16].mxu1  ;;  %1151 = vst.msk [vmem:[%s6169_s18] sm:$0xff] %vm1150_vm2, %v5116_v21 }
 0x1e2   : > { %v5120_v32 = vpop.eup %5119  ;;  %v1060_v49 = vadd.f32 1.0, %v5118_v46  ;;  %5139 = vpow2.f32 %v1014_v43  ;;  %v1020_v50 = vmul.f32 1.442695, %v973_v44  ;;  %v885_v22 = vadd.f32 %v4694_v48, %v6118_v7  ;;  %v879_v33 = vpop.f32.mrb[17].mxu1  ;;  %4980 = vmatmul.mubr.msk.f32.gmra.mrb[122].mxu1 %vm276_vm0, %v5824_v34 }
 0x1e3   : > { %v5122_v23 = vpop.eup %5121  ;;  %v1063_v51 = vadd.f32 1.0, %v5120_v32  ;;  %v1018_v52 = vmul.f32 1.442695, %v972_v47  ;;  %v880_v53 = vadd.f32 %v6118_v7, %v879_v33  ;;  %4982 = vmatprep.mubr.msk.f32.mxu1 %vm276_vm0, %v5827_v35 }
 0x1e4   : > { %v5124_v54 = vpop.eup %5123  ;;  %5141 = vrcp.f32 %v1060_v49  ;;  %v975_v55 = vsub.f32 0.0, %v885_v22  ;;  %1154 = vst.msk [vmem:[%s6169_s18 + $0x18] sm:$0xff] %vm1150_vm2, %v5122_v23 }
 0x1e5   : > { %v5126_v56 = vpop.eup %5125  ;;  %5143 = vrcp.f32 %v1063_v51  ;;  %v974_v24 = vsub.f32 0.0, %v880_v53  ;;  %v4697_v57 = vpop.f32.mrb[18].mxu1  ;;  %1153 = vst.msk [vmem:[%s6169_s18 + $0x10] sm:$0xff] %vm1150_vm2, %v5124_v54 }
 0x1e6   : > { %v5128_v34 = vpop.eup %5127  ;;  %v1062_v58 = vadd.f32 1.0, %v5126_v56  ;;  %5145 = vpow2.f32 %v1020_v50  ;;  %v1024_v59 = vmul.f32 1.442695, %v975_v55  ;;  %v895_v25 = vadd.f32 %v4697_v57, %v6118_v7  ;;  %v889_v60 = vpop.f32.mrb[19].mxu1  ;;  %4983 = vmatmul.mubr.msk.f32.gmra.mrb[124].mxu1 %vm276_vm0, %v5834_v36 }
 0x1e7   : > { %v5130_v35 = vpop.eup %5129  ;;  %v1065_v61 = vadd.f32 1.0, %v5128_v34  ;;  %5147 = vpow2.f32 %v1018_v52  ;;  %v1022_v45 = vmul.f32 1.442695, %v974_v24  ;;  %v890_v62 = vadd.f32 %v6118_v7, %v889_v60  ;;  %4985 = vmatprep.mubr.msk.f32.mxu1 %vm276_vm0, %v5837_v37 }
 0x1e8   : > { %v5132_v63 = vpop.eup %5131  ;;  %5149 = vrcp.f32 %v1062_v58  ;;  %v977_v0 = vsub.f32 0.0, %v895_v25  ;;  %1156 = vst.msk [vmem:[%s6169_s18 + $0x28] sm:$0xff] %vm1150_vm2, %v5130_v35 }
 0x1e9   : > { %v5134_v26 = vpop.eup %5133  ;;  %5151 = vrcp.f32 %v1065_v61  ;;  %v976_v2 = vsub.f32 0.0, %v890_v62  ;;  %v4700_v1 = vpop.f32.mrb[20].mxu1  ;;  %1155 = vst.msk [vmem:[%s6169_s18 + $0x20] sm:$0xff] %vm1150_vm2, %v5132_v63 }
 0x1ea   : > { %v5136_v36 = vpop.eup %5135  ;;  %v1064_v3 = vadd.f32 1.0, %v5134_v26  ;;  %5153 = vpow2.f32 %v1024_v59  ;;  %v1028_v27 = vmul.f32 1.442695, %v977_v0  ;;  %v905_v8 = vadd.f32 %v4700_v1, %v6118_v7  ;;  %v899_v9 = vpop.f32.mrb[21].mxu1  ;;  %4986 = vmatmul.mubr.msk.f32.gmra.mrb[126].mxu1 %vm276_vm0, %v5844_v38 }
 0x1eb   : > { %v5138_v37 = vpop.eup %5137  ;;  %v1067_v10 = vadd.f32 1.0, %v5136_v36  ;;  %5155 = vpow2.f32 %v1022_v45  ;;  %v900_v11 = vadd.f32 %v6118_v7, %v899_v9  ;;  %v1026_v13 = vmul.f32 1.442695, %v976_v2 }
 0x1ec   : > { %v5140_v12 = vpop.eup %5139  ;;  %5157 = vrcp.f32 %v1064_v3  ;;  %v979_v28 = vsub.f32 0.0, %v905_v8  ;;  %1158 = vst.msk [vmem:[%s6169_s18 + $0x38] sm:$0xff] %vm1150_vm2, %v5138_v37 }
 0x1ed   : > { %5159 = vrcp.f32 %v1067_v10  ;;  %v1066_v14 = vadd.f32 1.0, %v5140_v12  ;;  %v978_v15 = vsub.f32 0.0, %v900_v11  ;;  %v4703_v16 = vpop.f32.mrb[22].mxu1 }
 0x1ee   : > { %v5142_v29 = vpop.eup %5141  ;;  %5161 = vpow2.f32 %v1028_v27  ;;  %v1032_v38 = vmul.f32 1.442695, %v979_v28  ;;  %v915_v4 = vadd.f32 %v4703_v16, %v6118_v7  ;;  %v909_v17 = vpop.f32.mrb[23].mxu1 }
 0x1ef   : > { %v5144_v5 = vpop.eup %5143  ;;  %5163 = vrcp.f32 %v1066_v14  ;;  %v1030_v30 = vmul.f32 1.442695, %v978_v15  ;;  %v910_v18 = vadd.f32 %v6118_v7, %v909_v17  ;;  %1157 = vst.msk [vmem:[%s6169_s18 + $0x30] sm:$0xff] %vm1150_vm2, %v5142_v29 }
 0x1f0   : > { %v5146_v19 = vpop.eup %5145  ;;  %5165 = vpow2.f32 %v1026_v13  ;;  %v981_v6 = vsub.f32 0.0, %v915_v4  ;;  %1160 = vst.msk [vmem:[%s6169_s18 + $0x48] sm:$0xff] %vm1150_vm2, %v5144_v5 }
 0x1f1   : > { %v5148_v39 = vpop.eup %5147  ;;  %v1069_v31 = vadd.f32 1.0, %v5146_v19  ;;  %5167 = vpow2.f32 %v1032_v38  ;;  %v980_v40 = vsub.f32 0.0, %v910_v18  ;;  %v4706_v42 = vpop.f32.mrb[24].mxu1 }
 0x1f2   : > { %v5150_v43 = vpop.eup %5149  ;;  %v1068_v20 = vadd.f32 1.0, %v5148_v39  ;;  %5169 = vpow2.f32 %v1030_v30  ;;  %v1036_v21 = vmul.f32 1.442695, %v981_v6  ;;  %v925_v44 = vadd.f32 %v4706_v42, %v6118_v7  ;;  %v919_v46 = vpop.f32.mrb[25].mxu1 }
 0x1f3   : > { %v5152_v47 = vpop.eup %5151  ;;  %5171 = vrcp.f32 %v1069_v31  ;;  %v1034_v48 = vmul.f32 1.442695, %v980_v40  ;;  %v920_v32 = vadd.f32 %v6118_v7, %v919_v46  ;;  %1159 = vst.msk [vmem:[%s6169_s18 + $0x40] sm:$0xff] %vm1150_vm2, %v5150_v43 }
 0x1f4   : > { %v5154_v49 = vpop.eup %5153  ;;  %5173 = vrcp.f32 %v1068_v20  ;;  %v983_v50 = vsub.f32 0.0, %v925_v44  ;;  %1162 = vst.msk [vmem:[%s6169_s18 + $0x58] sm:$0xff] %vm1150_vm2, %v5152_v47 }
 0x1f5   : > { %v5156_v22 = vpop.eup %5155  ;;  %v1071_v33 = vadd.f32 1.0, %v5154_v49  ;;  %5175 = vpow2.f32 %v1036_v21  ;;  %v982_v23 = vsub.f32 0.0, %v920_v32  ;;  %v4709_v51 = vpop.f32.mrb[26].mxu1 }
 0x1f6   : > { %v5158_v52 = vpop.eup %5157  ;;  %v1070_v53 = vadd.f32 1.0, %v5156_v22  ;;  %5177 = vpow2.f32 %v1034_v48  ;;  %v1040_v54 = vmul.f32 1.442695, %v983_v50  ;;  %v935_v55 = vadd.f32 %v4709_v51, %v6118_v7  ;;  %v929_v56 = vpop.f32.mrb[27].mxu1 }
 0x1f7   : > { %v5160_v24 = vpop.eup %5159  ;;  %5179 = vrcp.f32 %v1071_v33  ;;  %v1038_v57 = vmul.f32 1.442695, %v982_v23  ;;  %v930_v34 = vadd.f32 %v6118_v7, %v929_v56  ;;  %1161 = vst.msk [vmem:[%s6169_s18 + $0x50] sm:$0xff] %vm1150_vm2, %v5158_v52 }
 0x1f8   : > { %v5162_v58 = vpop.eup %5161  ;;  %5181 = vrcp.f32 %v1070_v53  ;;  %v985_v59 = vsub.f32 0.0, %v935_v55  ;;  %1164 = vst.msk [vmem:[%s6169_s18 + $0x68] sm:$0xff] %vm1150_vm2, %v5160_v24 }
 0x1f9   : > { %v5164_v25 = vpop.eup %5163  ;;  %v1073_v60 = vadd.f32 1.0, %v5162_v58  ;;  %5183 = vpow2.f32 %v1040_v54  ;;  %v984_v35 = vsub.f32 0.0, %v930_v34  ;;  %v4712_v61 = vpop.f32.mrb[28].mxu1 }
 0x1fa   : > { %v5166_v45 = vpop.eup %5165  ;;  %5185 = vpow2.f32 %v1038_v57  ;;  %v1044_v62 = vmul.f32 1.442695, %v985_v59  ;;  %v945_v63 = vadd.f32 %v4712_v61, %v6118_v7  ;;  %v939_v0 = vpop.f32.mrb[29].mxu1  ;;  %1163 = vst.msk [vmem:[%s6169_s18 + $0x60] sm:$0xff] %vm1150_vm2, %v5164_v25 }
 0x1fb   : > { %v5168_v26 = vpop.eup %5167  ;;  %5187 = vrcp.f32 %v1073_v60  ;;  %v1072_v2 = vadd.f32 1.0, %v5166_v45  ;;  %v940_v1 = vadd.f32 %v6118_v7, %v939_v0  ;;  %v1042_v27 = vmul.f32 1.442695, %v984_v35 }
 0x1fc   : > { %v5170_v36 = vpop.eup %5169  ;;  %v1075_v3 = vadd.f32 1.0, %v5168_v26  ;;  %5189 = vpow2.f32 %v1044_v62  ;;  %v987_v8 = vsub.f32 0.0, %v945_v63 }
 0x1fd   : > { %v5172_v9 = vpop.eup %5171  ;;  %5191 = vrcp.f32 %v1072_v2  ;;  %v1074_v37 = vadd.f32 1.0, %v5170_v36  ;;  %v986_v10 = vsub.f32 0.0, %v940_v1  ;;  %v4715_v11 = vpop.f32.mrb[30].mxu1 }
 0x1fe   : > { %v5174_v12 = vpop.eup %5173  ;;  %5193 = vrcp.f32 %v1075_v3  ;;  %v1048_v13 = vmul.f32 1.442695, %v987_v8  ;;  %v955_v28 = vadd.f32 %v4715_v11, %v6118_v7  ;;  %v949_v14 = vpop.f32.mrb[31].mxu1  ;;  %1166 = vst.msk [vmem:[%s6169_s18 + $0x78] sm:$0xff] %vm1150_vm2, %v5172_v9 }
 0x1ff   : > { %v5176_v15 = vpop.eup %5175  ;;  %5195 = vrcp.f32 %v1074_v37  ;;  %v950_v16 = vadd.f32 %v6118_v7, %v949_v14  ;;  %1165 = vst.msk [vmem:[%s6169_s18 + $0x70] sm:$0xff] %vm1150_vm2, %v5174_v12  ;;  %v1046_v4 = vmul.f32 1.442695, %v986_v10  ;;  %v6238_v7 = vld [vmem:[%s6860_s2] ss:$0 sm:$0xff] }
 0x200   : > { %v5178_v29 = vpop.eup %5177  ;;  %v1077_v38 = vadd.f32 1.0, %v5176_v15  ;;  %5197 = vpow2.f32 %v1042_v27  ;;  %v989_v17 = vsub.f32 0.0, %v955_v28 }
 0x201   : > { %v5180_v5 = vpop.eup %5179  ;;  %v1076_v30 = vadd.f32 1.0, %v5178_v29  ;;  %5199 = vpow2.f32 %v1048_v13  ;;  %v988_v18 = vsub.f32 0.0, %v950_v16  ;;  %v4726_v19 = vpop.f32.mrb[32].mxu1 }
 0x202   : > { %v5182_v6 = vpop.eup %5181  ;;  %5201 = vrcp.f32 %v1077_v38  ;;  %v1052_v39 = vmul.f32 1.442695, %v989_v17  ;;  %v1260_v31 = vadd.f32 %v6238_v7, %v4726_v19  ;;  %v1254_v40 = vpop.f32.mrb[33].mxu1  ;;  %1168 = vst.msk [vmem:[%s6169_s18 + $0x88] sm:$0xff] %vm1150_vm2, %v5180_v5 }
 0x203   : > { %v5184_v42 = vpop.eup %5183  ;;  %5203 = vrcp.f32 %v1076_v30  ;;  %v1255_v43 = vadd.f32 %v6238_v7, %v1254_v40  ;;  %1167 = vst.msk [vmem:[%s6169_s18 + $0x80] sm:$0xff] %vm1150_vm2, %v5182_v6  ;;  %v1050_v44 = vmul.f32 1.442695, %v988_v18 }
 0x204   : > { %v5186_v20 = vpop.eup %5185  ;;  %v1079_v21 = vadd.f32 1.0, %v5184_v42  ;;  %5205 = vpow2.f32 %v1046_v4  ;;  %v1414_v50 = vmax.f32 %v1260_v31, 0.0 }
 0x205   : > { %v5188_v46 = vpop.eup %5187  ;;  %v1078_v47 = vadd.f32 1.0, %v5186_v20  ;;  %5207 = vpow2.f32 %v1052_v39  ;;  %v1413_v48 = vmax.f32 %v1255_v43, 0.0  ;;  %v4729_v32 = vpop.f32.mrb[34].mxu1 }
 0x206   : > { %v5190_v49 = vpop.eup %5189  ;;  %5209 = vrcp.f32 %v1079_v21  ;;  %v1270_v22 = vadd.f32 %v6238_v7, %v4729_v32  ;;  %v1264_v33 = vpop.f32.mrb[35].mxu1  ;;  %1170 = vst.msk [vmem:[%s6169_s18 + $0x98] sm:$0xff] %vm1150_vm2, %v5188_v46 }
 0x207   : > { %v5192_v23 = vpop.eup %5191  ;;  %5211 = vrcp.f32 %v1078_v47  ;;  %v1081_v51 = vadd.f32 1.0, %v5190_v49  ;;  %v1265_v52 = vadd.f32 %v6238_v7, %v1264_v33  ;;  %4776 = vmatprep.mubr.msk.f32.mxu0 %vm636_vm1, %v1413_v48 }
 0x208   : > { %v5194_v53 = vpop.eup %5193  ;;  %5213 = vpow2.f32 %v1050_v44  ;;  %4777 = vmatmul.mubr.msk.f32.vlgmr.msra.gmra.mrb[32].mxu0 %vm636_vm1, %v1414_v50  ;;  %1169 = vst.msk [vmem:[%s6169_s18 + $0x90] sm:$0xff] %vm1150_vm2, %v5192_v23  ;;  %v1416_v57 = vmax.f32 %v1270_v22, 0.0 }
 0x209   : > { %v5196_v54 = vpop.eup %5195  ;;  %5215 = vrcp.f32 %v1081_v51  ;;  %v1415_v55 = vmax.f32 %v1265_v52, 0.0  ;;  %v4732_v56 = vpop.f32.mrb[36].mxu1  ;;  %5075 = vmatpush3.bf16.msra.mxu0 %v5854_v41  ;;  %1172 = vst.msk [vmem:[%s6169_s18 + $0xa8] sm:$0xff] %vm1150_vm2, %v5194_v53 }
 0x20a   : > { %v5198_v24 = vpop.eup %5197  ;;  %v1280_v34 = vadd.f32 %v6238_v7, %v4732_v56  ;;  %v1274_v58 = vpop.f32.mrb[37].mxu1  ;;  %5085 = vmatprep.subr.bf16.mxu0 %v5854_v41  ;;  %1171 = vst.msk [vmem:[%s6169_s18 + $0xa0] sm:$0xff] %vm1150_vm2, %v5196_v54 }
 0x20b   : > { %v5200_v59 = vpop.eup %5199  ;;  %v1080_v25 = vadd.f32 1.0, %v5198_v24  ;;  %v1275_v60 = vadd.f32 %v6238_v7, %v1274_v58  ;;  %4779 = vmatprep.mubr.msk.f32.mxu0 %vm636_vm1, %v1415_v55 }
 0x20c   : > { %v5202_v35 = vpop.eup %5201  ;;  %v1083_v61 = vadd.f32 1.0, %v5200_v59  ;;  %v1418_v45 = vmax.f32 %v1280_v34, 0.0  ;;  %4780 = vmatmul.mubr.msk.f32.gmra.mrb[34].mxu0 %vm636_vm1, %v1416_v57 }
 0x20d   : > { %v5204_v62 = vpop.eup %5203  ;;  %5217 = vrcp.f32 %v1080_v25  ;;  %v1417_v63 = vmax.f32 %v1275_v60, 0.0  ;;  %v4735_v0 = vpop.f32.mrb[38].mxu1  ;;  %1174 = vst.msk [vmem:[%s6169_s18 + $0xb8] sm:$0xff] %vm1150_vm2, %v5202_v35 }
 0x20e   : > { %v5206_v26 = vpop.eup %5205  ;;  %5219 = vrcp.f32 %v1083_v61  ;;  %v1290_v2 = vadd.f32 %v6238_v7, %v4735_v0  ;;  %v1284_v1 = vpop.f32.mrb[39].mxu1  ;;  %1173 = vst.msk [vmem:[%s6169_s18 + $0xb0] sm:$0xff] %vm1150_vm2, %v5204_v62 }
 0x20f   : > { %v5208_v36 = vpop.eup %5207  ;;  %v1082_v3 = vadd.f32 1.0, %v5206_v26  ;;  %v1285_v27 = vadd.f32 %v6238_v7, %v1284_v1  ;;  %4782 = vmatprep.mubr.msk.f32.mxu0 %vm636_vm1, %v1417_v63 }
 0x210   : > { %v5210_v8 = vpop.eup %5209  ;;  %v1085_v9 = vadd.f32 1.0, %v5208_v36  ;;  %v1420_v37 = vmax.f32 %v1290_v2, 0.0  ;;  %4783 = vmatmul.mubr.msk.f32.gmra.mrb[36].mxu0 %vm636_vm1, %v1418_v45 }
 0x211   : > { %v5212_v10 = vpop.eup %5211  ;;  %5221 = vrcp.f32 %v1082_v3  ;;  %v1419_v11 = vmax.f32 %v1285_v27, 0.0  ;;  %v4738_v12 = vpop.f32.mrb[40].mxu1  ;;  %1176 = vst.msk [vmem:[%s6169_s18 + $0xc8] sm:$0xff] %vm1150_vm2, %v5210_v8 }
 0x212   : > { %v5214_v13 = vpop.eup %5213  ;;  %5223 = vrcp.f32 %v1085_v9  ;;  %v1300_v28 = vadd.f32 %v6238_v7, %v4738_v12  ;;  %v1294_v14 = vpop.f32.mrb[41].mxu1  ;;  %1175 = vst.msk [vmem:[%s6169_s18 + $0xc0] sm:$0xff] %vm1150_vm2, %v5212_v10 }
 0x213   : > { %v5216_v15 = vpop.eup %5215  ;;  %v1084_v16 = vadd.f32 1.0, %v5214_v13  ;;  %v1295_v29 = vadd.f32 %v6238_v7, %v1294_v14  ;;  %4785 = vmatprep.mubr.msk.f32.mxu0 %vm636_vm1, %v1419_v11 }
 0x214   : > { %v1422_v38 = vmax.f32 %v1300_v28, 0.0  ;;  %4786 = vmatmul.mubr.msk.f32.gmra.mrb[38].mxu0 %vm636_vm1, %v1420_v37  ;;  %1178 = vst.msk [vmem:[%s6169_s18 + $0xd8] sm:$0xff] %vm1150_vm2, %v5216_v15 }
 0x215   : > { %5225 = vrcp.f32 %v1084_v16  ;;  %v1421_v4 = vmax.f32 %v1295_v29, 0.0  ;;  %v4741_v17 = vpop.f32.mrb[42].mxu1 }
 0x216   : > { %v1310_v5 = vadd.f32 %v6238_v7, %v4741_v17  ;;  %v1304_v30 = vpop.f32.mrb[43].mxu1 }
 0x217   : > { %v5218_v18 = vpop.eup %5217  ;;  %v1305_v19 = vadd.f32 %v6238_v7, %v1304_v30  ;;  %4788 = vmatprep.mubr.msk.f32.mxu0 %vm636_vm1, %v1421_v4 }
 0x218   : > { %v5220_v6 = vpop.eup %5219  ;;  %v1424_v39 = vmax.f32 %v1310_v5, 0.0  ;;  %4789 = vmatmul.mubr.msk.f32.gmra.mrb[40].mxu0 %vm636_vm1, %v1422_v38  ;;  %1177 = vst.msk [vmem:[%s6169_s18 + $0xd0] sm:$0xff] %vm1150_vm2, %v5218_v18 }
 0x219   : > { %v1423_v31 = vmax.f32 %v1305_v19, 0.0  ;;  %v4744_v40 = vpop.f32.mrb[44].mxu1  ;;  %1180 = vst.msk [vmem:[%s6169_s18 + $0xe8] sm:$0xff] %vm1150_vm2, %v5220_v6 }
 0x21a   : > { %v1320_v42 = vadd.f32 %v6238_v7, %v4744_v40  ;;  %v1314_v43 = vpop.f32.mrb[45].mxu1 }
 0x21b   : > { %v5222_v20 = vpop.eup %5221  ;;  %v1315_v21 = vadd.f32 %v6238_v7, %v1314_v43  ;;  %4791 = vmatprep.mubr.msk.f32.mxu0 %vm636_vm1, %v1423_v31 }
 0x21c   : > { %v5224_v44 = vpop.eup %5223  ;;  %v1426_v46 = vmax.f32 %v1320_v42, 0.0  ;;  %4792 = vmatmul.mubr.msk.f32.gmra.mrb[42].mxu0 %vm636_vm1, %v1424_v39  ;;  %1179 = vst.msk [vmem:[%s6169_s18 + $0xe0] sm:$0xff] %vm1150_vm2, %v5222_v20 }
 0x21d   : > { %v1425_v47 = vmax.f32 %v1315_v21, 0.0  ;;  %v4747_v48 = vpop.f32.mrb[46].mxu1  ;;  %1182 = vst.msk [vmem:[%s6169_s18 + $0xf8] sm:$0xff] %vm1150_vm2, %v5224_v44 }
 0x21e   : > { %v1330_v32 = vadd.f32 %v6238_v7, %v4747_v48  ;;  %v1324_v49 = vpop.f32.mrb[47].mxu1 }
 0x21f   : > { %v5226_v50 = vpop.eup %5225  ;;  %v1325_v22 = vadd.f32 %v6238_v7, %v1324_v49  ;;  %4794 = vmatprep.mubr.msk.f32.mxu0 %vm636_vm1, %v1425_v47 }
 0x220   : > { %v1428_v33 = vmax.f32 %v1330_v32, 0.0  ;;  %4795 = vmatmul.mubr.msk.f32.gmra.mrb[44].mxu0 %vm636_vm1, %v1426_v46  ;;  %1181 = vst.msk [vmem:[%s6169_s18 + $0xf0] sm:$0xff] %vm1150_vm2, %v5226_v50 }
 0x221   : > { %v1427_v23 = vmax.f32 %v1325_v22, 0.0  ;;  %v4750_v51 = vpop.f32.mrb[48].mxu1 }
 0x222   : > { %v1340_v52 = vadd.f32 %v6238_v7, %v4750_v51  ;;  %v1334_v53 = vpop.f32.mrb[49].mxu1 }
 0x223   : > { %v1335_v54 = vadd.f32 %v6238_v7, %v1334_v53  ;;  %4797 = vmatprep.mubr.msk.f32.mxu0 %vm636_vm1, %v1427_v23 }
 0x224   : > { %v1430_v55 = vmax.f32 %v1340_v52, 0.0  ;;  %4798 = vmatmul.mubr.msk.f32.gmra.mrb[46].mxu0 %vm636_vm1, %v1428_v33 }
 0x225   : > { %v1429_v56 = vmax.f32 %v1335_v54, 0.0  ;;  %v4753_v24 = vpop.f32.mrb[50].mxu1 }
 0x226   : > { %v1350_v57 = vadd.f32 %v6238_v7, %v4753_v24  ;;  %v1344_v34 = vpop.f32.mrb[51].mxu1 }
 0x227   : > { %v1345_v58 = vadd.f32 %v6238_v7, %v1344_v34  ;;  %4800 = vmatprep.mubr.msk.f32.mxu0 %vm636_vm1, %v1429_v56 }
 0x228   : > { %v1432_v59 = vmax.f32 %v1350_v57, 0.0  ;;  %4801 = vmatmul.mubr.msk.f32.gmra.mrb[48].mxu0 %vm636_vm1, %v1430_v55 }
 0x229   : > { %v1431_v25 = vmax.f32 %v1345_v58, 0.0  ;;  %v4756_v60 = vpop.f32.mrb[52].mxu1 }
 0x22a   : > { %v1360_v35 = vadd.f32 %v6238_v7, %v4756_v60  ;;  %v1354_v61 = vpop.f32.mrb[53].mxu1 }
 0x22b   : > { %v1355_v45 = vadd.f32 %v6238_v7, %v1354_v61  ;;  %4803 = vmatprep.mubr.msk.f32.mxu0 %vm636_vm1, %v1431_v25 }
 0x22c   : > { %v1434_v62 = vmax.f32 %v1360_v35, 0.0  ;;  %4804 = vmatmul.mubr.msk.f32.gmra.mrb[50].mxu0 %vm636_vm1, %v1432_v59 }
 0x22d   : > { %v1433_v63 = vmax.f32 %v1355_v45, 0.0  ;;  %v4759_v0 = vpop.f32.mrb[54].mxu1 }
 0x22e   : > { %v1370_v26 = vadd.f32 %v6238_v7, %v4759_v0  ;;  %v1364_v2 = vpop.f32.mrb[55].mxu1 }
 0x22f   : > { %v1365_v1 = vadd.f32 %v6238_v7, %v1364_v2  ;;  %4806 = vmatprep.mubr.msk.f32.mxu0 %vm636_vm1, %v1433_v63 }
 0x230   : > { %v1436_v36 = vmax.f32 %v1370_v26, 0.0  ;;  %4807 = vmatmul.mubr.msk.f32.gmra.mrb[52].mxu0 %vm636_vm1, %v1434_v62 }
 0x231   : > { %v1435_v3 = vmax.f32 %v1365_v1, 0.0  ;;  %v4762_v27 = vpop.f32.mrb[56].mxu1 }
 0x232   : > { %v1380_v8 = vadd.f32 %v6238_v7, %v4762_v27  ;;  %v1374_v9 = vpop.f32.mrb[57].mxu1 }
 0x233   : > { %v1375_v37 = vadd.f32 %v6238_v7, %v1374_v9  ;;  %4809 = vmatprep.mubr.msk.f32.mxu0 %vm636_vm1, %v1435_v3 }
 0x234   : > { %v1438_v10 = vmax.f32 %v1380_v8, 0.0  ;;  %4810 = vmatmul.mubr.msk.f32.gmra.mrb[54].mxu0 %vm636_vm1, %v1436_v36 }
 0x235   : > { %v1437_v11 = vmax.f32 %v1375_v37, 0.0  ;;  %v4765_v12 = vpop.f32.mrb[58].mxu1 }
 0x236   : > { %v1390_v13 = vadd.f32 %v6238_v7, %v4765_v12  ;;  %v1384_v28 = vpop.f32.mrb[59].mxu1 }
 0x237   : > { %v1385_v14 = vadd.f32 %v6238_v7, %v1384_v28  ;;  %4812 = vmatprep.mubr.msk.f32.mxu0 %vm636_vm1, %v1437_v11 }
 0x238   : > { %v1440_v15 = vmax.f32 %v1390_v13, 0.0  ;;  %4813 = vmatmul.mubr.msk.f32.gmra.mrb[56].mxu0 %vm636_vm1, %v1438_v10 }
 0x239   : > { %v1439_v16 = vmax.f32 %v1385_v14, 0.0  ;;  %v4768_v29 = vpop.f32.mrb[60].mxu1 }
 0x23a   : > { %v1400_v38 = vadd.f32 %v6238_v7, %v4768_v29  ;;  %v1394_v4 = vpop.f32.mrb[61].mxu1 }
 0x23b   : > { %v1395_v17 = vadd.f32 %v6238_v7, %v1394_v4  ;;  %4815 = vmatprep.mubr.msk.f32.mxu0 %vm636_vm1, %v1439_v16 }
 0x23c   : > { %v1442_v5 = vmax.f32 %v1400_v38, 0.0  ;;  %4816 = vmatmul.mubr.msk.f32.gmra.mrb[58].mxu0 %vm636_vm1, %v1440_v15 }
 0x23d   : > { %v1441_v30 = vmax.f32 %v1395_v17, 0.0  ;;  %v4771_v18 = vpop.f32.mrb[62].mxu1 }
 0x23e   : > { %v1410_v19 = vadd.f32 %v6238_v7, %v4771_v18  ;;  %v1404_v6 = vpop.f32.mrb[63].mxu1 }
 0x23f   : > { %v1405_v39 = vadd.f32 %v6238_v7, %v1404_v6  ;;  %4818 = vmatprep.mubr.msk.f32.mxu0 %vm636_vm1, %v1441_v30 }
 0x240   : > { %v1444_v31 = vmax.f32 %v1410_v19, 0.0  ;;  %4819 = vmatmul.mubr.msk.f32.gmra.mrb[60].mxu0 %vm636_vm1, %v1442_v5 }
 0x241   : > { %v1443_v40 = vmax.f32 %v1405_v39, 0.0  ;;  %v4834_v42 = vpop.f32.mrb[64].mxu1 }
 0x242   : > { %v2196_v43 = vadd.f32 %v6238_v7, %v4834_v42  ;;  %v2190_v20 = vpop.f32.mrb[65].mxu1 }
 0x243   : > { %v2191_v21 = vadd.f32 %v6238_v7, %v2190_v20  ;;  %4821 = vmatprep.mubr.msk.f32.mxu0 %vm636_vm1, %v1443_v40 }
 0x244   : > { %v2350_v44 = vmax.f32 %v2196_v43, 0.0  ;;  %4822 = vmatmul.mubr.msk.f32.gmra.mrb[62].mxu0 %vm636_vm1, %v1444_v31 }
 0x245   : > { %v2349_v46 = vmax.f32 %v2191_v21, 0.0  ;;  %v4837_v47 = vpop.f32.mrb[66].mxu1 }
 0x246   : > { %v2206_v48 = vadd.f32 %v6238_v7, %v4837_v47  ;;  %v2200_v32 = vpop.f32.mrb[67].mxu1 }
 0x247   : > { %v2201_v49 = vadd.f32 %v6238_v7, %v2200_v32  ;;  %4884 = vmatprep.mubr.msk.f32.mxu0 %vm636_vm1, %v2349_v46 }
 0x248   : > { %v2352_v50 = vmax.f32 %v2206_v48, 0.0  ;;  %4885 = vmatmul.mubr.msk.f32.vlgmr.msra.gmra.mrb[64].mxu0 %vm636_vm1, %v2350_v44 }
 0x249   : > { %v2351_v22 = vmax.f32 %v2201_v49, 0.0  ;;  %v4840_v33 = vpop.f32.mrb[68].mxu1  ;;  %5087 = vmatpush3.bf16.msra.mxu0 %v5854_v41 }
 0x24a   : > { %v2216_v23 = vadd.f32 %v6238_v7, %v4840_v33  ;;  %v2210_v51 = vpop.f32.mrb[69].mxu1 }
 0x24b   : > { %v2211_v52 = vadd.f32 %v6238_v7, %v2210_v51  ;;  %4887 = vmatprep.mubr.msk.f32.mxu0 %vm636_vm1, %v2351_v22 }
 0x24c   : > { %v2354_v53 = vmax.f32 %v2216_v23, 0.0  ;;  %4888 = vmatmul.mubr.msk.f32.gmra.mrb[66].mxu0 %vm636_vm1, %v2352_v50 }
 0x24d   : > { %v2353_v54 = vmax.f32 %v2211_v52, 0.0  ;;  %v4843_v55 = vpop.f32.mrb[70].mxu1 }
 0x24e   : > { %v2226_v56 = vadd.f32 %v6238_v7, %v4843_v55  ;;  %v2220_v24 = vpop.f32.mrb[71].mxu1 }
 0x24f   : > { %v2221_v57 = vadd.f32 %v6238_v7, %v2220_v24  ;;  %4890 = vmatprep.mubr.msk.f32.mxu0 %vm636_vm1, %v2353_v54 }
 0x250   : > { %v2356_v41 = vmax.f32 %v2226_v56, 0.0  ;;  %4891 = vmatmul.mubr.msk.f32.gmra.mrb[68].mxu0 %vm636_vm1, %v2354_v53 }
 0x251   : > { %v2355_v34 = vmax.f32 %v2221_v57, 0.0  ;;  %v4846_v58 = vpop.f32.mrb[72].mxu1 }
 0x252   : > { %v2236_v59 = vadd.f32 %v6238_v7, %v4846_v58  ;;  %v2230_v25 = vpop.f32.mrb[73].mxu1 }
 0x253   : > { %v2231_v60 = vadd.f32 %v6238_v7, %v2230_v25  ;;  %4893 = vmatprep.mubr.msk.f32.mxu0 %vm636_vm1, %v2355_v34 }
 0x254   : > { %v2358_v35 = vmax.f32 %v2236_v59, 0.0  ;;  %4894 = vmatmul.mubr.msk.f32.gmra.mrb[70].mxu0 %vm636_vm1, %v2356_v41 }
 0x255   : > { %v2357_v61 = vmax.f32 %v2231_v60, 0.0  ;;  %v4849_v45 = vpop.f32.mrb[74].mxu1 }
 0x256   : > { %v2246_v62 = vadd.f32 %v6238_v7, %v4849_v45  ;;  %v2240_v63 = vpop.f32.mrb[75].mxu1 }
 0x257   : > { %v2241_v0 = vadd.f32 %v6238_v7, %v2240_v63  ;;  %4896 = vmatprep.mubr.msk.f32.mxu0 %vm636_vm1, %v2357_v61 }
 0x258   : > { %v2360_v26 = vmax.f32 %v2246_v62, 0.0  ;;  %4897 = vmatmul.mubr.msk.f32.gmra.mrb[72].mxu0 %vm636_vm1, %v2358_v35 }
 0x259   : > { %v2359_v2 = vmax.f32 %v2241_v0, 0.0  ;;  %v4852_v1 = vpop.f32.mrb[76].mxu1 }
 0x25a   : > { %v2256_v36 = vadd.f32 %v6238_v7, %v4852_v1  ;;  %v2250_v3 = vpop.f32.mrb[77].mxu1 }
 0x25b   : > { %v2251_v27 = vadd.f32 %v6238_v7, %v2250_v3  ;;  %4899 = vmatprep.mubr.msk.f32.mxu0 %vm636_vm1, %v2359_v2 }
 0x25c   : > { %v2362_v8 = vmax.f32 %v2256_v36, 0.0  ;;  %4900 = vmatmul.mubr.msk.f32.gmra.mrb[74].mxu0 %vm636_vm1, %v2360_v26 }
 0x25d   : > { %v2361_v9 = vmax.f32 %v2251_v27, 0.0  ;;  %v4855_v37 = vpop.f32.mrb[78].mxu1 }
 0x25e   : > { %v2266_v10 = vadd.f32 %v6238_v7, %v4855_v37  ;;  %v2260_v11 = vpop.f32.mrb[79].mxu1 }
 0x25f   : > { %v2261_v12 = vadd.f32 %v6238_v7, %v2260_v11  ;;  %4902 = vmatprep.mubr.msk.f32.mxu0 %vm636_vm1, %v2361_v9 }
 0x260   : > { %v2364_v13 = vmax.f32 %v2266_v10, 0.0  ;;  %4903 = vmatmul.mubr.msk.f32.gmra.mrb[76].mxu0 %vm636_vm1, %v2362_v8 }
 0x261   : > { %v2363_v28 = vmax.f32 %v2261_v12, 0.0  ;;  %v4858_v14 = vpop.f32.mrb[80].mxu1 }
 0x262   : > { %v2276_v15 = vadd.f32 %v6238_v7, %v4858_v14  ;;  %v2270_v16 = vpop.f32.mrb[81].mxu1 }
 0x263   : > { %v2271_v29 = vadd.f32 %v6238_v7, %v2270_v16  ;;  %4905 = vmatprep.mubr.msk.f32.mxu0 %vm636_vm1, %v2363_v28 }
 0x264   : > { %v2366_v38 = vmax.f32 %v2276_v15, 0.0  ;;  %4906 = vmatmul.mubr.msk.f32.gmra.mrb[78].mxu0 %vm636_vm1, %v2364_v13 }
 0x265   : > { %v2365_v4 = vmax.f32 %v2271_v29, 0.0  ;;  %v4861_v17 = vpop.f32.mrb[82].mxu1 }
 0x266   : > { %v2286_v5 = vadd.f32 %v6238_v7, %v4861_v17  ;;  %v2280_v30 = vpop.f32.mrb[83].mxu1 }
 0x267   : > { %v2281_v18 = vadd.f32 %v6238_v7, %v2280_v30  ;;  %4908 = vmatprep.mubr.msk.f32.mxu0 %vm636_vm1, %v2365_v4 }
 0x268   : > { %v2368_v19 = vmax.f32 %v2286_v5, 0.0  ;;  %4909 = vmatmul.mubr.msk.f32.gmra.mrb[80].mxu0 %vm636_vm1, %v2366_v38 }
 0x269   : > { %v2367_v6 = vmax.f32 %v2281_v18, 0.0  ;;  %v4864_v39 = vpop.f32.mrb[84].mxu1 }
 0x26a   : > { %v2296_v31 = vadd.f32 %v6238_v7, %v4864_v39  ;;  %v2290_v40 = vpop.f32.mrb[85].mxu1 }
 0x26b   : > { %v2291_v42 = vadd.f32 %v6238_v7, %v2290_v40  ;;  %4911 = vmatprep.mubr.msk.f32.mxu0 %vm636_vm1, %v2367_v6 }
 0x26c   : > { %v2370_v43 = vmax.f32 %v2296_v31, 0.0  ;;  %4912 = vmatmul.mubr.msk.f32.gmra.mrb[82].mxu0 %vm636_vm1, %v2368_v19 }
 0x26d   : > { %v2369_v20 = vmax.f32 %v2291_v42, 0.0  ;;  %v4867_v21 = vpop.f32.mrb[86].mxu1 }
 0x26e   : > { %v2306_v44 = vadd.f32 %v6238_v7, %v4867_v21  ;;  %v2300_v46 = vpop.f32.mrb[87].mxu1 }
 0x26f   : > { %v2301_v47 = vadd.f32 %v6238_v7, %v2300_v46  ;;  %4914 = vmatprep.mubr.msk.f32.mxu0 %vm636_vm1, %v2369_v20 }
 0x270   : > { %v2372_v48 = vmax.f32 %v2306_v44, 0.0  ;;  %4915 = vmatmul.mubr.msk.f32.gmra.mrb[84].mxu0 %vm636_vm1, %v2370_v43 }
 0x271   : > { %v2371_v32 = vmax.f32 %v2301_v47, 0.0  ;;  %v4870_v49 = vpop.f32.mrb[88].mxu1 }
 0x272   : > { %v2316_v50 = vadd.f32 %v6238_v7, %v4870_v49  ;;  %v2310_v22 = vpop.f32.mrb[89].mxu1 }
 0x273   : > { %v2311_v33 = vadd.f32 %v6238_v7, %v2310_v22  ;;  %4917 = vmatprep.mubr.msk.f32.mxu0 %vm636_vm1, %v2371_v32 }
 0x274   : > { %v2374_v23 = vmax.f32 %v2316_v50, 0.0  ;;  %4918 = vmatmul.mubr.msk.f32.gmra.mrb[86].mxu0 %vm636_vm1, %v2372_v48 }
 0x275   : > { %v2373_v51 = vmax.f32 %v2311_v33, 0.0  ;;  %v4873_v52 = vpop.f32.mrb[90].mxu1 }
 0x276   : > { %v2326_v53 = vadd.f32 %v6238_v7, %v4873_v52  ;;  %v2320_v54 = vpop.f32.mrb[91].mxu1 }
 0x277   : > { %v2321_v55 = vadd.f32 %v6238_v7, %v2320_v54  ;;  %4920 = vmatprep.mubr.msk.f32.mxu0 %vm636_vm1, %v2373_v51 }
 0x278   : > { %v2376_v56 = vmax.f32 %v2326_v53, 0.0  ;;  %4921 = vmatmul.mubr.msk.f32.gmra.mrb[88].mxu0 %vm636_vm1, %v2374_v23 }
 0x279   : > { %v2375_v24 = vmax.f32 %v2321_v55, 0.0  ;;  %v4876_v57 = vpop.f32.mrb[92].mxu1 }
 0x27a   : > { %v2336_v41 = vadd.f32 %v6238_v7, %v4876_v57  ;;  %v2330_v34 = vpop.f32.mrb[93].mxu1 }
 0x27b   : > { %v2331_v58 = vadd.f32 %v6238_v7, %v2330_v34  ;;  %4923 = vmatprep.mubr.msk.f32.mxu0 %vm636_vm1, %v2375_v24 }
 0x27c   : > { %v2378_v59 = vmax.f32 %v2336_v41, 0.0  ;;  %4924 = vmatmul.mubr.msk.f32.gmra.mrb[90].mxu0 %vm636_vm1, %v2376_v56 }
 0x27d   : > { %v2377_v25 = vmax.f32 %v2331_v58, 0.0  ;;  %v4879_v60 = vpop.f32.mrb[94].mxu1 }
 0x27e   : > { %v2346_v35 = vadd.f32 %v6238_v7, %v4879_v60  ;;  %v2340_v61 = vpop.f32.mrb[95].mxu1 }
 0x27f   : > { %v2341_v45 = vadd.f32 %v6238_v7, %v2340_v61  ;;  %4926 = vmatprep.mubr.msk.f32.mxu0 %vm636_vm1, %v2377_v25 }
 0x280   : > { %v2380_v62 = vmax.f32 %v2346_v35, 0.0  ;;  %4927 = vmatmul.mubr.msk.f32.gmra.mrb[92].mxu0 %vm636_vm1, %v2378_v59 }
 0x281   : > { %v2379_v63 = vmax.f32 %v2341_v45, 0.0  ;;  %v4942_v0 = vpop.f32.mrb[96].mxu1 }
 0x282   : > { %v3132_v26 = vadd.f32 %v6238_v7, %v4942_v0  ;;  %v3126_v2 = vpop.f32.mrb[97].mxu1 }
 0x283   : > { %v3127_v1 = vadd.f32 %v6238_v7, %v3126_v2  ;;  %4929 = vmatprep.mubr.msk.f32.mxu0 %vm636_vm1, %v2379_v63 }
 0x284   : > { %v3286_v36 = vmax.f32 %v3132_v26, 0.0  ;;  %4930 = vmatmul.mubr.msk.f32.gmra.mrb[94].mxu0 %vm636_vm1, %v2380_v62 }
 0x285   : > { %v3285_v3 = vmax.f32 %v3127_v1, 0.0  ;;  %v4945_v27 = vpop.f32.mrb[98].mxu1 }
 0x286   : > { %v3142_v8 = vadd.f32 %v6238_v7, %v4945_v27  ;;  %v3136_v9 = vpop.f32.mrb[99].mxu1 }
 0x287   : > { %v3137_v37 = vadd.f32 %v6238_v7, %v3136_v9  ;;  %4992 = vmatprep.mubr.msk.f32.mxu0 %vm636_vm1, %v3285_v3 }
 0x288   : > { %v3288_v10 = vmax.f32 %v3142_v8, 0.0  ;;  %4993 = vmatmul.mubr.msk.f32.vlgmr.msra.gmra.mrb[96].mxu0 %vm636_vm1, %v3286_v36 }
 0x289   : > { %v3287_v11 = vmax.f32 %v3137_v37, 0.0  ;;  %v4948_v12 = vpop.f32.mrb[100].mxu1 }
 0x28a   : > { %v3152_v13 = vadd.f32 %v6238_v7, %v4948_v12  ;;  %v3146_v28 = vpop.f32.mrb[101].mxu1 }
 0x28b   : > { %v3147_v14 = vadd.f32 %v6238_v7, %v3146_v28  ;;  %4995 = vmatprep.mubr.msk.f32.mxu0 %vm636_vm1, %v3287_v11 }
 0x28c   : > { %v3290_v15 = vmax.f32 %v3152_v13, 0.0  ;;  %4996 = vmatmul.mubr.msk.f32.gmra.mrb[98].mxu0 %vm636_vm1, %v3288_v10 }
 0x28d   : > { %v3289_v16 = vmax.f32 %v3147_v14, 0.0  ;;  %v4951_v29 = vpop.f32.mrb[102].mxu1 }
 0x28e   : > { %v3162_v38 = vadd.f32 %v6238_v7, %v4951_v29  ;;  %v3156_v4 = vpop.f32.mrb[103].mxu1 }
 0x28f   : > { %v3157_v17 = vadd.f32 %v6238_v7, %v3156_v4  ;;  %4998 = vmatprep.mubr.msk.f32.mxu0 %vm636_vm1, %v3289_v16 }
 0x290   : > { %v3292_v5 = vmax.f32 %v3162_v38, 0.0  ;;  %4999 = vmatmul.mubr.msk.f32.gmra.mrb[100].mxu0 %vm636_vm1, %v3290_v15 }
 0x291   : > { %v3291_v30 = vmax.f32 %v3157_v17, 0.0  ;;  %v4954_v18 = vpop.f32.mrb[104].mxu1 }
 0x292   : > { %v3172_v19 = vadd.f32 %v6238_v7, %v4954_v18  ;;  %v3166_v6 = vpop.f32.mrb[105].mxu1 }
 0x293   : > { %v3167_v39 = vadd.f32 %v6238_v7, %v3166_v6  ;;  %5001 = vmatprep.mubr.msk.f32.mxu0 %vm636_vm1, %v3291_v30 }
 0x294   : > { %v3294_v31 = vmax.f32 %v3172_v19, 0.0  ;;  %5002 = vmatmul.mubr.msk.f32.gmra.mrb[102].mxu0 %vm636_vm1, %v3292_v5 }
 0x295   : > { %v3293_v40 = vmax.f32 %v3167_v39, 0.0  ;;  %v4957_v42 = vpop.f32.mrb[106].mxu1 }
 0x296   : > { %v3182_v43 = vadd.f32 %v6238_v7, %v4957_v42  ;;  %v3176_v20 = vpop.f32.mrb[107].mxu1 }
 0x297   : > { %v3177_v21 = vadd.f32 %v6238_v7, %v3176_v20  ;;  %5004 = vmatprep.mubr.msk.f32.mxu0 %vm636_vm1, %v3293_v40 }
 0x298   : > { %v3296_v44 = vmax.f32 %v3182_v43, 0.0  ;;  %5005 = vmatmul.mubr.msk.f32.gmra.mrb[104].mxu0 %vm636_vm1, %v3294_v31 }
 0x299   : > { %v3295_v46 = vmax.f32 %v3177_v21, 0.0  ;;  %v4960_v47 = vpop.f32.mrb[108].mxu1 }
 0x29a   : > { %v3192_v48 = vadd.f32 %v6238_v7, %v4960_v47  ;;  %v3186_v32 = vpop.f32.mrb[109].mxu1 }
 0x29b   : > { %v3187_v49 = vadd.f32 %v6238_v7, %v3186_v32  ;;  %5007 = vmatprep.mubr.msk.f32.mxu0 %vm636_vm1, %v3295_v46 }
 0x29c   : > { %v3298_v50 = vmax.f32 %v3192_v48, 0.0  ;;  %5008 = vmatmul.mubr.msk.f32.gmra.mrb[106].mxu0 %vm636_vm1, %v3296_v44  ;;  %v6467_v44 = vld [vmem:[#allocation2] ss:$0 sm:$0xff] }
 0x29d   : > { %v3297_v22 = vmax.f32 %v3187_v49, 0.0  ;;  %v4963_v33 = vpop.f32.mrb[110].mxu1 }
 0x29e   : > { %v3202_v23 = vadd.f32 %v6238_v7, %v4963_v33  ;;  %v3196_v51 = vpop.f32.mrb[111].mxu1 }
 0x29f   : > { %v3197_v52 = vadd.f32 %v6238_v7, %v3196_v51  ;;  %5010 = vmatprep.mubr.msk.f32.mxu0 %vm636_vm1, %v3297_v22 }
 0x2a0   : > { %v3300_v53 = vmax.f32 %v3202_v23, 0.0  ;;  %5011 = vmatmul.mubr.msk.f32.gmra.mrb[108].mxu0 %vm636_vm1, %v3298_v50 }
 0x2a1   : > { %v3299_v54 = vmax.f32 %v3197_v52, 0.0  ;;  %v4966_v55 = vpop.f32.mrb[112].mxu1 }
 0x2a2   : > { %v3212_v56 = vadd.f32 %v6238_v7, %v4966_v55  ;;  %v3206_v24 = vpop.f32.mrb[113].mxu1 }
 0x2a3   : > { %v3207_v57 = vadd.f32 %v6238_v7, %v3206_v24  ;;  %5013 = vmatprep.mubr.msk.f32.mxu0 %vm636_vm1, %v3299_v54 }
 0x2a4   : > { %v3302_v41 = vmax.f32 %v3212_v56, 0.0  ;;  %5014 = vmatmul.mubr.msk.f32.gmra.mrb[110].mxu0 %vm636_vm1, %v3300_v53 }
 0x2a5   : > { %v3301_v34 = vmax.f32 %v3207_v57, 0.0  ;;  %v4969_v58 = vpop.f32.mrb[114].mxu1 }
 0x2a6   : > { %v3222_v59 = vadd.f32 %v6238_v7, %v4969_v58  ;;  %v3216_v25 = vpop.f32.mrb[115].mxu1 }
 0x2a7   : > { %v3217_v60 = vadd.f32 %v6238_v7, %v3216_v25  ;;  %5016 = vmatprep.mubr.msk.f32.mxu0 %vm636_vm1, %v3301_v34 }
 0x2a8   : > { %v3304_v35 = vmax.f32 %v3222_v59, 0.0  ;;  %5017 = vmatmul.mubr.msk.f32.gmra.mrb[112].mxu0 %vm636_vm1, %v3302_v41 }
 0x2a9   : > { %v3303_v61 = vmax.f32 %v3217_v60, 0.0  ;;  %v4972_v45 = vpop.f32.mrb[116].mxu1 }
 0x2aa   : > { %v3232_v62 = vadd.f32 %v6238_v7, %v4972_v45  ;;  %v3226_v63 = vpop.f32.mrb[117].mxu1 }
 0x2ab   : > { %v3227_v0 = vadd.f32 %v6238_v7, %v3226_v63  ;;  %5019 = vmatprep.mubr.msk.f32.mxu0 %vm636_vm1, %v3303_v61 }
 0x2ac   : > { %v3306_v26 = vmax.f32 %v3232_v62, 0.0  ;;  %5020 = vmatmul.mubr.msk.f32.gmra.mrb[114].mxu0 %vm636_vm1, %v3304_v35 }
 0x2ad   : > { %v3305_v2 = vmax.f32 %v3227_v0, 0.0  ;;  %v4975_v1 = vpop.f32.mrb[118].mxu1 }
 0x2ae   : > { %v3242_v36 = vadd.f32 %v6238_v7, %v4975_v1  ;;  %v3236_v3 = vpop.f32.mrb[119].mxu1 }
 0x2af   : > { %v3237_v27 = vadd.f32 %v6238_v7, %v3236_v3  ;;  %5022 = vmatprep.mubr.msk.f32.mxu0 %vm636_vm1, %v3305_v2 }
 0x2b0   : > { %v3308_v8 = vmax.f32 %v3242_v36, 0.0  ;;  %5023 = vmatmul.mubr.msk.f32.gmra.mrb[116].mxu0 %vm636_vm1, %v3306_v26 }
 0x2b1   : > { %v3307_v9 = vmax.f32 %v3237_v27, 0.0  ;;  %v4978_v37 = vpop.f32.mrb[120].mxu1 }
 0x2b2   : > { %v3252_v10 = vadd.f32 %v6238_v7, %v4978_v37  ;;  %v3246_v11 = vpop.f32.mrb[121].mxu1 }
 0x2b3   : > { %v3247_v12 = vadd.f32 %v6238_v7, %v3246_v11  ;;  %5025 = vmatprep.mubr.msk.f32.mxu0 %vm636_vm1, %v3307_v9 }
 0x2b4   : > { %v3310_v13 = vmax.f32 %v3252_v10, 0.0  ;;  %5026 = vmatmul.mubr.msk.f32.gmra.mrb[118].mxu0 %vm636_vm1, %v3308_v8 }
 0x2b5   : > { %v3309_v28 = vmax.f32 %v3247_v12, 0.0  ;;  %v4981_v14 = vpop.f32.mrb[122].mxu1 }
 0x2b6   : > { %v3262_v15 = vadd.f32 %v6238_v7, %v4981_v14  ;;  %v3256_v16 = vpop.f32.mrb[123].mxu1 }
 0x2b7   : > { %v3257_v29 = vadd.f32 %v6238_v7, %v3256_v16  ;;  %5028 = vmatprep.mubr.msk.f32.mxu0 %vm636_vm1, %v3309_v28 }
 0x2b8   : > { %v3312_v38 = vmax.f32 %v3262_v15, 0.0  ;;  %5029 = vmatmul.mubr.msk.f32.gmra.mrb[120].mxu0 %vm636_vm1, %v3310_v13 }
 0x2b9   : > { %v3311_v4 = vmax.f32 %v3257_v29, 0.0  ;;  %v4984_v17 = vpop.f32.mrb[124].mxu1 }
 0x2ba   : > { %v3272_v5 = vadd.f32 %v6238_v7, %v4984_v17  ;;  %v3266_v30 = vpop.f32.mrb[125].mxu1 }
 0x2bb   : > { %v3267_v18 = vadd.f32 %v6238_v7, %v3266_v30  ;;  %5031 = vmatprep.mubr.msk.f32.mxu0 %vm636_vm1, %v3311_v4 }
 0x2bc   : > { %v3314_v19 = vmax.f32 %v3272_v5, 0.0  ;;  %5032 = vmatmul.mubr.msk.f32.gmra.mrb[122].mxu0 %vm636_vm1, %v3312_v38 }
 0x2bd   : > { %v3313_v6 = vmax.f32 %v3267_v18, 0.0  ;;  %v4987_v39 = vpop.f32.mrb[126].mxu1 }
 0x2be   : > { %v3282_v31 = vadd.f32 %v6238_v7, %v4987_v39  ;;  %v3276_v40 = vpop.f32.mrb[127].mxu1 }
 0x2bf   : > { %v3277_v42 = vadd.f32 %v6238_v7, %v3276_v40  ;;  %5034 = vmatprep.mubr.msk.f32.mxu0 %vm636_vm1, %v3313_v6 }
 0x2c0   : > { %v3316_v43 = vmax.f32 %v3282_v31, 0.0  ;;  %5035 = vmatmul.mubr.msk.f32.gmra.mrb[124].mxu0 %vm636_vm1, %v3314_v19 }
 0x2c1   : > { %v3315_v20 = vmax.f32 %v3277_v42, 0.0 }
 0x2c3   : > { %5037 = vmatprep.mubr.msk.f32.mxu0 %vm636_vm1, %v3315_v20 }
 0x2c4   : > { %5038 = vmatmul.mubr.msk.f32.gmra.mrb[126].mxu0 %vm636_vm1, %v3316_v43 }
 0x2db   : > { %v4778_v21 = vpop.f32.mrb[32].mxu0 }
 0x2dc   : > { %v1613_v46 = vadd.f32 %v6467_v44, %v4778_v21  ;;  %v1607_v47 = vpop.f32.mrb[33].mxu0 }
 0x2dd   : > { %v1608_v48 = vadd.f32 %v6467_v44, %v1607_v47 }
 0x2de   : > { %v1767_v32 = vsub.f32 0.0, %v1613_v46 }
 0x2df   : > { %v1766_v7 = vsub.f32 0.0, %v1608_v48  ;;  %v4781_v49 = vpop.f32.mrb[34].mxu0 }
 0x2e0   : > { %v1800_v50 = vmul.f32 1.442695, %v1767_v32  ;;  %v1623_v22 = vadd.f32 %v6467_v44, %v4781_v49  ;;  %v1617_v33 = vpop.f32.mrb[35].mxu0 }
 0x2e1   : > { %v1798_v23 = vmul.f32 1.442695, %v1766_v7  ;;  %v1618_v51 = vadd.f32 %v6467_v44, %v1617_v33 }
 0x2e2   : > { %5227 = vpow2.f32 %v1800_v50  ;;  %v1769_v52 = vsub.f32 0.0, %v1623_v22 }
 0x2e3   : > { %5229 = vpow2.f32 %v1798_v23  ;;  %v1768_v53 = vsub.f32 0.0, %v1618_v51  ;;  %v4784_v54 = vpop.f32.mrb[36].mxu0 }
 0x2e4   : > { %v1804_v55 = vmul.f32 1.442695, %v1769_v52  ;;  %v1633_v56 = vadd.f32 %v6467_v44, %v4784_v54  ;;  %v1627_v24 = vpop.f32.mrb[37].mxu0 }
 0x2e5   : > { %v1802_v57 = vmul.f32 1.442695, %v1768_v53  ;;  %v1628_v41 = vadd.f32 %v6467_v44, %v1627_v24 }
 0x2e6   : > { %5231 = vpow2.f32 %v1804_v55  ;;  %v1771_v34 = vsub.f32 0.0, %v1633_v56 }
 0x2e7   : > { %5233 = vpow2.f32 %v1802_v57  ;;  %v1770_v58 = vsub.f32 0.0, %v1628_v41  ;;  %v4787_v59 = vpop.f32.mrb[38].mxu0 }
 0x2e8   : > { %v1808_v25 = vmul.f32 1.442695, %v1771_v34  ;;  %v1643_v60 = vadd.f32 %v6467_v44, %v4787_v59  ;;  %v1637_v35 = vpop.f32.mrb[39].mxu0 }
 0x2e9   : > { %v1806_v61 = vmul.f32 1.442695, %v1770_v58  ;;  %v1638_v45 = vadd.f32 %v6467_v44, %v1637_v35 }
 0x2ea   : > { %5235 = vpow2.f32 %v1808_v25  ;;  %v1773_v62 = vsub.f32 0.0, %v1643_v60 }
 0x2eb   : > { %5237 = vpow2.f32 %v1806_v61  ;;  %v1772_v63 = vsub.f32 0.0, %v1638_v45  ;;  %v4790_v0 = vpop.f32.mrb[40].mxu0 }
 0x2ec   : > { %v5228_v26 = vpop.eup %5227  ;;  %v1812_v2 = vmul.f32 1.442695, %v1773_v62  ;;  %v1653_v1 = vadd.f32 %v6467_v44, %v4790_v0  ;;  %v1647_v36 = vpop.f32.mrb[41].mxu0 }
 0x2ed   : > { %v5230_v3 = vpop.eup %5229  ;;  %v1863_v27 = vadd.f32 1.0, %v5228_v26  ;;  %v1810_v8 = vmul.f32 1.442695, %v1772_v63  ;;  %v1648_v9 = vadd.f32 %v6467_v44, %v1647_v36 }
 0x2ee   : > { %v1862_v37 = vadd.f32 1.0, %v5230_v3  ;;  %5239 = vpow2.f32 %v1812_v2  ;;  %v1775_v10 = vsub.f32 0.0, %v1653_v1 }
 0x2ef   : > { %5241 = vrcp.f32 %v1863_v27  ;;  %v1774_v11 = vsub.f32 0.0, %v1648_v9  ;;  %v4793_v12 = vpop.f32.mrb[42].mxu0 }
 0x2f0   : > { %v5232_v13 = vpop.eup %5231  ;;  %5243 = vrcp.f32 %v1862_v37  ;;  %v1816_v28 = vmul.f32 1.442695, %v1775_v10  ;;  %v1663_v14 = vadd.f32 %v6467_v44, %v4793_v12  ;;  %v1657_v15 = vpop.f32.mrb[43].mxu0 }
 0x2f1   : > { %v5234_v16 = vpop.eup %5233  ;;  %v1865_v29 = vadd.f32 1.0, %v5232_v13  ;;  %5245 = vpow2.f32 %v1810_v8  ;;  %v1814_v38 = vmul.f32 1.442695, %v1774_v11  ;;  %v1658_v4 = vadd.f32 %v6467_v44, %v1657_v15 }
 0x2f2   : > { %5247 = vpow2.f32 %v1816_v28  ;;  %v1777_v17 = vsub.f32 0.0, %v1663_v14  ;;  %v1864_v5 = vadd.f32 1.0, %v5234_v16 }
 0x2f3   : > { %5249 = vrcp.f32 %v1865_v29  ;;  %v1776_v30 = vsub.f32 0.0, %v1658_v4  ;;  %v4796_v18 = vpop.f32.mrb[44].mxu0 }
 0x2f4   : > { %v5236_v19 = vpop.eup %5235  ;;  %v1820_v6 = vmul.f32 1.442695, %v1777_v17  ;;  %v1673_v39 = vadd.f32 %v6467_v44, %v4796_v18  ;;  %v1667_v31 = vpop.f32.mrb[45].mxu0  ;;  %5251 = vpow2.f32 %v1814_v38 }
 0x2f5   : > { %v5238_v40 = vpop.eup %5237  ;;  %v1818_v42 = vmul.f32 1.442695, %v1776_v30  ;;  %v1668_v43 = vadd.f32 %v6467_v44, %v1667_v31  ;;  %v1867_v46 = vadd.f32 1.0, %v5236_v19 }
 0x2f6   : > { %v1866_v20 = vadd.f32 1.0, %v5238_v40  ;;  %5253 = vpow2.f32 %v1820_v6  ;;  %v1779_v21 = vsub.f32 0.0, %v1673_v39 }
 0x2f7   : > { %5255 = vrcp.f32 %v1864_v5  ;;  %v1778_v47 = vsub.f32 0.0, %v1668_v43  ;;  %v4799_v48 = vpop.f32.mrb[46].mxu0 }
 0x2f8   : > { %v5240_v32 = vpop.eup %5239  ;;  %5257 = vrcp.f32 %v1866_v20  ;;  %v1824_v7 = vmul.f32 1.442695, %v1779_v21  ;;  %v1683_v49 = vadd.f32 %v6467_v44, %v4799_v48  ;;  %v1677_v50 = vpop.f32.mrb[47].mxu0 }
 0x2f9   : > { %v5242_v22 = vpop.eup %5241  ;;  %v1869_v33 = vadd.f32 1.0, %v5240_v32  ;;  %5259 = vpow2.f32 %v1818_v42  ;;  %v1822_v23 = vmul.f32 1.442695, %v1778_v47  ;;  %v1678_v51 = vadd.f32 %v6467_v44, %v1677_v50 }
 0x2fa   : > { %v5244_v52 = vpop.eup %5243  ;;  %5261 = vpow2.f32 %v1824_v7  ;;  %v1781_v53 = vsub.f32 0.0, %v1683_v49  ;;  %1992 = vrot.lane.b32.xlu0 %v5242_v22, %s5622_s19 }
 0x2fb   : > { %v5246_v54 = vpop.eup %5245  ;;  %5263 = vrcp.f32 %v1867_v46  ;;  %v1780_v55 = vsub.f32 0.0, %v1678_v51  ;;  %v4802_v56 = vpop.f32.mrb[48].mxu0 }
 0x2fc   : > { %v5248_v24 = vpop.eup %5247  ;;  %v1868_v57 = vadd.f32 1.0, %v5246_v54  ;;  %5265 = vpow2.f32 %v1822_v23  ;;  %v1828_v41 = vmul.f32 1.442695, %v1781_v53  ;;  %v1693_v34 = vadd.f32 %v6467_v44, %v4802_v56  ;;  %v1687_v58 = vpop.f32.mrb[49].mxu0 }
 0x2fd   : > { %v5250_v59 = vpop.eup %5249  ;;  %5267 = vrcp.f32 %v1869_v33  ;;  %v1871_v25 = vadd.f32 1.0, %v5248_v24  ;;  %v1826_v60 = vmul.f32 1.442695, %v1780_v55  ;;  %v1688_v35 = vadd.f32 %v6467_v44, %v1687_v58 }
 0x2fe   : > { %5269 = vrcp.f32 %v1868_v57  ;;  %v1783_v61 = vsub.f32 0.0, %v1693_v34  ;;  %1996 = vrot.lane.b32.xlu1 %v5250_v59, %s5622_s19  ;;  %1990 = vrot.lane.b32.xlu0 %v5244_v52, %s5622_s19  ;;  %v5252_v45 = vpop.eup %5251 }
 0x2ff   : > { %5271 = vrcp.f32 %v1871_v25  ;;  %v1782_v62 = vsub.f32 0.0, %v1688_v35  ;;  %v4805_v63 = vpop.f32.mrb[50].mxu0  ;;  %v1870_v26 = vadd.f32 1.0, %v5252_v45 }
 0x300   : > { %v5254_v0 = vpop.eup %5253  ;;  %5273 = vpow2.f32 %v1828_v41  ;;  %v1832_v2 = vmul.f32 1.442695, %v1783_v61  ;;  %v1703_v1 = vadd.f32 %v6467_v44, %v4805_v63  ;;  %v1697_v36 = vpop.f32.mrb[51].mxu0 }
 0x301   : > { %v5256_v3 = vpop.eup %5255  ;;  %v1873_v27 = vadd.f32 1.0, %v5254_v0  ;;  %5275 = vpow2.f32 %v1826_v60  ;;  %v1830_v8 = vmul.f32 1.442695, %v1782_v62  ;;  %v1698_v9 = vadd.f32 %v6467_v44, %v1697_v36 }
 0x302   : > { %v5258_v37 = vpop.eup %5257  ;;  %5277 = vrcp.f32 %v1870_v26  ;;  %v1785_v10 = vsub.f32 0.0, %v1703_v1  ;;  %1994 = vrot.lane.b32.xlu1 %v5256_v3, %s5622_s19 }
 0x303   : > { %v5260_v11 = vpop.eup %5259  ;;  %5279 = vrcp.f32 %v1873_v27  ;;  %v1784_v12 = vsub.f32 0.0, %v1698_v9  ;;  %v4808_v13 = vpop.f32.mrb[52].mxu0  ;;  %1998 = vrot.lane.b32.xlu0 %v5258_v37, %s5622_s19 }
 0x304   : > { %v5262_v28 = vpop.eup %5261  ;;  %v1872_v14 = vadd.f32 1.0, %v5260_v11  ;;  %5281 = vpow2.f32 %v1832_v2  ;;  %v1836_v15 = vmul.f32 1.442695, %v1785_v10  ;;  %v1713_v16 = vadd.f32 %v6467_v44, %v4808_v13  ;;  %v1707_v29 = vpop.f32.mrb[53].mxu0 }
 0x305   : > { %v5264_v38 = vpop.eup %5263  ;;  %v1875_v4 = vadd.f32 1.0, %v5262_v28  ;;  %5283 = vpow2.f32 %v1830_v8  ;;  %v1708_v17 = vadd.f32 %v6467_v44, %v1707_v29  ;;  %v1834_v30 = vmul.f32 1.442695, %v1784_v12 }
 0x306   : > { %v5266_v5 = vpop.eup %5265  ;;  %5285 = vrcp.f32 %v1872_v14  ;;  %v1787_v18 = vsub.f32 0.0, %v1713_v16  ;;  %2000 = vrot.lane.b32.xlu1 %v5264_v38, %s5622_s19 }
 0x307   : > { %v5268_v19 = vpop.eup %5267  ;;  %5287 = vrcp.f32 %v1875_v4  ;;  %v1874_v6 = vadd.f32 1.0, %v5266_v5  ;;  %v1786_v39 = vsub.f32 0.0, %v1708_v17  ;;  %v4811_v31 = vpop.f32.mrb[54].mxu0 }
 0x308   : > { %v5270_v40 = vpop.eup %5269  ;;  %5289 = vpow2.f32 %v1836_v15  ;;  %v1840_v42 = vmul.f32 1.442695, %v1787_v18  ;;  %v1723_v43 = vadd.f32 %v6467_v44, %v4811_v31  ;;  %v1717_v20 = vpop.f32.mrb[55].mxu0 }
 0x309   : > { %v5272_v21 = vpop.eup %5271  ;;  %5291 = vrcp.f32 %v1874_v6  ;;  %v1838_v46 = vmul.f32 1.442695, %v1786_v39  ;;  %2002 = vrot.lane.b32.xlu0 %v5270_v40, %s5622_s19  ;;  %v1718_v47 = vadd.f32 %v6467_v44, %v1717_v20 }
 0x30a   : > { %v5274_v48 = vpop.eup %5273  ;;  %5293 = vpow2.f32 %v1834_v30  ;;  %v1789_v32 = vsub.f32 0.0, %v1723_v43  ;;  %2004 = vrot.lane.b32.xlu1 %v5268_v19, %s5622_s19 }
 0x30b   : > { %v5276_v7 = vpop.eup %5275  ;;  %v1877_v49 = vadd.f32 1.0, %v5274_v48  ;;  %5295 = vpow2.f32 %v1840_v42  ;;  %v1788_v50 = vsub.f32 0.0, %v1718_v47  ;;  %v4814_v22 = vpop.f32.mrb[56].mxu0 }
 0x30c   : > { %v5278_v33 = vpop.eup %5277  ;;  %v1876_v23 = vadd.f32 1.0, %v5276_v7  ;;  %5297 = vpow2.f32 %v1838_v46  ;;  %v1844_v51 = vmul.f32 1.442695, %v1789_v32  ;;  %v1733_v52 = vadd.f32 %v6467_v44, %v4814_v22  ;;  %v1727_v53 = vpop.f32.mrb[57].mxu0 }
 0x30d   : > { %v5280_v54 = vpop.eup %5279  ;;  %5299 = vrcp.f32 %v1877_v49  ;;  %v1842_v55 = vmul.f32 1.442695, %v1788_v50  ;;  %2006 = vrot.lane.b32.xlu0 %v5278_v33, %s5622_s19  ;;  %v1728_v56 = vadd.f32 %v6467_v44, %v1727_v53 }
 0x30e   : > { %v5282_v24 = vpop.eup %5281  ;;  %5301 = vrcp.f32 %v1876_v23  ;;  %v1791_v57 = vsub.f32 0.0, %v1733_v52  ;;  %2008 = vrot.lane.b32.xlu1 %v5272_v21, %s5622_s19 }
 0x30f   : > { %v5284_v41 = vpop.eup %5283  ;;  %v1879_v34 = vadd.f32 1.0, %v5282_v24  ;;  %5303 = vpow2.f32 %v1844_v51  ;;  %v1790_v58 = vsub.f32 0.0, %v1728_v56  ;;  %v4817_v59 = vpop.f32.mrb[58].mxu0 }
 0x310   : > { %v5286_v25 = vpop.eup %5285  ;;  %v1878_v60 = vadd.f32 1.0, %v5284_v41  ;;  %5305 = vpow2.f32 %v1842_v55  ;;  %v1848_v35 = vmul.f32 1.442695, %v1791_v57  ;;  %v1743_v61 = vadd.f32 %v6467_v44, %v4817_v59  ;;  %v1737_v45 = vpop.f32.mrb[59].mxu0 }
 0x311   : > { %v5288_v62 = vpop.eup %5287  ;;  %5307 = vrcp.f32 %v1879_v34  ;;  %v1846_v63 = vmul.f32 1.442695, %v1790_v58  ;;  %2010 = vrot.lane.b32.xlu0 %v5286_v25, %s5622_s19  ;;  %v1738_v0 = vadd.f32 %v6467_v44, %v1737_v45 }
 0x312   : > { %v5290_v26 = vpop.eup %5289  ;;  %5309 = vrcp.f32 %v1878_v60  ;;  %v1793_v2 = vsub.f32 0.0, %v1743_v61  ;;  %2012 = vrot.lane.b32.xlu1 %v5280_v54, %s5622_s19 }
 0x313   : > { %v5292_v1 = vpop.eup %5291  ;;  %v1881_v36 = vadd.f32 1.0, %v5290_v26  ;;  %5311 = vpow2.f32 %v1848_v35  ;;  %v1792_v3 = vsub.f32 0.0, %v1738_v0  ;;  %v4820_v27 = vpop.f32.mrb[60].mxu0 }
 0x314   : > { %v5294_v8 = vpop.eup %5293  ;;  %5313 = vpow2.f32 %v1846_v63  ;;  %v1852_v9 = vmul.f32 1.442695, %v1793_v2  ;;  %v1753_v37 = vadd.f32 %v6467_v44, %v4820_v27  ;;  %v1747_v10 = vpop.f32.mrb[61].mxu0 }
 0x315   : > { %v5296_v11 = vpop.eup %5295  ;;  %5315 = vrcp.f32 %v1881_v36  ;;  %v1880_v12 = vadd.f32 1.0, %v5294_v8  ;;  %2014 = vrot.lane.b32.xlu0 %v5292_v1, %s5622_s19  ;;  %v1748_v13 = vadd.f32 %v6467_v44, %v1747_v10  ;;  %v1850_v15 = vmul.f32 1.442695, %v1792_v3 }
 0x316   : > { %v5298_v28 = vpop.eup %5297  ;;  %v1883_v14 = vadd.f32 1.0, %v5296_v11  ;;  %5317 = vpow2.f32 %v1852_v9  ;;  %v1795_v16 = vsub.f32 0.0, %v1753_v37  ;;  %2016 = vrot.lane.b32.xlu1 %v5288_v62, %s5622_s19 }
 0x317   : > { %v5300_v29 = vpop.eup %5299  ;;  %5319 = vrcp.f32 %v1880_v12  ;;  %v1882_v38 = vadd.f32 1.0, %v5298_v28  ;;  %v1794_v4 = vsub.f32 0.0, %v1748_v13  ;;  %v4823_v17 = vpop.f32.mrb[62].mxu0 }
 0x318   : > { %v5302_v5 = vpop.eup %5301  ;;  %5321 = vrcp.f32 %v1883_v14  ;;  %v1856_v30 = vmul.f32 1.442695, %v1795_v16  ;;  %v1763_v18 = vadd.f32 %v6467_v44, %v4823_v17  ;;  %v1757_v19 = vpop.f32.mrb[63].mxu0 }
 0x319   : > { %v5304_v6 = vpop.eup %5303  ;;  %5323 = vrcp.f32 %v1882_v38  ;;  %2018 = vrot.lane.b32.xlu0 %v5302_v5, %s5622_s19  ;;  %v1758_v39 = vadd.f32 %v6467_v44, %v1757_v19  ;;  %v1854_v42 = vmul.f32 1.442695, %v1794_v4 }
 0x31a   : > { %v5306_v31 = vpop.eup %5305  ;;  %v1885_v40 = vadd.f32 1.0, %v5304_v6  ;;  %5325 = vpow2.f32 %v1850_v15  ;;  %v1797_v43 = vsub.f32 0.0, %v1763_v18  ;;  %2020 = vrot.lane.b32.xlu1 %v5300_v29, %s5622_s19 }
 0x31b   : > { %v5308_v20 = vpop.eup %5307  ;;  %v1884_v21 = vadd.f32 1.0, %v5306_v31  ;;  %5327 = vpow2.f32 %v1856_v30  ;;  %v1796_v46 = vsub.f32 0.0, %v1758_v39  ;;  %v4886_v47 = vpop.f32.mrb[64].mxu0 }
 0x31c   : > { %v5310_v48 = vpop.eup %5309  ;;  %5329 = vrcp.f32 %v1885_v40  ;;  %v1860_v32 = vmul.f32 1.442695, %v1797_v43  ;;  %v2549_v7 = vadd.f32 %v6467_v44, %v4886_v47  ;;  %v2543_v49 = vpop.f32.mrb[65].mxu0 }
 0x31d   : > { %v5312_v50 = vpop.eup %5311  ;;  %5331 = vrcp.f32 %v1884_v21  ;;  %2022 = vrot.lane.b32.xlu0 %v5310_v48, %s5622_s19  ;;  %v2544_v22 = vadd.f32 %v6467_v44, %v2543_v49  ;;  %v1858_v51 = vmul.f32 1.442695, %v1796_v46 }
 0x31e   : > { %v5314_v33 = vpop.eup %5313  ;;  %v1887_v23 = vadd.f32 1.0, %v5312_v50  ;;  %5333 = vpow2.f32 %v1854_v42  ;;  %v2703_v52 = vsub.f32 0.0, %v2549_v7  ;;  %2024 = vrot.lane.b32.xlu1 %v5308_v20, %s5622_s19 }
 0x31f   : > { %v5316_v53 = vpop.eup %5315  ;;  %v1886_v54 = vadd.f32 1.0, %v5314_v33  ;;  %5335 = vpow2.f32 %v1860_v32  ;;  %v2702_v55 = vsub.f32 0.0, %v2544_v22  ;;  %v4889_v56 = vpop.f32.mrb[66].mxu0 }
 0x320   : > { %v5318_v24 = vpop.eup %5317  ;;  %5337 = vrcp.f32 %v1887_v23  ;;  %v2736_v57 = vmul.f32 1.442695, %v2703_v52  ;;  %v2559_v41 = vadd.f32 %v6467_v44, %v4889_v56  ;;  %v2553_v34 = vpop.f32.mrb[67].mxu0 }
 0x321   : > { %v5320_v58 = vpop.eup %5319  ;;  %5339 = vrcp.f32 %v1886_v54  ;;  %v1889_v59 = vadd.f32 1.0, %v5318_v24  ;;  %v2734_v25 = vmul.f32 1.442695, %v2702_v55  ;;  %v2554_v60 = vadd.f32 %v6467_v44, %v2553_v34 }
 0x322   : > { %v5322_v35 = vpop.eup %5321  ;;  %5341 = vpow2.f32 %v1858_v51  ;;  %v2705_v61 = vsub.f32 0.0, %v2559_v41  ;;  %2026 = vrot.lane.b32.xlu0 %v5320_v58, %s5622_s19  ;;  %2028 = vrot.lane.b32.xlu1 %v5316_v53, %s5622_s19 }
 0x323   : > { %v5324_v45 = vpop.eup %5323  ;;  %5343 = vrcp.f32 %v1889_v59  ;;  %v2704_v62 = vsub.f32 0.0, %v2554_v60  ;;  %v4892_v63 = vpop.f32.mrb[68].mxu0 }
 0x324   : > { %v5326_v0 = vpop.eup %5325  ;;  %5345 = vpow2.f32 %v2736_v57  ;;  %v2740_v26 = vmul.f32 1.442695, %v2705_v61  ;;  %v2569_v2 = vadd.f32 %v6467_v44, %v4892_v63  ;;  %v2563_v1 = vpop.f32.mrb[69].mxu0 }
 0x325   : > { %v5328_v36 = vpop.eup %5327  ;;  %v1888_v3 = vadd.f32 1.0, %v5326_v0  ;;  %5347 = vpow2.f32 %v2734_v25  ;;  %v2738_v27 = vmul.f32 1.442695, %v2704_v62  ;;  %v2564_v8 = vadd.f32 %v6467_v44, %v2563_v1 }
 0x326   : > { %v5330_v9 = vpop.eup %5329  ;;  %v1891_v37 = vadd.f32 1.0, %v5328_v36  ;;  %5349 = vpow2.f32 %v2740_v26  ;;  %v2707_v10 = vsub.f32 0.0, %v2569_v2  ;;  %2030 = vrot.lane.b32.xlu0 %v5324_v45, %s5622_s19  ;;  %2032 = vrot.lane.b32.xlu1 %v5322_v35, %s5622_s19 }
 0x327   : > { %v5332_v11 = vpop.eup %5331  ;;  %5351 = vrcp.f32 %v1888_v3  ;;  %v2706_v12 = vsub.f32 0.0, %v2564_v8  ;;  %v4895_v13 = vpop.f32.mrb[70].mxu0 }
 0x328   : > { %v5334_v28 = vpop.eup %5333  ;;  %5353 = vrcp.f32 %v1891_v37  ;;  %v2744_v14 = vmul.f32 1.442695, %v2707_v10  ;;  %v2579_v15 = vadd.f32 %v6467_v44, %v4895_v13  ;;  %v2573_v16 = vpop.f32.mrb[71].mxu0 }
 0x329   : > { %v5336_v29 = vpop.eup %5335  ;;  %v1890_v38 = vadd.f32 1.0, %v5334_v28  ;;  %5355 = vpow2.f32 %v2738_v27  ;;  %v2742_v4 = vmul.f32 1.442695, %v2706_v12  ;;  %v2574_v17 = vadd.f32 %v6467_v44, %v2573_v16 }
 0x32a   : > { %v5338_v5 = vpop.eup %5337  ;;  %v1893_v30 = vadd.f32 1.0, %v5336_v29  ;;  %5357 = vpow2.f32 %v2744_v14  ;;  %v2709_v18 = vsub.f32 0.0, %v2579_v15  ;;  %2034 = vrot.lane.b32.xlu0 %v5332_v11, %s5622_s19  ;;  %2036 = vrot.lane.b32.xlu1 %v5330_v9, %s5622_s19 }
 0x32b   : > { %v5340_v19 = vpop.eup %5339  ;;  %5359 = vrcp.f32 %v1890_v38  ;;  %v2708_v6 = vsub.f32 0.0, %v2574_v17  ;;  %v4898_v39 = vpop.f32.mrb[72].mxu0 }
 0x32c   : > { %v5342_v31 = vpop.eup %5341  ;;  %5361 = vrcp.f32 %v1893_v30  ;;  %v2748_v40 = vmul.f32 1.442695, %v2709_v18  ;;  %v2589_v42 = vadd.f32 %v6467_v44, %v4898_v39  ;;  %v2583_v43 = vpop.f32.mrb[73].mxu0 }
 0x32d   : > { %v5344_v20 = vpop.eup %5343  ;;  %v1892_v21 = vadd.f32 1.0, %v5342_v31  ;;  %5363 = vpow2.f32 %v2742_v4  ;;  %v2746_v46 = vmul.f32 1.442695, %v2708_v6  ;;  %v2584_v47 = vadd.f32 %v6467_v44, %v2583_v43 }
 0x32e   : > { %v5346_v48 = vpop.eup %5345  ;;  %5365 = vpow2.f32 %v2748_v40  ;;  %v2711_v32 = vsub.f32 0.0, %v2589_v42  ;;  %2038 = vrot.lane.b32.xlu0 %v5340_v19, %s5622_s19  ;;  %2040 = vrot.lane.b32.xlu1 %v5338_v5, %s5622_s19 }
 0x32f   : > { %v5348_v7 = vpop.eup %5347  ;;  %5367 = vrcp.f32 %v1892_v21  ;;  %v2799_v49 = vadd.f32 1.0, %v5346_v48  ;;  %v2710_v50 = vsub.f32 0.0, %v2584_v47  ;;  %v4901_v22 = vpop.f32.mrb[74].mxu0 }
 0x330   : > { %v5350_v33 = vpop.eup %5349  ;;  %v2798_v23 = vadd.f32 1.0, %v5348_v7  ;;  %5369 = vpow2.f32 %v2746_v46  ;;  %v2752_v51 = vmul.f32 1.442695, %v2711_v32  ;;  %v2599_v52 = vadd.f32 %v6467_v44, %v4901_v22  ;;  %v2593_v53 = vpop.f32.mrb[75].mxu0 }
 0x331   : > { %v5352_v54 = vpop.eup %5351  ;;  %5371 = vrcp.f32 %v2799_v49  ;;  %v2801_v55 = vadd.f32 1.0, %v5350_v33  ;;  %v2750_v56 = vmul.f32 1.442695, %v2710_v50  ;;  %v2594_v24 = vadd.f32 %v6467_v44, %v2593_v53 }
 0x332   : > { %v5354_v57 = vpop.eup %5353  ;;  %5373 = vrcp.f32 %v2798_v23  ;;  %v2713_v41 = vsub.f32 0.0, %v2599_v52  ;;  %2042 = vrot.lane.b32.xlu0 %v5352_v54, %s5622_s19  ;;  %2044 = vrot.lane.b32.xlu1 %v5344_v20, %s5622_s19 }
 0x333   : > { %v5356_v34 = vpop.eup %5355  ;;  %5375 = vrcp.f32 %v2801_v55  ;;  %v2712_v58 = vsub.f32 0.0, %v2594_v24  ;;  %v4904_v59 = vpop.f32.mrb[76].mxu0 }
 0x334   : > { %v5358_v25 = vpop.eup %5357  ;;  %v2800_v60 = vadd.f32 1.0, %v5356_v34  ;;  %5377 = vpow2.f32 %v2752_v51  ;;  %v2756_v35 = vmul.f32 1.442695, %v2713_v41  ;;  %v2609_v61 = vadd.f32 %v6467_v44, %v4904_v59  ;;  %v2603_v45 = vpop.f32.mrb[77].mxu0 }
 0x335   : > { %v5360_v62 = vpop.eup %5359  ;;  %v2803_v63 = vadd.f32 1.0, %v5358_v25  ;;  %5379 = vpow2.f32 %v2750_v56  ;;  %v2754_v0 = vmul.f32 1.442695, %v2712_v58  ;;  %v2604_v26 = vadd.f32 %v6467_v44, %v2603_v45 }
 0x336   : > { %v5362_v2 = vpop.eup %5361  ;;  %5381 = vrcp.f32 %v2800_v60  ;;  %v2715_v1 = vsub.f32 0.0, %v2609_v61  ;;  %2046 = vrot.lane.b32.xlu0 %v5360_v62, %s5622_s19  ;;  %2048 = vrot.lane.b32.xlu1 %v5354_v57, %s5622_s19 }
 0x337   : > { %v5364_v36 = vpop.eup %5363  ;;  %5383 = vrcp.f32 %v2803_v63  ;;  %v2714_v3 = vsub.f32 0.0, %v2604_v26  ;;  %v4907_v27 = vpop.f32.mrb[78].mxu0 }
 0x338   : > { %v5366_v8 = vpop.eup %5365  ;;  %v2802_v9 = vadd.f32 1.0, %v5364_v36  ;;  %5385 = vpow2.f32 %v2756_v35  ;;  %v2760_v37 = vmul.f32 1.442695, %v2715_v1  ;;  %v2619_v10 = vadd.f32 %v6467_v44, %v4907_v27  ;;  %v2613_v11 = vpop.f32.mrb[79].mxu0 }
 0x339   : > { %v5368_v12 = vpop.eup %5367  ;;  %v2805_v13 = vadd.f32 1.0, %v5366_v8  ;;  %5387 = vpow2.f32 %v2754_v0  ;;  %v2614_v28 = vadd.f32 %v6467_v44, %v2613_v11  ;;  %v2758_v15 = vmul.f32 1.442695, %v2714_v3 }
 0x33a   : > { %v5370_v14 = vpop.eup %5369  ;;  %5389 = vrcp.f32 %v2802_v9  ;;  %v2717_v16 = vsub.f32 0.0, %v2619_v10  ;;  %2050 = vrot.lane.b32.xlu0 %v5368_v12, %s5622_s19  ;;  %2052 = vrot.lane.b32.xlu1 %v5362_v2, %s5622_s19 }
 0x33b   : > { %v5372_v29 = vpop.eup %5371  ;;  %5391 = vrcp.f32 %v2805_v13  ;;  %v2804_v38 = vadd.f32 1.0, %v5370_v14  ;;  %v2716_v4 = vsub.f32 0.0, %v2614_v28  ;;  %v4910_v17 = vpop.f32.mrb[80].mxu0 }
 0x33c   : > { %v5374_v5 = vpop.eup %5373  ;;  %5393 = vpow2.f32 %v2760_v37  ;;  %v2764_v30 = vmul.f32 1.442695, %v2717_v16  ;;  %v2629_v18 = vadd.f32 %v6467_v44, %v4910_v17  ;;  %v2623_v19 = vpop.f32.mrb[81].mxu0 }
 0x33d   : > { %v5376_v6 = vpop.eup %5375  ;;  %5395 = vrcp.f32 %v2804_v38  ;;  %v2762_v39 = vmul.f32 1.442695, %v2716_v4  ;;  %v2624_v31 = vadd.f32 %v6467_v44, %v2623_v19 }
 0x33e   : > { %v5378_v40 = vpop.eup %5377  ;;  %5397 = vpow2.f32 %v2758_v15  ;;  %v2719_v42 = vsub.f32 0.0, %v2629_v18  ;;  %2926 = vrot.lane.b32.xlu0 %v5374_v5, %s5623_s21  ;;  %2928 = vrot.lane.b32.xlu1 %v5372_v29, %s5623_s21 }
 0x33f   : > { %v5380_v43 = vpop.eup %5379  ;;  %v2807_v20 = vadd.f32 1.0, %v5378_v40  ;;  %5399 = vpow2.f32 %v2764_v30  ;;  %v2718_v21 = vsub.f32 0.0, %v2624_v31  ;;  %v4913_v46 = vpop.f32.mrb[82].mxu0 }
 0x340   : > { %v5382_v47 = vpop.eup %5381  ;;  %v2806_v48 = vadd.f32 1.0, %v5380_v43  ;;  %5401 = vpow2.f32 %v2762_v39  ;;  %v2768_v32 = vmul.f32 1.442695, %v2719_v42  ;;  %v2639_v7 = vadd.f32 %v6467_v44, %v4913_v46  ;;  %v2633_v49 = vpop.f32.mrb[83].mxu0  ;;  %v6569_v43 = vld [vmem:[#allocation2] ss:$0 sm:$0xff] }
 0x341   : > { %v5384_v50 = vpop.eup %5383  ;;  %5403 = vrcp.f32 %v2807_v20  ;;  %v2766_v22 = vmul.f32 1.442695, %v2718_v21  ;;  %v2634_v33 = vadd.f32 %v6467_v44, %v2633_v49 }
 0x342   : > { %v5386_v23 = vpop.eup %5385  ;;  %5405 = vrcp.f32 %v2806_v48  ;;  %v2721_v51 = vsub.f32 0.0, %v2639_v7  ;;  %2930 = vrot.lane.b32.xlu0 %v5382_v47, %s5623_s21  ;;  %2932 = vrot.lane.b32.xlu1 %v5376_v6, %s5623_s21 }
 0x343   : > { %v5388_v52 = vpop.eup %5387  ;;  %v2809_v53 = vadd.f32 1.0, %v5386_v23  ;;  %5407 = vpow2.f32 %v2768_v32  ;;  %v2720_v54 = vsub.f32 0.0, %v2634_v33  ;;  %v4916_v55 = vpop.f32.mrb[84].mxu0 }
 0x344   : > { %v5390_v56 = vpop.eup %5389  ;;  %v2808_v24 = vadd.f32 1.0, %v5388_v52  ;;  %5409 = vpow2.f32 %v2766_v22  ;;  %v2772_v57 = vmul.f32 1.442695, %v2721_v51  ;;  %v2649_v41 = vadd.f32 %v6467_v44, %v4916_v55  ;;  %v2643_v34 = vpop.f32.mrb[85].mxu0 }
 0x345   : > { %v5392_v58 = vpop.eup %5391  ;;  %5411 = vrcp.f32 %v2809_v53  ;;  %v2770_v59 = vmul.f32 1.442695, %v2720_v54  ;;  %v2644_v25 = vadd.f32 %v6467_v44, %v2643_v34 }
 0x346   : > { %v5394_v60 = vpop.eup %5393  ;;  %5413 = vrcp.f32 %v2808_v24  ;;  %v2723_v35 = vsub.f32 0.0, %v2649_v41  ;;  %2934 = vrot.lane.b32.xlu0 %v5390_v56, %s5623_s21  ;;  %2936 = vrot.lane.b32.xlu1 %v5384_v50, %s5623_s21 }
 0x347   : > { %v5396_v61 = vpop.eup %5395  ;;  %v2811_v45 = vadd.f32 1.0, %v5394_v60  ;;  %5415 = vpow2.f32 %v2772_v57  ;;  %v2722_v62 = vsub.f32 0.0, %v2644_v25  ;;  %v4919_v63 = vpop.f32.mrb[86].mxu0 }
 0x348   : > { %v5398_v0 = vpop.eup %5397  ;;  %5417 = vpow2.f32 %v2770_v59  ;;  %v2776_v26 = vmul.f32 1.442695, %v2723_v35  ;;  %v2659_v2 = vadd.f32 %v6467_v44, %v4919_v63  ;;  %v2653_v1 = vpop.f32.mrb[87].mxu0 }
 0x349   : > { %v5400_v36 = vpop.eup %5399  ;;  %5419 = vrcp.f32 %v2811_v45  ;;  %v2810_v3 = vadd.f32 1.0, %v5398_v0  ;;  %v2654_v27 = vadd.f32 %v6467_v44, %v2653_v1  ;;  %v2774_v37 = vmul.f32 1.442695, %v2722_v62 }
 0x34a   : > { %v5402_v8 = vpop.eup %5401  ;;  %v2813_v9 = vadd.f32 1.0, %v5400_v36  ;;  %5421 = vpow2.f32 %v2776_v26  ;;  %v2725_v10 = vsub.f32 0.0, %v2659_v2  ;;  %2938 = vrot.lane.b32.xlu0 %v5396_v61, %s5623_s21  ;;  %2940 = vrot.lane.b32.xlu1 %v5392_v58, %s5623_s21 }
 0x34b   : > { %v5404_v11 = vpop.eup %5403  ;;  %5423 = vrcp.f32 %v2810_v3  ;;  %v2812_v12 = vadd.f32 1.0, %v5402_v8  ;;  %v2724_v13 = vsub.f32 0.0, %v2654_v27  ;;  %v4922_v28 = vpop.f32.mrb[88].mxu0 }
 0x34c   : > { %v5406_v14 = vpop.eup %5405  ;;  %5425 = vrcp.f32 %v2813_v9  ;;  %v2780_v15 = vmul.f32 1.442695, %v2725_v10  ;;  %v2669_v16 = vadd.f32 %v6467_v44, %v4922_v28  ;;  %v2663_v29 = vpop.f32.mrb[89].mxu0 }
 0x34d   : > { %v5408_v38 = vpop.eup %5407  ;;  %5427 = vrcp.f32 %v2812_v12  ;;  %v2664_v4 = vadd.f32 %v6467_v44, %v2663_v29  ;;  %v2778_v30 = vmul.f32 1.442695, %v2724_v13 }
 0x34e   : > { %v5410_v17 = vpop.eup %5409  ;;  %v2815_v5 = vadd.f32 1.0, %v5408_v38  ;;  %5429 = vpow2.f32 %v2774_v37  ;;  %v2727_v18 = vsub.f32 0.0, %v2669_v16  ;;  %2942 = vrot.lane.b32.xlu0 %v5406_v14, %s5623_s21  ;;  %2944 = vrot.lane.b32.xlu1 %v5404_v11, %s5623_s21 }
 0x34f   : > { %v5412_v19 = vpop.eup %5411  ;;  %v2814_v6 = vadd.f32 1.0, %v5410_v17  ;;  %5431 = vpow2.f32 %v2780_v15  ;;  %v2726_v39 = vsub.f32 0.0, %v2664_v4  ;;  %v4925_v31 = vpop.f32.mrb[90].mxu0 }
 0x350   : > { %v5414_v40 = vpop.eup %5413  ;;  %5433 = vrcp.f32 %v2815_v5  ;;  %v2784_v42 = vmul.f32 1.442695, %v2727_v18  ;;  %v2679_v44 = vadd.f32 %v6569_v43, %v4925_v31  ;;  %v2673_v20 = vpop.f32.mrb[91].mxu0 }
 0x351   : > { %v5416_v21 = vpop.eup %5415  ;;  %5435 = vrcp.f32 %v2814_v6  ;;  %v2674_v46 = vadd.f32 %v6569_v43, %v2673_v20  ;;  %v2782_v32 = vmul.f32 1.442695, %v2726_v39 }
 0x352   : > { %v5418_v47 = vpop.eup %5417  ;;  %v2817_v48 = vadd.f32 1.0, %v5416_v21  ;;  %5437 = vpow2.f32 %v2778_v30  ;;  %v2729_v7 = vsub.f32 0.0, %v2679_v44  ;;  %2946 = vrot.lane.b32.xlu0 %v5414_v40, %s5623_s21  ;;  %2948 = vrot.lane.b32.xlu1 %v5412_v19, %s5623_s21 }
 0x353   : > { %v5420_v49 = vpop.eup %5419  ;;  %v2816_v50 = vadd.f32 1.0, %v5418_v47  ;;  %5439 = vpow2.f32 %v2784_v42  ;;  %v2728_v22 = vsub.f32 0.0, %v2674_v46  ;;  %v4928_v33 = vpop.f32.mrb[92].mxu0 }
 0x354   : > { %v5422_v23 = vpop.eup %5421  ;;  %5441 = vrcp.f32 %v2817_v48  ;;  %v2788_v51 = vmul.f32 1.442695, %v2729_v7  ;;  %v2689_v52 = vadd.f32 %v6569_v43, %v4928_v33  ;;  %v2683_v53 = vpop.f32.mrb[93].mxu0 }
 0x355   : > { %v5424_v54 = vpop.eup %5423  ;;  %5443 = vrcp.f32 %v2816_v50  ;;  %v2819_v55 = vadd.f32 1.0, %v5422_v23  ;;  %v2786_v56 = vmul.f32 1.442695, %v2728_v22  ;;  %v2684_v24 = vadd.f32 %v6569_v43, %v2683_v53 }
 0x356   : > { %v5426_v57 = vpop.eup %5425  ;;  %5445 = vpow2.f32 %v2782_v32  ;;  %v2731_v41 = vsub.f32 0.0, %v2689_v52  ;;  %2950 = vrot.lane.b32.xlu0 %v5424_v54, %s5623_s21  ;;  %2952 = vrot.lane.b32.xlu1 %v5420_v49, %s5623_s21 }
 0x357   : > { %v5428_v34 = vpop.eup %5427  ;;  %5447 = vrcp.f32 %v2819_v55  ;;  %v2730_v58 = vsub.f32 0.0, %v2684_v24  ;;  %v4931_v59 = vpop.f32.mrb[94].mxu0 }
 0x358   : > { %v5430_v25 = vpop.eup %5429  ;;  %5449 = vpow2.f32 %v2788_v51  ;;  %v2792_v60 = vmul.f32 1.442695, %v2731_v41  ;;  %v2699_v35 = vadd.f32 %v6569_v43, %v4931_v59  ;;  %v2693_v61 = vpop.f32.mrb[95].mxu0 }
 0x359   : > { %v5432_v45 = vpop.eup %5431  ;;  %v2818_v62 = vadd.f32 1.0, %v5430_v25  ;;  %5451 = vpow2.f32 %v2786_v56  ;;  %v2790_v63 = vmul.f32 1.442695, %v2730_v58  ;;  %v2694_v0 = vadd.f32 %v6569_v43, %v2693_v61 }
 0x35a   : > { %v5434_v26 = vpop.eup %5433  ;;  %v2821_v2 = vadd.f32 1.0, %v5432_v45  ;;  %5453 = vpow2.f32 %v2792_v60  ;;  %v2733_v1 = vsub.f32 0.0, %v2699_v35  ;;  %2954 = vrot.lane.b32.xlu0 %v5428_v34, %s5623_s21  ;;  %2956 = vrot.lane.b32.xlu1 %v5426_v57, %s5623_s21 }
 0x35b   : > { %v5436_v36 = vpop.eup %5435  ;;  %5455 = vrcp.f32 %v2818_v62  ;;  %v2732_v3 = vsub.f32 0.0, %v2694_v0  ;;  %v4994_v27 = vpop.f32.mrb[96].mxu0 }
 0x35c   : > { %v5438_v8 = vpop.eup %5437  ;;  %5457 = vrcp.f32 %v2821_v2  ;;  %v2796_v9 = vmul.f32 1.442695, %v2733_v1  ;;  %v3485_v37 = vadd.f32 %v6569_v43, %v4994_v27  ;;  %v3479_v10 = vpop.f32.mrb[97].mxu0 }
 0x35d   : > { %v5440_v11 = vpop.eup %5439  ;;  %v2820_v12 = vadd.f32 1.0, %v5438_v8  ;;  %5459 = vpow2.f32 %v2790_v63  ;;  %v2794_v13 = vmul.f32 1.442695, %v2732_v3  ;;  %v3480_v28 = vadd.f32 %v6569_v43, %v3479_v10 }
 0x35e   : > { %v5442_v14 = vpop.eup %5441  ;;  %v2823_v15 = vadd.f32 1.0, %v5440_v11  ;;  %5461 = vpow2.f32 %v2796_v9  ;;  %v3639_v16 = vsub.f32 0.0, %v3485_v37  ;;  %2958 = vrot.lane.b32.xlu0 %v5436_v36, %s5623_s21  ;;  %2960 = vrot.lane.b32.xlu1 %v5434_v26, %s5623_s21 }
 0x35f   : > { %v5444_v29 = vpop.eup %5443  ;;  %5463 = vrcp.f32 %v2820_v12  ;;  %v3638_v38 = vsub.f32 0.0, %v3480_v28  ;;  %v4997_v4 = vpop.f32.mrb[98].mxu0 }
 0x360   : > { %v5446_v17 = vpop.eup %5445  ;;  %5465 = vrcp.f32 %v2823_v15  ;;  %v3672_v5 = vmul.f32 1.442695, %v3639_v16  ;;  %v3495_v30 = vadd.f32 %v6569_v43, %v4997_v4  ;;  %v3489_v18 = vpop.f32.mrb[99].mxu0 }
 0x361   : > { %v5448_v19 = vpop.eup %5447  ;;  %v2822_v6 = vadd.f32 1.0, %v5446_v17  ;;  %5467 = vpow2.f32 %v2794_v13  ;;  %v3670_v39 = vmul.f32 1.442695, %v3638_v38  ;;  %v3490_v31 = vadd.f32 %v6569_v43, %v3489_v18 }
 0x362   : > { %v5450_v40 = vpop.eup %5449  ;;  %5469 = vpow2.f32 %v3672_v5  ;;  %v3641_v42 = vsub.f32 0.0, %v3495_v30  ;;  %2962 = vrot.lane.b32.xlu0 %v5444_v29, %s5623_s21  ;;  %2964 = vrot.lane.b32.xlu1 %v5442_v14, %s5623_s21 }
 0x363   : > { %v5452_v44 = vpop.eup %5451  ;;  %5471 = vrcp.f32 %v2822_v6  ;;  %v2825_v20 = vadd.f32 1.0, %v5450_v40  ;;  %v3640_v21 = vsub.f32 0.0, %v3490_v31  ;;  %v5000_v46 = vpop.f32.mrb[100].mxu0 }
 0x364   : > { %v5454_v47 = vpop.eup %5453  ;;  %v2824_v48 = vadd.f32 1.0, %v5452_v44  ;;  %5473 = vpow2.f32 %v3670_v39  ;;  %v3676_v32 = vmul.f32 1.442695, %v3641_v42  ;;  %v3505_v7 = vadd.f32 %v6569_v43, %v5000_v46  ;;  %v3499_v49 = vpop.f32.mrb[101].mxu0 }
 0x365   : > { %v5456_v50 = vpop.eup %5455  ;;  %5475 = vrcp.f32 %v2825_v20  ;;  %v2827_v22 = vadd.f32 1.0, %v5454_v47  ;;  %v3674_v33 = vmul.f32 1.442695, %v3640_v21  ;;  %v3500_v23 = vadd.f32 %v6569_v43, %v3499_v49 }
 0x366   : > { %v5458_v51 = vpop.eup %5457  ;;  %5477 = vrcp.f32 %v2824_v48  ;;  %v3643_v52 = vsub.f32 0.0, %v3505_v7  ;;  %2966 = vrot.lane.b32.xlu0 %v5456_v50, %s5623_s21  ;;  %2968 = vrot.lane.b32.xlu1 %v5448_v19, %s5623_s21 }
 0x367   : > { %v5460_v53 = vpop.eup %5459  ;;  %5479 = vrcp.f32 %v2827_v22  ;;  %v3642_v54 = vsub.f32 0.0, %v3500_v23  ;;  %v5003_v55 = vpop.f32.mrb[102].mxu0 }
 0x368   : > { %v5462_v56 = vpop.eup %5461  ;;  %v2826_v24 = vadd.f32 1.0, %v5460_v53  ;;  %5481 = vpow2.f32 %v3676_v32  ;;  %v3680_v57 = vmul.f32 1.442695, %v3643_v52  ;;  %v3515_v41 = vadd.f32 %v6569_v43, %v5003_v55  ;;  %v3509_v34 = vpop.f32.mrb[103].mxu0 }
 0x369   : > { %v5464_v58 = vpop.eup %5463  ;;  %v2829_v59 = vadd.f32 1.0, %v5462_v56  ;;  %5483 = vpow2.f32 %v3674_v33  ;;  %v3678_v25 = vmul.f32 1.442695, %v3642_v54  ;;  %v3510_v60 = vadd.f32 %v6569_v43, %v3509_v34 }
 0x36a   : > { %v5466_v35 = vpop.eup %5465  ;;  %5485 = vrcp.f32 %v2826_v24  ;;  %v3645_v61 = vsub.f32 0.0, %v3515_v41  ;;  %2970 = vrot.lane.b32.xlu0 %v5464_v58, %s5623_s21  ;;  %2972 = vrot.lane.b32.xlu1 %v5458_v51, %s5623_s21 }
 0x36b   : > { %v5468_v45 = vpop.eup %5467  ;;  %5487 = vrcp.f32 %v2829_v59  ;;  %v3644_v62 = vsub.f32 0.0, %v3510_v60  ;;  %v5006_v63 = vpop.f32.mrb[104].mxu0 }
 0x36c   : > { %v5470_v0 = vpop.eup %5469  ;;  %v2828_v26 = vadd.f32 1.0, %v5468_v45  ;;  %5489 = vpow2.f32 %v3680_v57  ;;  %v3684_v2 = vmul.f32 1.442695, %v3645_v61  ;;  %v3525_v1 = vadd.f32 %v6569_v43, %v5006_v63  ;;  %v1993_v36 = vpop.permute.xlu0 %1992 }
 0x36d   : > { %v3519_v3 = vpop.f32.mrb[105].mxu0  ;;  %v5472_v27 = vpop.eup %5471  ;;  %v3735_v8 = vadd.f32 1.0, %v5470_v0  ;;  %5491 = vpow2.f32 %v3678_v25  ;;  %2088 = vst.msk [vmem:[%s6169_s18 + $0x8] sm:$0xff] %vm2086_vm3, %v1993_v36  ;;  %v3682_v10 = vmul.f32 1.442695, %v3644_v62 }
 0x36e   : > { %v3520_v9 = vadd.f32 %v6569_v43, %v3519_v3  ;;  %v5474_v37 = vpop.eup %5473  ;;  %5493 = vrcp.f32 %v2828_v26  ;;  %v3647_v11 = vsub.f32 0.0, %v3525_v1  ;;  %2974 = vrot.lane.b32.xlu0 %v5472_v27, %s5623_s21  ;;  %2976 = vrot.lane.b32.xlu1 %v5466_v35, %s5623_s21 }
 0x36f   : > { %v5476_v12 = vpop.eup %5475  ;;  %5495 = vrcp.f32 %v3735_v8  ;;  %v3734_v13 = vadd.f32 1.0, %v5474_v37  ;;  %v5009_v14 = vpop.f32.mrb[106].mxu0 }
 0x370   : > { %v3646_v28 = vsub.f32 0.0, %v3520_v9  ;;  %v5478_v15 = vpop.eup %5477  ;;  %5497 = vpow2.f32 %v3684_v2  ;;  %v3688_v16 = vmul.f32 1.442695, %v3647_v11  ;;  %v3535_v29 = vadd.f32 %v6569_v43, %v5009_v14  ;;  %v1997_v38 = vpop.permute.xlu1 %1996 }
 0x371   : > { %v3529_v4 = vpop.f32.mrb[107].mxu0  ;;  %v5480_v17 = vpop.eup %5479  ;;  %5499 = vrcp.f32 %v3734_v13  ;;  %2090 = vst.msk [vmem:[%s6169_s18 + $0x18] sm:$0xff] %vm2086_vm3, %v1997_v38 }
 0x372   : > { %v3686_v5 = vmul.f32 1.442695, %v3646_v28  ;;  %v3530_v30 = vadd.f32 %v6569_v43, %v3529_v4  ;;  %v1991_v18 = vpop.permute.xlu0 %1990  ;;  %v5482_v19 = vpop.eup %5481  ;;  %5501 = vpow2.f32 %v3682_v10  ;;  %v3649_v6 = vsub.f32 0.0, %v3535_v29  ;;  %2978 = vrot.lane.b32.xlu0 %v5478_v15, %s5623_s21  ;;  %2980 = vrot.lane.b32.xlu1 %v5476_v12, %s5623_s21 }
 0x373   : > { %2087 = vst.msk [vmem:[%s6169_s18] sm:$0xff] %vm2086_vm3, %v1991_v18  ;;  %v5484_v39 = vpop.eup %5483  ;;  %v3737_v31 = vadd.f32 1.0, %v5482_v19  ;;  %5503 = vpow2.f32 %v3688_v16  ;;  %v5012_v42 = vpop.f32.mrb[108].mxu0 }
 0x374   : > { %v3648_v40 = vsub.f32 0.0, %v3530_v30  ;;  %v5486_v44 = vpop.eup %5485  ;;  %v3736_v20 = vadd.f32 1.0, %v5484_v39  ;;  %5505 = vpow2.f32 %v3686_v5  ;;  %v3692_v21 = vmul.f32 1.442695, %v3649_v6  ;;  %v3539_v47 = vpop.f32.mrb[109].mxu0 }
 0x375   : > { %v3545_v46 = vadd.f32 %v6569_v43, %v5012_v42  ;;  %v1995_v48 = vpop.permute.xlu1 %1994  ;;  %v5488_v32 = vpop.eup %5487  ;;  %5507 = vrcp.f32 %v3737_v31  ;;  %v3540_v49 = vadd.f32 %v6569_v43, %v3539_v47 }
 0x376   : > { %v3690_v7 = vmul.f32 1.442695, %v3648_v40  ;;  %2089 = vst.msk [vmem:[%s6169_s18 + $0x10] sm:$0xff] %vm2086_vm3, %v1995_v48  ;;  %v1999_v50 = vpop.permute.xlu0 %1998  ;;  %v5490_v22 = vpop.eup %5489  ;;  %5509 = vrcp.f32 %v3736_v20  ;;  %2982 = vrot.lane.b32.xlu0 %v5486_v44, %s5623_s21  ;;  %2984 = vrot.lane.b32.xlu1 %v5480_v17, %s5623_s21 }
 0x377   : > { %v3651_v33 = vsub.f32 0.0, %v3545_v46  ;;  %2091 = vst.msk [vmem:[%s6169_s18 + $0x20] sm:$0xff] %vm2086_vm3, %v1999_v50  ;;  %v5492_v23 = vpop.eup %5491  ;;  %v3739_v51 = vadd.f32 1.0, %v5490_v22  ;;  %5511 = vpow2.f32 %v3692_v21  ;;  %v3650_v52 = vsub.f32 0.0, %v3540_v49  ;;  %v5015_v53 = vpop.f32.mrb[110].mxu0 }
 0x378   : > { %v5494_v54 = vpop.eup %5493  ;;  %v3738_v55 = vadd.f32 1.0, %v5492_v23  ;;  %5513 = vpow2.f32 %v3690_v7  ;;  %v3555_v24 = vadd.f32 %v6569_v43, %v5015_v53  ;;  %v3549_v57 = vpop.f32.mrb[111].mxu0 }
 0x379   : > { %v3696_v56 = vmul.f32 1.442695, %v3651_v33  ;;  %v2001_v41 = vpop.permute.xlu1 %2000  ;;  %v5496_v34 = vpop.eup %5495  ;;  %5515 = vrcp.f32 %v3739_v51  ;;  %v3694_v58 = vmul.f32 1.442695, %v3650_v52  ;;  %v3550_v59 = vadd.f32 %v6569_v43, %v3549_v57 }
 0x37a   : > { %2092 = vst.msk [vmem:[%s6169_s18 + $0x28] sm:$0xff] %vm2086_vm3, %v2001_v41  ;;  %v5498_v25 = vpop.eup %5497  ;;  %5517 = vrcp.f32 %v3738_v55  ;;  %v3653_v60 = vsub.f32 0.0, %v3555_v24  ;;  %2986 = vrot.lane.b32.xlu0 %v5494_v54, %s5623_s21  ;;  %2988 = vrot.lane.b32.xlu1 %v5488_v32, %s5623_s21 }
 0x37b   : > { %v5500_v35 = vpop.eup %5499  ;;  %v3741_v61 = vadd.f32 1.0, %v5498_v25  ;;  %5519 = vpow2.f32 %v3696_v56  ;;  %v3652_v45 = vsub.f32 0.0, %v3550_v59  ;;  %v2003_v62 = vpop.permute.xlu0 %2002 }
 0x37c   : > { %v5018_v63 = vpop.f32.mrb[112].mxu0  ;;  %v5502_v0 = vpop.eup %5501  ;;  %5521 = vpow2.f32 %v3694_v58  ;;  %v3700_v26 = vmul.f32 1.442695, %v3653_v60  ;;  %2093 = vst.msk [vmem:[%s6169_s18 + $0x30] sm:$0xff] %vm2086_vm3, %v2003_v62 }
 0x37d   : > { %v3565_v2 = vadd.f32 %v6569_v43, %v5018_v63  ;;  %v3559_v1 = vpop.f32.mrb[113].mxu0  ;;  %v2005_v36 = vpop.permute.xlu1 %2004  ;;  %5523 = vrcp.f32 %v3741_v61  ;;  %v3740_v27 = vadd.f32 1.0, %v5502_v0  ;;  %v3698_v10 = vmul.f32 1.442695, %v3652_v45 }
 0x37e   : > { %v5504_v3 = vpop.eup %5503  ;;  %v3560_v8 = vadd.f32 %v6569_v43, %v3559_v1  ;;  %2094 = vst.msk [vmem:[%s6169_s18 + $0x38] sm:$0xff] %vm2086_vm3, %v2005_v36  ;;  %5525 = vpow2.f32 %v3700_v26  ;;  %3862 = vrot.lane.b32.xlu0 %v5500_v35, %s5624_s22  ;;  %3864 = vrot.lane.b32.xlu1 %v5496_v34, %s5624_s22 }
 0x37f   : > { %v5506_v9 = vpop.eup %5505  ;;  %v3743_v37 = vadd.f32 1.0, %v5504_v3  ;;  %v3655_v11 = vsub.f32 0.0, %v3565_v2  ;;  %5527 = vrcp.f32 %v3740_v27  ;;  %v2007_v14 = vpop.permute.xlu0 %2006 }
 0x380   : > { %v5508_v12 = vpop.eup %5507  ;;  %v3742_v13 = vadd.f32 1.0, %v5506_v9  ;;  %v3654_v28 = vsub.f32 0.0, %v3560_v8  ;;  %v5021_v15 = vpop.f32.mrb[114].mxu0  ;;  %2095 = vst.msk [vmem:[%s6169_s18 + $0x40] sm:$0xff] %vm2086_vm3, %v2007_v14 }
 0x381   : > { %v5510_v16 = vpop.eup %5509  ;;  %5529 = vrcp.f32 %v3743_v37  ;;  %v3704_v29 = vmul.f32 1.442695, %v3655_v11  ;;  %v3575_v38 = vadd.f32 %v6569_v43, %v5021_v15  ;;  %v3569_v4 = vpop.f32.mrb[115].mxu0 }
 0x382   : > { %v2009_v17 = vpop.permute.xlu1 %2008  ;;  %v5512_v5 = vpop.eup %5511  ;;  %5531 = vrcp.f32 %v3742_v13  ;;  %v3570_v30 = vadd.f32 %v6569_v43, %v3569_v4  ;;  %v3702_v6 = vmul.f32 1.442695, %v3654_v28  ;;  %3866 = vrot.lane.b32.xlu0 %v5510_v16, %s5624_s22  ;;  %3868 = vrot.lane.b32.xlu1 %v5508_v12, %s5624_s22 }
 0x383   : > { %2096 = vst.msk [vmem:[%s6169_s18 + $0x48] sm:$0xff] %vm2086_vm3, %v2009_v17  ;;  %v5514_v18 = vpop.eup %5513  ;;  %v3745_v19 = vadd.f32 1.0, %v5512_v5  ;;  %5533 = vpow2.f32 %v3698_v10  ;;  %v3657_v39 = vsub.f32 0.0, %v3575_v38  ;;  %v2011_v44 = vpop.permute.xlu0 %2010 }
 0x384   : > { %v5516_v31 = vpop.eup %5515  ;;  %v3744_v40 = vadd.f32 1.0, %v5514_v18  ;;  %5535 = vpow2.f32 %v3704_v29  ;;  %v3656_v42 = vsub.f32 0.0, %v3570_v30  ;;  %v5024_v20 = vpop.f32.mrb[116].mxu0  ;;  %2097 = vst.msk [vmem:[%s6169_s18 + $0x50] sm:$0xff] %vm2086_vm3, %v2011_v44 }
 0x385   : > { %v5518_v21 = vpop.eup %5517  ;;  %5537 = vrcp.f32 %v3745_v19  ;;  %v3708_v46 = vmul.f32 1.442695, %v3657_v39  ;;  %v3585_v47 = vadd.f32 %v6569_v43, %v5024_v20  ;;  %v3579_v48 = vpop.f32.mrb[117].mxu0 }
 0x386   : > { %v2013_v32 = vpop.permute.xlu1 %2012  ;;  %v5520_v7 = vpop.eup %5519  ;;  %5539 = vrcp.f32 %v3744_v40  ;;  %v3580_v49 = vadd.f32 %v6569_v43, %v3579_v48  ;;  %v3706_v33 = vmul.f32 1.442695, %v3656_v42  ;;  %3870 = vrot.lane.b32.xlu0 %v5518_v21, %s5624_s22  ;;  %3872 = vrot.lane.b32.xlu1 %v5516_v31, %s5624_s22 }
 0x387   : > { %2098 = vst.msk [vmem:[%s6169_s18 + $0x58] sm:$0xff] %vm2086_vm3, %v2013_v32  ;;  %v5522_v50 = vpop.eup %5521  ;;  %v3747_v22 = vadd.f32 1.0, %v5520_v7  ;;  %5541 = vpow2.f32 %v3702_v6  ;;  %v3659_v23 = vsub.f32 0.0, %v3585_v47  ;;  %v2015_v54 = vpop.permute.xlu0 %2014 }
 0x388   : > { %v5524_v51 = vpop.eup %5523  ;;  %v3746_v52 = vadd.f32 1.0, %v5522_v50  ;;  %5543 = vpow2.f32 %v3708_v46  ;;  %v3658_v53 = vsub.f32 0.0, %v3580_v49  ;;  %v5027_v55 = vpop.f32.mrb[118].mxu0  ;;  %2099 = vst.msk [vmem:[%s6169_s18 + $0x60] sm:$0xff] %vm2086_vm3, %v2015_v54 }
 0x389   : > { %v5526_v56 = vpop.eup %5525  ;;  %5545 = vrcp.f32 %v3747_v22  ;;  %v3712_v24 = vmul.f32 1.442695, %v3659_v23  ;;  %v3595_v57 = vadd.f32 %v6569_v43, %v5027_v55  ;;  %v3589_v41 = vpop.f32.mrb[119].mxu0 }
 0x38a   : > { %v2017_v34 = vpop.permute.xlu1 %2016  ;;  %v5528_v58 = vpop.eup %5527  ;;  %5547 = vrcp.f32 %v3746_v52  ;;  %v3749_v59 = vadd.f32 1.0, %v5526_v56  ;;  %v3710_v25 = vmul.f32 1.442695, %v3658_v53  ;;  %v3590_v60 = vadd.f32 %v6569_v43, %v3589_v41  ;;  %3876 = vrot.lane.b32.xlu1 %v5524_v51, %s5624_s22 }
 0x38b   : > { %2100 = vst.msk [vmem:[%s6169_s18 + $0x68] sm:$0xff] %vm2086_vm3, %v2017_v34  ;;  %v5530_v35 = vpop.eup %5529  ;;  %5549 = vpow2.f32 %v3706_v33  ;;  %v3661_v61 = vsub.f32 0.0, %v3595_v57  ;;  %3874 = vrot.lane.b32.xlu0 %v5528_v58, %s5624_s22  ;;  %v2019_v63 = vpop.permute.xlu0 %2018 }
 0x38c   : > { %v5532_v45 = vpop.eup %5531  ;;  %5551 = vrcp.f32 %v3749_v59  ;;  %v3660_v62 = vsub.f32 0.0, %v3590_v60  ;;  %v5030_v0 = vpop.f32.mrb[120].mxu0  ;;  %2101 = vst.msk [vmem:[%s6169_s18 + $0x70] sm:$0xff] %vm2086_vm3, %v2019_v63 }
 0x38d   : > { %v5534_v26 = vpop.eup %5533  ;;  %5553 = vpow2.f32 %v3712_v24  ;;  %v3716_v2 = vmul.f32 1.442695, %v3661_v61  ;;  %v3605_v1 = vadd.f32 %v6569_v43, %v5030_v0  ;;  %v3599_v36 = vpop.f32.mrb[121].mxu0 }
 0x38e   : > { %v2021_v3 = vpop.permute.xlu1 %2020  ;;  %v5536_v27 = vpop.eup %5535  ;;  %v3748_v8 = vadd.f32 1.0, %v5534_v26  ;;  %5555 = vpow2.f32 %v3710_v25  ;;  %v3714_v9 = vmul.f32 1.442695, %v3660_v62  ;;  %v3600_v37 = vadd.f32 %v6569_v43, %v3599_v36  ;;  %3880 = vrot.lane.b32.xlu1 %v5530_v35, %s5624_s22 }
 0x38f   : > { %2102 = vst.msk [vmem:[%s6169_s18 + $0x78] sm:$0xff] %vm2086_vm3, %v2021_v3  ;;  %v5538_v10 = vpop.eup %5537  ;;  %v3751_v11 = vadd.f32 1.0, %v5536_v27  ;;  %5557 = vpow2.f32 %v3716_v2  ;;  %v3663_v12 = vsub.f32 0.0, %v3605_v1  ;;  %3878 = vrot.lane.b32.xlu0 %v5532_v45, %s5624_s22  ;;  %v2023_v14 = vpop.permute.xlu0 %2022 }
 0x390   : > { %v5540_v13 = vpop.eup %5539  ;;  %5559 = vrcp.f32 %v3748_v8  ;;  %v3662_v28 = vsub.f32 0.0, %v3600_v37  ;;  %v5033_v15 = vpop.f32.mrb[122].mxu0  ;;  %2103 = vst.msk [vmem:[%s6169_s18 + $0x80] sm:$0xff] %vm2086_vm3, %v2023_v14 }
 0x391   : > { %v5542_v16 = vpop.eup %5541  ;;  %5561 = vrcp.f32 %v3751_v11  ;;  %v3720_v29 = vmul.f32 1.442695, %v3663_v12  ;;  %v3615_v38 = vadd.f32 %v6569_v43, %v5033_v15  ;;  %v3609_v4 = vpop.f32.mrb[123].mxu0 }
 0x392   : > { %v2025_v17 = vpop.permute.xlu1 %2024  ;;  %v5544_v5 = vpop.eup %5543  ;;  %v3750_v30 = vadd.f32 1.0, %v5542_v16  ;;  %5563 = vpow2.f32 %v3714_v9  ;;  %v3718_v18 = vmul.f32 1.442695, %v3662_v28  ;;  %v3610_v19 = vadd.f32 %v6569_v43, %v3609_v4  ;;  %3884 = vrot.lane.b32.xlu1 %v5538_v10, %s5624_s22 }
 0x393   : > { %2104 = vst.msk [vmem:[%s6169_s18 + $0x88] sm:$0xff] %vm2086_vm3, %v2025_v17  ;;  %v5546_v6 = vpop.eup %5545  ;;  %v3753_v39 = vadd.f32 1.0, %v5544_v5  ;;  %5565 = vpow2.f32 %v3720_v29  ;;  %v3665_v31 = vsub.f32 0.0, %v3615_v38  ;;  %3882 = vrot.lane.b32.xlu0 %v5540_v13, %s5624_s22  ;;  %v5036_v44 = vpop.f32.mrb[124].mxu0 }
 0x394   : > { %v5548_v40 = vpop.eup %5547  ;;  %5567 = vrcp.f32 %v3750_v30  ;;  %v3664_v42 = vsub.f32 0.0, %v3610_v19  ;;  %v2027_v46 = vpop.permute.xlu0 %2026  ;;  %v3625_v47 = vadd.f32 %v6569_v43, %v5036_v44 }
 0x395   : > { %v5550_v20 = vpop.eup %5549  ;;  %5569 = vrcp.f32 %v3753_v39  ;;  %v3724_v21 = vmul.f32 1.442695, %v3665_v31  ;;  %v3619_v48 = vpop.f32.mrb[125].mxu0  ;;  %2105 = vst.msk [vmem:[%s6169_s18 + $0x90] sm:$0xff] %vm2086_vm3, %v2027_v46 }
 0x396   : > { %v5552_v32 = vpop.eup %5551  ;;  %v3752_v7 = vadd.f32 1.0, %v5550_v20  ;;  %5571 = vpow2.f32 %v3718_v18  ;;  %v3722_v49 = vmul.f32 1.442695, %v3664_v42  ;;  %v3620_v50 = vadd.f32 %v6569_v43, %v3619_v48  ;;  %v2029_v22 = vpop.permute.xlu1 %2028  ;;  %3888 = vrot.lane.b32.xlu1 %v5546_v6, %s5624_s22 }
 0x397   : > { %v5554_v33 = vpop.eup %5553  ;;  %5573 = vpow2.f32 %v3724_v21  ;;  %v3667_v23 = vsub.f32 0.0, %v3625_v47  ;;  %3886 = vrot.lane.b32.xlu0 %v5548_v40, %s5624_s22  ;;  %2106 = vst.msk [vmem:[%s6169_s18 + $0x98] sm:$0xff] %vm2086_vm3, %v2029_v22  ;;  %v5039_v54 = vpop.f32.mrb[126].mxu0 }
 0x398   : > { %v5556_v51 = vpop.eup %5555  ;;  %5575 = vrcp.f32 %v3752_v7  ;;  %v3755_v52 = vadd.f32 1.0, %v5554_v33  ;;  %v3666_v53 = vsub.f32 0.0, %v3620_v50  ;;  %v2031_v57 = vpop.permute.xlu0 %2030  ;;  %v3635_v41 = vadd.f32 %v6569_v43, %v5039_v54 }
 0x399   : > { %v5558_v55 = vpop.eup %5557  ;;  %v3754_v56 = vadd.f32 1.0, %v5556_v51  ;;  %5577 = vpow2.f32 %v3722_v49  ;;  %v3728_v24 = vmul.f32 1.442695, %v3667_v23  ;;  %v3629_v34 = vpop.f32.mrb[127].mxu0  ;;  %2107 = vst.msk [vmem:[%s6169_s18 + $0xa0] sm:$0xff] %vm2086_vm3, %v2031_v57 }
 0x39a   : > { %v5560_v58 = vpop.eup %5559  ;;  %v3726_v59 = vmul.f32 1.442695, %v3666_v53  ;;  %v3630_v25 = vadd.f32 %v6569_v43, %v3629_v34  ;;  %v2033_v60 = vpop.permute.xlu1 %2032  ;;  %v3669_v61 = vsub.f32 0.0, %v3635_v41  ;;  %3892 = vrot.lane.b32.xlu1 %v5552_v32, %s5624_s22  ;;  %v3757_v62 = vadd.f32 1.0, %v5558_v55 }
 0x39b   : > { %v5562_v35 = vpop.eup %5561  ;;  %5579 = vrcp.f32 %v3754_v56  ;;  %3890 = vrot.lane.b32.xlu0 %v5560_v58, %s5624_s22  ;;  %2108 = vst.msk [vmem:[%s6169_s18 + $0xa8] sm:$0xff] %vm2086_vm3, %v2033_v60 }
 0x39c   : > { %v5564_v45 = vpop.eup %5563  ;;  %5581 = vrcp.f32 %v3755_v52  ;;  %v3668_v63 = vsub.f32 0.0, %v3630_v25  ;;  %v3732_v43 = vmul.f32 1.442695, %v3669_v61  ;;  %v2035_v2 = vpop.permute.xlu0 %2034 }
 0x39d   : > { %v5566_v0 = vpop.eup %5565  ;;  %v3756_v26 = vadd.f32 1.0, %v5564_v45  ;;  %5583 = vpow2.f32 %v3728_v24  ;;  %2109 = vst.msk [vmem:[%s6169_s18 + $0xb0] sm:$0xff] %vm2086_vm3, %v2035_v2 }
 0x39e   : > { %v5568_v1 = vpop.eup %5567  ;;  %5585 = vpow2.f32 %v3726_v59  ;;  %v3730_v36 = vmul.f32 1.442695, %v3668_v63  ;;  %v2037_v3 = vpop.permute.xlu1 %2036  ;;  %3896 = vrot.lane.b32.xlu1 %v5562_v35, %s5624_s22  ;;  %v3759_v9 = vadd.f32 1.0, %v5566_v0 }
 0x39f   : > { %v5570_v27 = vpop.eup %5569  ;;  %5587 = vrcp.f32 %v3756_v26  ;;  %3894 = vrot.lane.b32.xlu0 %v5568_v1, %s5624_s22  ;;  %2110 = vst.msk [vmem:[%s6169_s18 + $0xb8] sm:$0xff] %vm2086_vm3, %v2037_v3 }
 0x3a0   : > { %v5572_v8 = vpop.eup %5571  ;;  %5589 = vrcp.f32 %v3757_v62  ;;  %v2039_v11 = vpop.permute.xlu0 %2038 }
 0x3a1   : > { %v5574_v37 = vpop.eup %5573  ;;  %v3758_v10 = vadd.f32 1.0, %v5572_v8  ;;  %5591 = vpow2.f32 %v3732_v43  ;;  %2111 = vst.msk [vmem:[%s6169_s18 + $0xc0] sm:$0xff] %vm2086_vm3, %v2039_v11 }
 0x3a2   : > { %v5576_v12 = vpop.eup %5575  ;;  %5593 = vpow2.f32 %v3730_v36  ;;  %v2041_v13 = vpop.permute.xlu1 %2040  ;;  %3900 = vrot.lane.b32.xlu1 %v5570_v27, %s5624_s22  ;;  %v3761_v14 = vadd.f32 1.0, %v5574_v37 }
 0x3a3   : > { %v5578_v28 = vpop.eup %5577  ;;  %5595 = vrcp.f32 %v3758_v10  ;;  %3898 = vrot.lane.b32.xlu0 %v5576_v12, %s5624_s22  ;;  %2112 = vst.msk [vmem:[%s6169_s18 + $0xc8] sm:$0xff] %vm2086_vm3, %v2041_v13 }
 0x3a4   : > { %5597 = vrcp.f32 %v3759_v9  ;;  %v3760_v15 = vadd.f32 1.0, %v5578_v28  ;;  %v2043_v29 = vpop.permute.xlu0 %2042 }
 0x3a5   : > { %v5580_v16 = vpop.eup %5579  ;;  %2113 = vst.msk [vmem:[%s6169_s18 + $0xd0] sm:$0xff] %vm2086_vm3, %v2043_v29 }
 0x3a6   : > { %v5582_v38 = vpop.eup %5581  ;;  %5599 = vrcp.f32 %v3760_v15  ;;  %v2045_v4 = vpop.permute.xlu1 %2044 }
 0x3a7   : > { %v5584_v17 = vpop.eup %5583  ;;  %3902 = vrot.lane.b32.xlu0 %v5580_v16, %s5624_s22  ;;  %2114 = vst.msk [vmem:[%s6169_s18 + $0xd8] sm:$0xff] %vm2086_vm3, %v2045_v4  ;;  %3904 = vrot.lane.b32.xlu1 %v5582_v38, %s5624_s22  ;;  %5601 = vrcp.f32 %v3761_v14 }
 0x3a8   : > { %v5586_v5 = vpop.eup %5585  ;;  %v3763_v30 = vadd.f32 1.0, %v5584_v17  ;;  %v2047_v6 = vpop.permute.xlu0 %2046 }
 0x3a9   : > { %v5588_v18 = vpop.eup %5587  ;;  %v3762_v19 = vadd.f32 1.0, %v5586_v5  ;;  %2115 = vst.msk [vmem:[%s6169_s18 + $0xe0] sm:$0xff] %vm2086_vm3, %v2047_v6 }
 0x3aa   : > { %v5590_v39 = vpop.eup %5589  ;;  %v2049_v31 = vpop.permute.xlu1 %2048 }
 0x3ab   : > { %v5592_v40 = vpop.eup %5591  ;;  %5603 = vrcp.f32 %v3762_v19  ;;  %3906 = vrot.lane.b32.xlu0 %v5588_v18, %s5624_s22  ;;  %2116 = vst.msk [vmem:[%s6169_s18 + $0xe8] sm:$0xff] %vm2086_vm3, %v2049_v31  ;;  %3908 = vrot.lane.b32.xlu1 %v5590_v39, %s5624_s22 }
 0x3ac   : > { %v5594_v42 = vpop.eup %5593  ;;  %5605 = vrcp.f32 %v3763_v30  ;;  %v3765_v44 = vadd.f32 1.0, %v5592_v40  ;;  %v2051_v46 = vpop.permute.xlu0 %2050 }
 0x3ad   : > { %v5596_v20 = vpop.eup %5595  ;;  %v3764_v21 = vadd.f32 1.0, %v5594_v42  ;;  %2117 = vst.msk [vmem:[%s6169_s18 + $0xf0] sm:$0xff] %vm2086_vm3, %v2051_v46 }
 0x3ae   : > { %v5598_v47 = vpop.eup %5597  ;;  %v2053_v48 = vpop.permute.xlu1 %2052 }
 0x3af   : > { %5607 = vrcp.f32 %v3764_v21  ;;  %3910 = vrot.lane.b32.xlu0 %v5596_v20, %s5624_s22  ;;  %2118 = vst.msk [vmem:[%s6169_s18 + $0xf8] sm:$0xff] %vm2086_vm3, %v2053_v48  ;;  %3912 = vrot.lane.b32.xlu1 %v5598_v47, %s5624_s22 }
 0x3b0   : > { %v5600_v32 = vpop.eup %5599  ;;  %5609 = vrcp.f32 %v3765_v44  ;;  %v2927_v7 = vpop.permute.xlu0 %2926 }
 0x3b1   : > { %v5602_v49 = vpop.eup %5601  ;;  %3023 = vst.msk [vmem:[%s6169_s18] sm:$0xff] %vm3022_vm4, %v2927_v7 }
 0x3b2   : > { %v2929_v50 = vpop.permute.xlu1 %2928 }
 0x3b3   : > { %3914 = vrot.lane.b32.xlu0 %v5600_v32, %s5624_s22  ;;  %3024 = vst.msk [vmem:[%s6169_s18 + $0x8] sm:$0xff] %vm3022_vm4, %v2929_v50  ;;  %3916 = vrot.lane.b32.xlu1 %v5602_v49, %s5624_s22 }
 0x3b4   : > { %v2931_v33 = vpop.permute.xlu0 %2930 }
 0x3b5   : > { %v5604_v22 = vpop.eup %5603  ;;  %3025 = vst.msk [vmem:[%s6169_s18 + $0x10] sm:$0xff] %vm3022_vm4, %v2931_v33 }
 0x3b6   : > { %v5606_v23 = vpop.eup %5605  ;;  %v2933_v51 = vpop.permute.xlu1 %2932 }
 0x3b7   : > { %3918 = vrot.lane.b32.xlu0 %v5604_v22, %s5624_s22  ;;  %3026 = vst.msk [vmem:[%s6169_s18 + $0x18] sm:$0xff] %vm3022_vm4, %v2933_v51  ;;  %3920 = vrot.lane.b32.xlu1 %v5606_v23, %s5624_s22 }
 0x3b8   : > { %v2935_v53 = vpop.permute.xlu0 %2934 }
 0x3b9   : > { %v5608_v52 = vpop.eup %5607  ;;  %3027 = vst.msk [vmem:[%s6169_s18 + $0x20] sm:$0xff] %vm3022_vm4, %v2935_v53 }
 0x3ba   : > { %v5610_v54 = vpop.eup %5609  ;;  %v2937_v55 = vpop.permute.xlu1 %2936 }
 0x3bb   : > { %3922 = vrot.lane.b32.xlu0 %v5608_v52, %s5624_s22  ;;  %3028 = vst.msk [vmem:[%s6169_s18 + $0x28] sm:$0xff] %vm3022_vm4, %v2937_v55  ;;  %3924 = vrot.lane.b32.xlu1 %v5610_v54, %s5624_s22 }
 0x3bc   : > { %v2939_v56 = vpop.permute.xlu0 %2938 }
 0x3bd   : > { %3029 = vst.msk [vmem:[%s6169_s18 + $0x30] sm:$0xff] %vm3022_vm4, %v2939_v56 }
 0x3be   : > { %v2941_v24 = vpop.permute.xlu1 %2940 }
 0x3bf   : > { %3030 = vst.msk [vmem:[%s6169_s18 + $0x38] sm:$0xff] %vm3022_vm4, %v2941_v24 }
 0x3c0   : > { %v2943_v57 = vpop.permute.xlu0 %2942 }
 0x3c1   : > { %3031 = vst.msk [vmem:[%s6169_s18 + $0x40] sm:$0xff] %vm3022_vm4, %v2943_v57 }
 0x3c2   : > { %v2945_v41 = vpop.permute.xlu1 %2944 }
 0x3c3   : > { %3032 = vst.msk [vmem:[%s6169_s18 + $0x48] sm:$0xff] %vm3022_vm4, %v2945_v41 }
 0x3c4   : > { %v2947_v34 = vpop.permute.xlu0 %2946 }
 0x3c5   : > { %3033 = vst.msk [vmem:[%s6169_s18 + $0x50] sm:$0xff] %vm3022_vm4, %v2947_v34 }
 0x3c6   : > { %v2949_v58 = vpop.permute.xlu1 %2948 }
 0x3c7   : > { %3034 = vst.msk [vmem:[%s6169_s18 + $0x58] sm:$0xff] %vm3022_vm4, %v2949_v58 }
 0x3c8   : > { %v2951_v59 = vpop.permute.xlu0 %2950 }
 0x3c9   : > { %3035 = vst.msk [vmem:[%s6169_s18 + $0x60] sm:$0xff] %vm3022_vm4, %v2951_v59 }
 0x3ca   : > { %v2953_v25 = vpop.permute.xlu1 %2952 }
 0x3cb   : > { %3036 = vst.msk [vmem:[%s6169_s18 + $0x68] sm:$0xff] %vm3022_vm4, %v2953_v25 }
 0x3cc   : > { %v2955_v60 = vpop.permute.xlu0 %2954 }
 0x3cd   : > { %3037 = vst.msk [vmem:[%s6169_s18 + $0x70] sm:$0xff] %vm3022_vm4, %v2955_v60 }
 0x3ce   : > { %v2957_v35 = vpop.permute.xlu1 %2956 }
 0x3cf   : > { %3038 = vst.msk [vmem:[%s6169_s18 + $0x78] sm:$0xff] %vm3022_vm4, %v2957_v35 }
 0x3d0   : > { %v2959_v61 = vpop.permute.xlu0 %2958 }
 0x3d1   : > { %3039 = vst.msk [vmem:[%s6169_s18 + $0x80] sm:$0xff] %vm3022_vm4, %v2959_v61 }
 0x3d2   : > { %v2961_v45 = vpop.permute.xlu1 %2960 }
 0x3d3   : > { %3040 = vst.msk [vmem:[%s6169_s18 + $0x88] sm:$0xff] %vm3022_vm4, %v2961_v45 }
 0x3d4   : > { %v2963_v62 = vpop.permute.xlu0 %2962 }
 0x3d5   : > { %3041 = vst.msk [vmem:[%s6169_s18 + $0x90] sm:$0xff] %vm3022_vm4, %v2963_v62 }
 0x3d6   : > { %v2965_v63 = vpop.permute.xlu1 %2964 }
 0x3d7   : > { %3042 = vst.msk [vmem:[%s6169_s18 + $0x98] sm:$0xff] %vm3022_vm4, %v2965_v63 }
 0x3d8   : > { %v2967_v0 = vpop.permute.xlu0 %2966 }
 0x3d9   : > { %3043 = vst.msk [vmem:[%s6169_s18 + $0xa0] sm:$0xff] %vm3022_vm4, %v2967_v0 }
 0x3da   : > { %v2969_v26 = vpop.permute.xlu1 %2968 }
 0x3db   : > { %3044 = vst.msk [vmem:[%s6169_s18 + $0xa8] sm:$0xff] %vm3022_vm4, %v2969_v26 }
 0x3dc   : > { %v2971_v43 = vpop.permute.xlu0 %2970 }
 0x3dd   : > { %3045 = vst.msk [vmem:[%s6169_s18 + $0xb0] sm:$0xff] %vm3022_vm4, %v2971_v43 }
 0x3de   : > { %v2973_v2 = vpop.permute.xlu1 %2972 }
 0x3df   : > { %3046 = vst.msk [vmem:[%s6169_s18 + $0xb8] sm:$0xff] %vm3022_vm4, %v2973_v2 }
 0x3e0   : > { %v2975_v1 = vpop.permute.xlu0 %2974 }
 0x3e1   : > { %3047 = vst.msk [vmem:[%s6169_s18 + $0xc0] sm:$0xff] %vm3022_vm4, %v2975_v1 }
 0x3e2   : > { %v2977_v36 = vpop.permute.xlu1 %2976 }
 0x3e3   : > { %3048 = vst.msk [vmem:[%s6169_s18 + $0xc8] sm:$0xff] %vm3022_vm4, %v2977_v36 }
 0x3e4   : > { %v2979_v3 = vpop.permute.xlu0 %2978 }
 0x3e5   : > { %3049 = vst.msk [vmem:[%s6169_s18 + $0xd0] sm:$0xff] %vm3022_vm4, %v2979_v3 }
 0x3e6   : > { %v2981_v27 = vpop.permute.xlu1 %2980 }
 0x3e7   : > { %3050 = vst.msk [vmem:[%s6169_s18 + $0xd8] sm:$0xff] %vm3022_vm4, %v2981_v27 }
 0x3e8   : > { %v2983_v8 = vpop.permute.xlu0 %2982 }
 0x3e9   : > { %3051 = vst.msk [vmem:[%s6169_s18 + $0xe0] sm:$0xff] %vm3022_vm4, %v2983_v8 }
 0x3ea   : > { %v2985_v9 = vpop.permute.xlu1 %2984 }
 0x3eb   : > { %3052 = vst.msk [vmem:[%s6169_s18 + $0xe8] sm:$0xff] %vm3022_vm4, %v2985_v9 }
 0x3ec   : > { %v2987_v37 = vpop.permute.xlu0 %2986 }
 0x3ed   : > { %3053 = vst.msk [vmem:[%s6169_s18 + $0xf0] sm:$0xff] %vm3022_vm4, %v2987_v37 }
 0x3ee   : > { %v2989_v10 = vpop.permute.xlu1 %2988 }
 0x3ef   : > { %3054 = vst.msk [vmem:[%s6169_s18 + $0xf8] sm:$0xff] %vm3022_vm4, %v2989_v10 }
 0x3f0   : > { %v3863_v11 = vpop.permute.xlu0 %3862 }
 0x3f1   : > { %3959 = vst.msk [vmem:[%s6169_s18] sm:$0xff] %vm3958_vm5, %v3863_v11 }
 0x3f2   : > { %v3865_v12 = vpop.permute.xlu1 %3864 }
 0x3f3   : > { %3960 = vst.msk [vmem:[%s6169_s18 + $0x8] sm:$0xff] %vm3958_vm5, %v3865_v12 }
 0x3f4   : > { %v3867_v13 = vpop.permute.xlu0 %3866 }
 0x3f5   : > { %3961 = vst.msk [vmem:[%s6169_s18 + $0x10] sm:$0xff] %vm3958_vm5, %v3867_v13 }
 0x3f6   : > { %v3869_v28 = vpop.permute.xlu1 %3868 }
 0x3f7   : > { %3962 = vst.msk [vmem:[%s6169_s18 + $0x18] sm:$0xff] %vm3958_vm5, %v3869_v28 }
 0x3f8   : > { %v3871_v14 = vpop.permute.xlu0 %3870 }
 0x3f9   : > { %3963 = vst.msk [vmem:[%s6169_s18 + $0x20] sm:$0xff] %vm3958_vm5, %v3871_v14 }
 0x3fa   : > { %v3873_v15 = vpop.permute.xlu1 %3872 }
 0x3fb   : > { %3964 = vst.msk [vmem:[%s6169_s18 + $0x28] sm:$0xff] %vm3958_vm5, %v3873_v15 }
 0x3fd   : > { %v3875_v16 = vpop.permute.xlu0 %3874 }
 0x3fe   : > { %3965 = vst.msk [vmem:[%s6169_s18 + $0x30] sm:$0xff] %vm3958_vm5, %v3875_v16  ;;  %v3877_v29 = vpop.permute.xlu1 %3876 }
 0x3ff   : > { %3966 = vst.msk [vmem:[%s6169_s18 + $0x38] sm:$0xff] %vm3958_vm5, %v3877_v29 }
 0x401   : > { %v3879_v38 = vpop.permute.xlu0 %3878 }
 0x402   : > { %3967 = vst.msk [vmem:[%s6169_s18 + $0x40] sm:$0xff] %vm3958_vm5, %v3879_v38  ;;  %v3881_v4 = vpop.permute.xlu1 %3880 }
 0x403   : > { %3968 = vst.msk [vmem:[%s6169_s18 + $0x48] sm:$0xff] %vm3958_vm5, %v3881_v4 }
 0x405   : > { %v3883_v17 = vpop.permute.xlu0 %3882 }
 0x406   : > { %3969 = vst.msk [vmem:[%s6169_s18 + $0x50] sm:$0xff] %vm3958_vm5, %v3883_v17  ;;  %v3885_v5 = vpop.permute.xlu1 %3884 }
 0x407   : > { %3970 = vst.msk [vmem:[%s6169_s18 + $0x58] sm:$0xff] %vm3958_vm5, %v3885_v5 }
 0x409   : > { %v3887_v30 = vpop.permute.xlu0 %3886 }
 0x40a   : > { %3971 = vst.msk [vmem:[%s6169_s18 + $0x60] sm:$0xff] %vm3958_vm5, %v3887_v30  ;;  %v3889_v18 = vpop.permute.xlu1 %3888 }
 0x40b   : > { %3972 = vst.msk [vmem:[%s6169_s18 + $0x68] sm:$0xff] %vm3958_vm5, %v3889_v18 }
 0x40d   : > { %v3891_v19 = vpop.permute.xlu0 %3890 }
 0x40e   : > { %3973 = vst.msk [vmem:[%s6169_s18 + $0x70] sm:$0xff] %vm3958_vm5, %v3891_v19  ;;  %v3893_v6 = vpop.permute.xlu1 %3892 }
 0x40f   : > { %3974 = vst.msk [vmem:[%s6169_s18 + $0x78] sm:$0xff] %vm3958_vm5, %v3893_v6 }
 0x411   : > { %v3895_v39 = vpop.permute.xlu0 %3894 }
 0x412   : > { %3975 = vst.msk [vmem:[%s6169_s18 + $0x80] sm:$0xff] %vm3958_vm5, %v3895_v39  ;;  %v3897_v31 = vpop.permute.xlu1 %3896 }
 0x413   : > { %3976 = vst.msk [vmem:[%s6169_s18 + $0x88] sm:$0xff] %vm3958_vm5, %v3897_v31 }
 0x415   : > { %v3899_v40 = vpop.permute.xlu0 %3898 }
 0x416   : > { %3977 = vst.msk [vmem:[%s6169_s18 + $0x90] sm:$0xff] %vm3958_vm5, %v3899_v40  ;;  %v3901_v42 = vpop.permute.xlu1 %3900 }
 0x417   : > { %3978 = vst.msk [vmem:[%s6169_s18 + $0x98] sm:$0xff] %vm3958_vm5, %v3901_v42 }
 0x419   : > { %v3903_v44 = vpop.permute.xlu0 %3902 }
 0x41a   : > { %3979 = vst.msk [vmem:[%s6169_s18 + $0xa0] sm:$0xff] %vm3958_vm5, %v3903_v44  ;;  %v3905_v20 = vpop.permute.xlu1 %3904 }
 0x41b   : > { %3980 = vst.msk [vmem:[%s6169_s18 + $0xa8] sm:$0xff] %vm3958_vm5, %v3905_v20 }
 0x41d   : > { %v3907_v21 = vpop.permute.xlu0 %3906 }
 0x41e   : > { %3981 = vst.msk [vmem:[%s6169_s18 + $0xb0] sm:$0xff] %vm3958_vm5, %v3907_v21  ;;  %v3909_v46 = vpop.permute.xlu1 %3908 }
 0x41f   : > { %3982 = vst.msk [vmem:[%s6169_s18 + $0xb8] sm:$0xff] %vm3958_vm5, %v3909_v46 }
 0x421   : > { %v3911_v47 = vpop.permute.xlu0 %3910 }
 0x422   : > { %3983 = vst.msk [vmem:[%s6169_s18 + $0xc0] sm:$0xff] %vm3958_vm5, %v3911_v47  ;;  %v3913_v48 = vpop.permute.xlu1 %3912 }
 0x423   : > { %3984 = vst.msk [vmem:[%s6169_s18 + $0xc8] sm:$0xff] %vm3958_vm5, %v3913_v48 }
 0x425   : > { %v3915_v32 = vpop.permute.xlu0 %3914 }
 0x426   : > { %3985 = vst.msk [vmem:[%s6169_s18 + $0xd0] sm:$0xff] %vm3958_vm5, %v3915_v32  ;;  %v3917_v7 = vpop.permute.xlu1 %3916 }
 0x427   : > { %3986 = vst.msk [vmem:[%s6169_s18 + $0xd8] sm:$0xff] %vm3958_vm5, %v3917_v7 }
 0x429   : > { %v3919_v49 = vpop.permute.xlu0 %3918 }
 0x42a   : > { %3987 = vst.msk [vmem:[%s6169_s18 + $0xe0] sm:$0xff] %vm3958_vm5, %v3919_v49  ;;  %v3921_v50 = vpop.permute.xlu1 %3920 }
 0x42b   : > { %3988 = vst.msk [vmem:[%s6169_s18 + $0xe8] sm:$0xff] %vm3958_vm5, %v3921_v50 }
 0x42d   : > { %v3923_v22 = vpop.permute.xlu0 %3922 }
 0x42e   : > { %3989 = vst.msk [vmem:[%s6169_s18 + $0xf0] sm:$0xff] %vm3958_vm5, %v3923_v22  ;;  %v3925_v33 = vpop.permute.xlu1 %3924 }
 0x42f   : > { %3990 = vst.msk [vmem:[%s6169_s18 + $0xf8] sm:$0xff] %vm3958_vm5, %v3925_v33 }
 0x430 PF: > { %s17_s20 = sadd.s32 1, %s5620_s20  }
 0x431   : > { %p14_p4 = scmp.ge.s32.totalorder %s17_s20, 4  }
 0x433   :  { %16 = sbr.rel (!%p14_p4) target bundleno = 3 (0x3), region = 73 }

</bundles_post_ra>
